<compile_context>
chip_gen: v5e
topology: v5e:2x2
jax: 0.10.0
libtpu: 0.0.40
codegen_flags: <defaults>
</compile_context>

<pallas_src>
import functools
import math

import jax
import jax.numpy as jnp
from jax import lax
from jax.experimental import pallas as pl
from jax.experimental.pallas import tpu as pltpu


# ------------------------------ in-kernel helpers ---------------------------

def _layernorm(h, g, b, eps):
    mu = jnp.mean(h, axis=-1, keepdims=True)
    var = jnp.mean((h - mu) * (h - mu), axis=-1, keepdims=True)
    return (h - mu) * lax.rsqrt(var + eps) * g + b


def _gelu_tanh(y):
    c = 0.7978845608028654  # sqrt(2/pi)
    return 0.5 * y * (1.0 + jnp.tanh(c * (y + 0.044715 * y * y * y)))


# --------------------------- fused encoder-layer kernel ----------------------

def _encoder_layer_kernel(lens_ref,                      # scalar prefetch (SMEM): [B] int32
                          x_ref,                         # (B*S, H) f32 activations
                          ing_ref, inb_ref,              # (1, H) f32 input-LN (emb LN, layer 0)
                          wqkv_ref, bqkv_ref,            # (H, 3H) bf16, (1, 3H) f32 (Q pre-scaled)
                          wo_ref, bo_ref,                # (H, H) bf16, (1, H) f32
                          ln1g_ref, ln1b_ref,            # (1, H) f32
                          w1_ref, b1_ref,                # (H, I) bf16, (1, I) f32
                          w2_ref, b2_ref,                # (I, H) bf16, (1, H) f32
                          ln2g_ref, ln2b_ref,            # (1, H) f32
                          o_ref,                         # (B*S, H) f32
                          *, batch, seq, num_heads, head_dim, eps, apply_input_ln):
    M, H = x_ref.shape
    x = x_ref[...]                                                     # (M, H) f32

    # --- (layer 0 only) fused embedding LayerNorm ---
    if apply_input_ln:
        x = _layernorm(x, ing_ref[...], inb_ref[...], eps)

    # --- fused Q|K|V projection over ALL rows: one bf16 MXU pass, f32 accumulation.
    #     softmax scale is already folded into the Q columns of wqkv/bqkv. ---
    qkv = jnp.dot(x.astype(jnp.bfloat16), wqkv_ref[...],
                  preferred_element_type=jnp.float32) + bqkv_ref[...]  # (M, 3H) f32

    # --- per-batch attention; the multi-head merge is folded into the output projection:
    #     each head's P.V goes through its own row-slab of wo and is accumulated into a
    #     lane-dense (S, H) f32 buffer (no lane-offset concat). ---
    attn_blocks = []
    for b in range(batch):                               # static toy batch; see TODO for 12 heads
        r0 = b * seq
        valid = lens_ref[b]
        key_pos = lax.broadcasted_iota(jnp.int32, (1, seq), 1)
        mask_add = jnp.where(key_pos < valid, 0.0, -10000.0).astype(jnp.float32)

        acc = None                                       # (S, H) f32 projected-context accumulator
        for h in range(num_heads):
            lo = h * head_dim
            q = qkv[r0:r0 + seq, lo:lo + head_dim].astype(jnp.bfloat16)           # (S, DH)
            k = qkv[r0:r0 + seq, H + lo:H + lo + head_dim].astype(jnp.bfloat16)   # (S, DH)
            v = qkv[r0:r0 + seq, 2 * H + lo:2 * H + lo + head_dim].astype(jnp.bfloat16)
            s = lax.dot_general(q, k, (((1,), (1,)), ((), ())),
                                preferred_element_type=jnp.float32)               # (S, S) f32
            s = s + mask_add
            m = jnp.max(s, axis=-1, keepdims=True)
            e = jnp.exp(s - m)
            denom = jnp.sum(e, axis=-1, keepdims=True)
            pv = jnp.dot(e.astype(jnp.bfloat16), v,
                         preferred_element_type=jnp.float32)                      # (S, DH)
            pv = pv * pl.reciprocal(denom, approx=True)
            contrib = jnp.dot(pv.astype(jnp.bfloat16), wo_ref[lo:lo + head_dim, :],
                              preferred_element_type=jnp.float32)                 # (S, H)
            acc = contrib if acc is None else acc + contrib
        attn_blocks.append(acc)

    attn = attn_blocks[0] if batch == 1 else jnp.concatenate(attn_blocks, axis=0)  # sublane stack

    # --- attention output bias + residual + LayerNorm (all rows) ---
    x1 = _layernorm(attn + bo_ref[...] + x, ln1g_ref[...], ln1b_ref[...], eps)

    # --- FFN (w1 + GELU + w2) + residual + LayerNorm (all rows) ---
    h1 = jnp.dot(x1.astype(jnp.bfloat16), w1_ref[...],
                 preferred_element_type=jnp.float32) + b1_ref[...]
    h1 = _gelu_tanh(h1)
    h2 = jnp.dot(h1.astype(jnp.bfloat16), w2_ref[...],
                 preferred_element_type=jnp.float32) + b2_ref[...]
    o_ref[...] = _layernorm(h2 + x1, ln2g_ref[...], ln2b_ref[...], eps)


def encoder_layer(x, lens, p, cfg, B, S, input_ln=None):
    H, I, NH = cfg["hidden"], cfg["intermediate"], cfg["heads"]
    DH = H // NH
    M = B * S
    apply_input_ln = input_ln is not None
    if apply_input_ln:
        in_g, in_b = input_ln
    else:  # unused dummies (static flag skips the LN); tiny (1, H) DMAs
        in_g = jnp.ones((1, H), jnp.float32)
        in_b = jnp.zeros((1, H), jnp.float32)

    def full(shape):
        return pl.BlockSpec(shape, lambda i, lens_ref: (0,) * len(shape))

    grid_spec = pltpu.PrefetchScalarGridSpec(
        num_scalar_prefetch=1,
        grid=(1,),                      # toy config: one fat step (see TODO for real sizes)
        in_specs=[
            full((M, H)),               # x (all rows)
            full((1, H)), full((1, H)),                 # input LN gamma/beta (layer 0)
            full((H, 3 * H)), full((1, 3 * H)),          # wqkv, bqkv
            full((H, H)), full((1, H)),                  # wo, bo
            full((1, H)), full((1, H)),                  # ln1 gamma/beta
            full((H, I)), full((1, I)),                  # w1, b1
            full((I, H)), full((1, H)),                  # w2, b2
            full((1, H)), full((1, H)),                  # ln2 gamma/beta
        ],
        out_specs=pl.BlockSpec((M, H), lambda i, lens_ref: (0, 0)),
    )
    return pl.pallas_call(
        functools.partial(_encoder_layer_kernel,
                          batch=B, seq=S, num_heads=NH, head_dim=DH,
                          eps=1e-12, apply_input_ln=apply_input_ln),
        out_shape=jax.ShapeDtypeStruct((M, H), jnp.float32),
        grid_spec=grid_spec,
        compiler_params=pltpu.CompilerParams(dimension_semantics=("arbitrary",)),
    )(lens, x, in_g, in_b,
      p["wqkv"], p["bqkv"], p["wo"], p["bo"], p["ln1_g"], p["ln1_b"],
      p["w1"], p["b1"], p["w2"], p["b2"], p["ln2_g"], p["ln2_b"])


# ------------------------ parameter init (synthetic) -------------------------

CFG = dict(vocab=64, hidden=128, heads=2, layers=2, intermediate=256,
           max_pos=16, type_vocab=2)


def init_params(key, cfg):
    H, I = cfg["hidden"], cfg["intermediate"]
    keys = iter(jax.random.split(key, 64))
    n = lambda shape: 0.02 * jax.random.normal(next(keys), shape, jnp.float32)
    params = {
        "word_emb": n((cfg["vocab"], H)),
        "pos_emb": n((cfg["max_pos"], H)),
        "type_emb": n((cfg["type_vocab"], H)),
        "emb_ln_g": jnp.ones((H,), jnp.float32),
        "emb_ln_b": jnp.zeros((H,), jnp.float32),
        "layers": [],
    }
    for _ in range(cfg["layers"]):
        params["layers"].append({
            "wq": n((H, H)), "bq": jnp.zeros((H,), jnp.float32),
            "wk": n((H, H)), "bk": jnp.zeros((H,), jnp.float32),
            "wv": n((H, H)), "bv": jnp.zeros((H,), jnp.float32),
            "wo": n((H, H)), "bo": jnp.zeros((H,), jnp.float32),
            "ln1_g": jnp.ones((H,), jnp.float32),
            "ln1_b": jnp.zeros((H,), jnp.float32),
            "w1": n((H, I)), "b1": jnp.zeros((I,), jnp.float32),
            "w2": n((I, H)), "b2": jnp.zeros((H,), jnp.float32),
            "ln2_g": jnp.ones((H,), jnp.float32),
            "ln2_b": jnp.zeros((H,), jnp.float32),
        })
    return params


def prepare_params(raw, cfg=CFG):
    """One-time host-side prep: fuse Q|K|V, fold softmax scale into Q, cast matmul weights
    to bf16, reshape biases/LN params to (1, H)."""
    H, NH = cfg["hidden"], cfg["heads"]
    scale = 1.0 / math.sqrt(H // NH)
    prepared = {
        "word_emb": raw["word_emb"],
        "pos_emb": raw["pos_emb"],
        "type_emb": raw["type_emb"],
        "emb_ln_g": raw["emb_ln_g"].reshape(1, -1),
        "emb_ln_b": raw["emb_ln_b"].reshape(1, -1),
        "layers": [],
    }
    for p in raw["layers"]:
        prepared["layers"].append({
            "wqkv": jnp.concatenate([p["wq"] * scale, p["wk"], p["wv"]],
                                    axis=1).astype(jnp.bfloat16),
            "bqkv": jnp.concatenate([p["bq"] * scale, p["bk"], p["bv"]]).reshape(1, -1),
            "wo": p["wo"].astype(jnp.bfloat16), "bo": p["bo"].reshape(1, -1),
            "ln1_g": p["ln1_g"].reshape(1, -1), "ln1_b": p["ln1_b"].reshape(1, -1),
            "w1": p["w1"].astype(jnp.bfloat16), "b1": p["b1"].reshape(1, -1),
            "w2": p["w2"].astype(jnp.bfloat16), "b2": p["b2"].reshape(1, -1),
            "ln2_g": p["ln2_g"].reshape(1, -1), "ln2_b": p["ln2_b"].reshape(1, -1),
        })
    return prepared


# -------------------------------- forward pass --------------------------------

def bert_classifier_forward(params, sentence_ids, mask, cfg=CFG):
    B, S = sentence_ids.shape
    H = cfg["hidden"]

    # Embedding lookup is a gather -- plain-JAX glue; the embedding LayerNorm is fused
    # into the first encoder-layer kernel.
    word = jnp.take(params["word_emb"], sentence_ids, axis=0)        # [B, S, H]
    pos = params["pos_emb"][:S][None, :, :]                          # [1, S, H]
    tok = params["type_emb"][0][None, None, :]                       # token_type_ids = 0
    x = (word + pos + tok).reshape(B * S, H)

    # Per-batch valid lengths for the in-kernel attention mask (SMEM scalar prefetch).
    lens = jnp.sum(mask.astype(jnp.int32), axis=-1)                  # [B]

    for li, layer in enumerate(params["layers"]):
        input_ln = (params["emb_ln_g"], params["emb_ln_b"]) if li == 0 else None
        x = encoder_layer(x, lens, layer, cfg, B, S, input_ln=input_ln)

    x = x.reshape(B, S, H)
    return x[:, 0, :]                                                # CLS token


# ------------------------------------ main ------------------------------------

if __name__ == "__main__":
    key = jax.random.PRNGKey(0)
    k_param, k_ids = jax.random.split(key)

    B, S = 2, 8
    raw_params = init_params(k_param, CFG)
    params = prepare_params(raw_params)                  # fuse + fold scale + bf16-cast once
    sentence_ids = jax.random.randint(k_ids, (B, S), 0, CFG["vocab"], jnp.int32)
    mask = jnp.ones((B, S), jnp.int32).at[1, 6:].set(0)  # second sequence right-padded

    out = jax.jit(bert_classifier_forward)(params, sentence_ids, mask)
    jax.block_until_ready(out)
    assert out.shape == (B, CFG["hidden"]) and out.dtype == jnp.float32
    assert bool(jnp.all(jnp.isfinite(out)))
    print("KERNEL_OK")
</pallas_src>

<mosaic_0001>
module attributes {stable_mosaic.version = 11 : i64} {
  func.func @_encoder_layer_kernel(%arg0: i32, %arg1: memref<2xi32, #tpu.memory_space<smem>>, %arg2: memref<16x128xf32, #tpu.memory_space<vmem>>, %arg3: memref<1x128xf32, #tpu.memory_space<vmem>>, %arg4: memref<1x128xf32, #tpu.memory_space<vmem>>, %arg5: memref<128x384xbf16, #tpu.memory_space<vmem>>, %arg6: memref<1x384xf32, #tpu.memory_space<vmem>>, %arg7: memref<128x128xbf16, #tpu.memory_space<vmem>>, %arg8: memref<1x128xf32, #tpu.memory_space<vmem>>, %arg9: memref<1x128xf32, #tpu.memory_space<vmem>>, %arg10: memref<1x128xf32, #tpu.memory_space<vmem>>, %arg11: memref<128x256xbf16, #tpu.memory_space<vmem>>, %arg12: memref<1x256xf32, #tpu.memory_space<vmem>>, %arg13: memref<256x128xbf16, #tpu.memory_space<vmem>>, %arg14: memref<1x128xf32, #tpu.memory_space<vmem>>, %arg15: memref<1x128xf32, #tpu.memory_space<vmem>>, %arg16: memref<1x128xf32, #tpu.memory_space<vmem>>, %arg17: memref<16x128xf32, #tpu.memory_space<vmem>>) attributes {dimension_semantics = [#tpu.dimension_semantics<arbitrary>], iteration_bounds = array<i64: 1>, scalar_prefetch = 1 : i64, scratch_operands = 0 : i64, tpu.core_type = #tpu.core_type<tc>, window_params = [{pipeline_mode = #tpu.pipeline_mode<synchronous>, transform_indices = @transform_0, window_bounds = array<i64: 16, 128>}, {pipeline_mode = #tpu.pipeline_mode<synchronous>, transform_indices = @transform_1, window_bounds = array<i64: 1, 128>}, {pipeline_mode = #tpu.pipeline_mode<synchronous>, transform_indices = @transform_2, window_bounds = array<i64: 1, 128>}, {pipeline_mode = #tpu.pipeline_mode<synchronous>, transform_indices = @transform_3, window_bounds = array<i64: 128, 384>}, {pipeline_mode = #tpu.pipeline_mode<synchronous>, transform_indices = @transform_4, window_bounds = array<i64: 1, 384>}, {pipeline_mode = #tpu.pipeline_mode<synchronous>, transform_indices = @transform_5, window_bounds = array<i64: 128, 128>}, {pipeline_mode = #tpu.pipeline_mode<synchronous>, transform_indices = @transform_6, window_bounds = array<i64: 1, 128>}, {pipeline_mode = #tpu.pipeline_mode<synchronous>, transform_indices = @transform_7, window_bounds = array<i64: 1, 128>}, {pipeline_mode = #tpu.pipeline_mode<synchronous>, transform_indices = @transform_8, window_bounds = array<i64: 1, 128>}, {pipeline_mode = #tpu.pipeline_mode<synchronous>, transform_indices = @transform_9, window_bounds = array<i64: 128, 256>}, {pipeline_mode = #tpu.pipeline_mode<synchronous>, transform_indices = @transform_10, window_bounds = array<i64: 1, 256>}, {pipeline_mode = #tpu.pipeline_mode<synchronous>, transform_indices = @transform_11, window_bounds = array<i64: 256, 128>}, {pipeline_mode = #tpu.pipeline_mode<synchronous>, transform_indices = @transform_12, window_bounds = array<i64: 1, 128>}, {pipeline_mode = #tpu.pipeline_mode<synchronous>, transform_indices = @transform_13, window_bounds = array<i64: 1, 128>}, {pipeline_mode = #tpu.pipeline_mode<synchronous>, transform_indices = @transform_14, window_bounds = array<i64: 1, 128>}, {pipeline_mode = #tpu.pipeline_mode<synchronous>, transform_indices = @transform_15, window_bounds = array<i64: 16, 128>}]} {
    %c0 = arith.constant 0 : index
    %c0_0 = arith.constant 0 : index
    %0 = vector.load %arg2[%c0, %c0_0] : memref<16x128xf32, #tpu.memory_space<vmem>>, vector<16x128xf32>
    %c0_1 = arith.constant 0 : index
    %c0_2 = arith.constant 0 : index
    %1 = vector.load %arg3[%c0_1, %c0_2] : memref<1x128xf32, #tpu.memory_space<vmem>>, vector<1x128xf32>
    %c0_3 = arith.constant 0 : index
    %c0_4 = arith.constant 0 : index
    %2 = vector.load %arg4[%c0_3, %c0_4] : memref<1x128xf32, #tpu.memory_space<vmem>>, vector<1x128xf32>
    %cst = arith.constant dense<0.000000e+00> : vector<16xf32>
    %3 = vector.multi_reduction <add>, %0, %cst [1] : vector<16x128xf32> to vector<16xf32>
    %4 = vector.shape_cast %3 : vector<16xf32> to vector<16x1xf32>
    %cst_5 = arith.constant 1.280000e+02 : f32
    %5 = vector.broadcast %cst_5 : f32 to vector<16x1xf32>
    %6 = arith.divf %4, %5 : vector<16x1xf32>
    %7 = vector.broadcast %6 : vector<16x1xf32> to vector<16x128xf32>
    %8 = arith.subf %0, %7 : vector<16x128xf32>
    %9 = vector.broadcast %6 : vector<16x1xf32> to vector<16x128xf32>
    %10 = arith.subf %0, %9 : vector<16x128xf32>
    %11 = arith.mulf %8, %10 : vector<16x128xf32>
    %cst_6 = arith.constant dense<0.000000e+00> : vector<16xf32>
    %12 = vector.multi_reduction <add>, %11, %cst_6 [1] : vector<16x128xf32> to vector<16xf32>
    %13 = vector.shape_cast %12 : vector<16xf32> to vector<16x1xf32>
    %cst_7 = arith.constant 1.280000e+02 : f32
    %14 = vector.broadcast %cst_7 : f32 to vector<16x1xf32>
    %15 = arith.divf %13, %14 : vector<16x1xf32>
    %16 = vector.broadcast %6 : vector<16x1xf32> to vector<16x128xf32>
    %17 = arith.subf %0, %16 : vector<16x128xf32>
    %cst_8 = arith.constant 9.99999996E-13 : f32
    %18 = vector.broadcast %cst_8 : f32 to vector<16x1xf32>
    %19 = arith.addf %15, %18 : vector<16x1xf32>
    %20 = math.rsqrt %19 : vector<16x1xf32>
    %21 = vector.broadcast %20 : vector<16x1xf32> to vector<16x128xf32>
    %22 = arith.mulf %17, %21 : vector<16x128xf32>
    %23 = vector.broadcast %1 : vector<1x128xf32> to vector<16x128xf32>
    %24 = arith.mulf %22, %23 : vector<16x128xf32>
    %25 = vector.broadcast %2 : vector<1x128xf32> to vector<16x128xf32>
    %26 = arith.addf %24, %25 : vector<16x128xf32>
    %27 = arith.truncf %26 : vector<16x128xf32> to vector<16x128xbf16>
    %c0_9 = arith.constant 0 : index
    %c0_10 = arith.constant 0 : index
    %28 = vector.load %arg5[%c0_9, %c0_10] : memref<128x384xbf16, #tpu.memory_space<vmem>>, vector<128x384xbf16>
    %cst_11 = arith.constant dense<0.000000e+00> : vector<16x384xf32>
    %29 = tpu.matmul %27, %28, %cst_11 {dimension_numbers = #tpu.dot_dimension_numbers<[1], [0], [0], [1], [0, 0, 1, 1], [], []>} : vector<16x128xbf16>, vector<128x384xbf16>, vector<16x384xf32> -> vector<16x384xf32>
    %c0_12 = arith.constant 0 : index
    %c0_13 = arith.constant 0 : index
    %30 = vector.load %arg6[%c0_12, %c0_13] : memref<1x384xf32, #tpu.memory_space<vmem>>, vector<1x384xf32>
    %31 = vector.broadcast %30 : vector<1x384xf32> to vector<16x384xf32>
    %32 = arith.addf %29, %31 : vector<16x384xf32>
    %c0_14 = arith.constant 0 : index
    %33 = memref.load %arg1[%c0_14] : memref<2xi32, #tpu.memory_space<smem>>
    %34 = tpu.iota {dimensions = array<i32: 1>} : vector<1x8xi32>
    %35 = vector.broadcast %33 : i32 to vector<1x8xi32>
    %36 = arith.cmpi slt, %34, %35 : vector<1x8xi32>
    %cst_15 = arith.constant 0.000000e+00 : f32
    %cst_16 = arith.constant -1.000000e+04 : f32
    %37 = vector.broadcast %cst_15 : f32 to vector<1x8xf32>
    %38 = vector.broadcast %cst_16 : f32 to vector<1x8xf32>
    %39 = arith.select %36, %37, %38 : vector<1x8xi1>, vector<1x8xf32>
    %40 = vector.extract_strided_slice %32 {offsets = [0, 0], sizes = [8, 64], strides = [1, 1]} : vector<16x384xf32> to vector<8x64xf32>
    %41 = arith.truncf %40 : vector<8x64xf32> to vector<8x64xbf16>
    %42 = vector.extract_strided_slice %32 {offsets = [0, 128], sizes = [8, 64], strides = [1, 1]} : vector<16x384xf32> to vector<8x64xf32>
    %43 = arith.truncf %42 : vector<8x64xf32> to vector<8x64xbf16>
    %44 = vector.extract_strided_slice %32 {offsets = [0, 256], sizes = [8, 64], strides = [1, 1]} : vector<16x384xf32> to vector<8x64xf32>
    %45 = arith.truncf %44 : vector<8x64xf32> to vector<8x64xbf16>
    %cst_17 = arith.constant dense<0.000000e+00> : vector<8x8xf32>
    %46 = tpu.matmul %41, %43, %cst_17 {dimension_numbers = #tpu.dot_dimension_numbers<[1], [1], [0], [0], [0, 0, 1, 0], [], []>} : vector<8x64xbf16>, vector<8x64xbf16>, vector<8x8xf32> -> vector<8x8xf32>
    %47 = vector.broadcast %39 : vector<1x8xf32> to vector<8x8xf32>
    %48 = arith.addf %46, %47 : vector<8x8xf32>
    %cst_18 = arith.constant dense<0xFF800000> : vector<8xf32>
    %49 = vector.multi_reduction <maximumf>, %48, %cst_18 [1] : vector<8x8xf32> to vector<8xf32>
    %50 = vector.shape_cast %49 : vector<8xf32> to vector<8x1xf32>
    %51 = vector.broadcast %50 : vector<8x1xf32> to vector<8x8xf32>
    %52 = arith.subf %48, %51 : vector<8x8xf32>
    %53 = math.exp %52 : vector<8x8xf32>
    %cst_19 = arith.constant dense<0.000000e+00> : vector<8xf32>
    %54 = vector.multi_reduction <add>, %53, %cst_19 [1] : vector<8x8xf32> to vector<8xf32>
    %55 = vector.shape_cast %54 : vector<8xf32> to vector<8x1xf32>
    %56 = arith.truncf %53 : vector<8x8xf32> to vector<8x8xbf16>
    %cst_20 = arith.constant dense<0.000000e+00> : vector<8x64xf32>
    %57 = tpu.matmul %56, %45, %cst_20 {dimension_numbers = #tpu.dot_dimension_numbers<[1], [0], [0], [1], [0, 0, 1, 1], [], []>} : vector<8x8xbf16>, vector<8x64xbf16>, vector<8x64xf32> -> vector<8x64xf32>
    %58 = tpu.reciprocal %55 {approx = true} : vector<8x1xf32> -> vector<8x1xf32>
    %59 = vector.broadcast %58 : vector<8x1xf32> to vector<8x64xf32>
    %60 = arith.mulf %57, %59 : vector<8x64xf32>
    %61 = arith.truncf %60 : vector<8x64xf32> to vector<8x64xbf16>
    %c0_21 = arith.constant 0 : index
    %c0_22 = arith.constant 0 : index
    %62 = vector.load %arg7[%c0_21, %c0_22] : memref<128x128xbf16, #tpu.memory_space<vmem>>, vector<64x128xbf16>
    %cst_23 = arith.constant dense<0.000000e+00> : vector<8x128xf32>
    %63 = tpu.matmul %61, %62, %cst_23 {dimension_numbers = #tpu.dot_dimension_numbers<[1], [0], [0], [1], [0, 0, 1, 1], [], []>} : vector<8x64xbf16>, vector<64x128xbf16>, vector<8x128xf32> -> vector<8x128xf32>
    %64 = vector.extract_strided_slice %32 {offsets = [0, 64], sizes = [8, 64], strides = [1, 1]} : vector<16x384xf32> to vector<8x64xf32>
    %65 = arith.truncf %64 : vector<8x64xf32> to vector<8x64xbf16>
    %66 = vector.extract_strided_slice %32 {offsets = [0, 192], sizes = [8, 64], strides = [1, 1]} : vector<16x384xf32> to vector<8x64xf32>
    %67 = arith.truncf %66 : vector<8x64xf32> to vector<8x64xbf16>
    %68 = vector.extract_strided_slice %32 {offsets = [0, 320], sizes = [8, 64], strides = [1, 1]} : vector<16x384xf32> to vector<8x64xf32>
    %69 = arith.truncf %68 : vector<8x64xf32> to vector<8x64xbf16>
    %cst_24 = arith.constant dense<0.000000e+00> : vector<8x8xf32>
    %70 = tpu.matmul %65, %67, %cst_24 {dimension_numbers = #tpu.dot_dimension_numbers<[1], [1], [0], [0], [0, 0, 1, 0], [], []>} : vector<8x64xbf16>, vector<8x64xbf16>, vector<8x8xf32> -> vector<8x8xf32>
    %71 = vector.broadcast %39 : vector<1x8xf32> to vector<8x8xf32>
    %72 = arith.addf %70, %71 : vector<8x8xf32>
    %cst_25 = arith.constant dense<0xFF800000> : vector<8xf32>
    %73 = vector.multi_reduction <maximumf>, %72, %cst_25 [1] : vector<8x8xf32> to vector<8xf32>
    %74 = vector.shape_cast %73 : vector<8xf32> to vector<8x1xf32>
    %75 = vector.broadcast %74 : vector<8x1xf32> to vector<8x8xf32>
    %76 = arith.subf %72, %75 : vector<8x8xf32>
    %77 = math.exp %76 : vector<8x8xf32>
    %cst_26 = arith.constant dense<0.000000e+00> : vector<8xf32>
    %78 = vector.multi_reduction <add>, %77, %cst_26 [1] : vector<8x8xf32> to vector<8xf32>
    %79 = vector.shape_cast %78 : vector<8xf32> to vector<8x1xf32>
    %80 = arith.truncf %77 : vector<8x8xf32> to vector<8x8xbf16>
    %cst_27 = arith.constant dense<0.000000e+00> : vector<8x64xf32>
    %81 = tpu.matmul %80, %69, %cst_27 {dimension_numbers = #tpu.dot_dimension_numbers<[1], [0], [0], [1], [0, 0, 1, 1], [], []>} : vector<8x8xbf16>, vector<8x64xbf16>, vector<8x64xf32> -> vector<8x64xf32>
    %82 = tpu.reciprocal %79 {approx = true} : vector<8x1xf32> -> vector<8x1xf32>
    %83 = vector.broadcast %82 : vector<8x1xf32> to vector<8x64xf32>
    %84 = arith.mulf %81, %83 : vector<8x64xf32>
    %85 = arith.truncf %84 : vector<8x64xf32> to vector<8x64xbf16>
    %c64 = arith.constant 64 : index
    %c0_28 = arith.constant 0 : index
    %86 = vector.load %arg7[%c64, %c0_28] : memref<128x128xbf16, #tpu.memory_space<vmem>>, vector<64x128xbf16>
    %cst_29 = arith.constant dense<0.000000e+00> : vector<8x128xf32>
    %87 = tpu.matmul %85, %86, %cst_29 {dimension_numbers = #tpu.dot_dimension_numbers<[1], [0], [0], [1], [0, 0, 1, 1], [], []>} : vector<8x64xbf16>, vector<64x128xbf16>, vector<8x128xf32> -> vector<8x128xf32>
    %88 = arith.addf %63, %87 : vector<8x128xf32>
    %c1 = arith.constant 1 : index
    %89 = memref.load %arg1[%c1] : memref<2xi32, #tpu.memory_space<smem>>
    %90 = tpu.iota {dimensions = array<i32: 1>} : vector<1x8xi32>
    %91 = vector.broadcast %89 : i32 to vector<1x8xi32>
    %92 = arith.cmpi slt, %90, %91 : vector<1x8xi32>
    %cst_30 = arith.constant 0.000000e+00 : f32
    %cst_31 = arith.constant -1.000000e+04 : f32
    %93 = vector.broadcast %cst_30 : f32 to vector<1x8xf32>
    %94 = vector.broadcast %cst_31 : f32 to vector<1x8xf32>
    %95 = arith.select %92, %93, %94 : vector<1x8xi1>, vector<1x8xf32>
    %96 = vector.extract_strided_slice %32 {offsets = [8, 0], sizes = [8, 64], strides = [1, 1]} : vector<16x384xf32> to vector<8x64xf32>
    %97 = arith.truncf %96 : vector<8x64xf32> to vector<8x64xbf16>
    %98 = vector.extract_strided_slice %32 {offsets = [8, 128], sizes = [8, 64], strides = [1, 1]} : vector<16x384xf32> to vector<8x64xf32>
    %99 = arith.truncf %98 : vector<8x64xf32> to vector<8x64xbf16>
    %100 = vector.extract_strided_slice %32 {offsets = [8, 256], sizes = [8, 64], strides = [1, 1]} : vector<16x384xf32> to vector<8x64xf32>
    %101 = arith.truncf %100 : vector<8x64xf32> to vector<8x64xbf16>
    %cst_32 = arith.constant dense<0.000000e+00> : vector<8x8xf32>
    %102 = tpu.matmul %97, %99, %cst_32 {dimension_numbers = #tpu.dot_dimension_numbers<[1], [1], [0], [0], [0, 0, 1, 0], [], []>} : vector<8x64xbf16>, vector<8x64xbf16>, vector<8x8xf32> -> vector<8x8xf32>
    %103 = vector.broadcast %95 : vector<1x8xf32> to vector<8x8xf32>
    %104 = arith.addf %102, %103 : vector<8x8xf32>
    %cst_33 = arith.constant dense<0xFF800000> : vector<8xf32>
    %105 = vector.multi_reduction <maximumf>, %104, %cst_33 [1] : vector<8x8xf32> to vector<8xf32>
    %106 = vector.shape_cast %105 : vector<8xf32> to vector<8x1xf32>
    %107 = vector.broadcast %106 : vector<8x1xf32> to vector<8x8xf32>
    %108 = arith.subf %104, %107 : vector<8x8xf32>
    %109 = math.exp %108 : vector<8x8xf32>
    %cst_34 = arith.constant dense<0.000000e+00> : vector<8xf32>
    %110 = vector.multi_reduction <add>, %109, %cst_34 [1] : vector<8x8xf32> to vector<8xf32>
    %111 = vector.shape_cast %110 : vector<8xf32> to vector<8x1xf32>
    %112 = arith.truncf %109 : vector<8x8xf32> to vector<8x8xbf16>
    %cst_35 = arith.constant dense<0.000000e+00> : vector<8x64xf32>
    %113 = tpu.matmul %112, %101, %cst_35 {dimension_numbers = #tpu.dot_dimension_numbers<[1], [0], [0], [1], [0, 0, 1, 1], [], []>} : vector<8x8xbf16>, vector<8x64xbf16>, vector<8x64xf32> -> vector<8x64xf32>
    %114 = tpu.reciprocal %111 {approx = true} : vector<8x1xf32> -> vector<8x1xf32>
    %115 = vector.broadcast %114 : vector<8x1xf32> to vector<8x64xf32>
    %116 = arith.mulf %113, %115 : vector<8x64xf32>
    %117 = arith.truncf %116 : vector<8x64xf32> to vector<8x64xbf16>
    %c0_36 = arith.constant 0 : index
    %c0_37 = arith.constant 0 : index
    %118 = vector.load %arg7[%c0_36, %c0_37] : memref<128x128xbf16, #tpu.memory_space<vmem>>, vector<64x128xbf16>
    %cst_38 = arith.constant dense<0.000000e+00> : vector<8x128xf32>
    %119 = tpu.matmul %117, %118, %cst_38 {dimension_numbers = #tpu.dot_dimension_numbers<[1], [0], [0], [1], [0, 0, 1, 1], [], []>} : vector<8x64xbf16>, vector<64x128xbf16>, vector<8x128xf32> -> vector<8x128xf32>
    %120 = vector.extract_strided_slice %32 {offsets = [8, 64], sizes = [8, 64], strides = [1, 1]} : vector<16x384xf32> to vector<8x64xf32>
    %121 = arith.truncf %120 : vector<8x64xf32> to vector<8x64xbf16>
    %122 = vector.extract_strided_slice %32 {offsets = [8, 192], sizes = [8, 64], strides = [1, 1]} : vector<16x384xf32> to vector<8x64xf32>
    %123 = arith.truncf %122 : vector<8x64xf32> to vector<8x64xbf16>
    %124 = vector.extract_strided_slice %32 {offsets = [8, 320], sizes = [8, 64], strides = [1, 1]} : vector<16x384xf32> to vector<8x64xf32>
    %125 = arith.truncf %124 : vector<8x64xf32> to vector<8x64xbf16>
    %cst_39 = arith.constant dense<0.000000e+00> : vector<8x8xf32>
    %126 = tpu.matmul %121, %123, %cst_39 {dimension_numbers = #tpu.dot_dimension_numbers<[1], [1], [0], [0], [0, 0, 1, 0], [], []>} : vector<8x64xbf16>, vector<8x64xbf16>, vector<8x8xf32> -> vector<8x8xf32>
    %127 = vector.broadcast %95 : vector<1x8xf32> to vector<8x8xf32>
    %128 = arith.addf %126, %127 : vector<8x8xf32>
    %cst_40 = arith.constant dense<0xFF800000> : vector<8xf32>
    %129 = vector.multi_reduction <maximumf>, %128, %cst_40 [1] : vector<8x8xf32> to vector<8xf32>
    %130 = vector.shape_cast %129 : vector<8xf32> to vector<8x1xf32>
    %131 = vector.broadcast %130 : vector<8x1xf32> to vector<8x8xf32>
    %132 = arith.subf %128, %131 : vector<8x8xf32>
    %133 = math.exp %132 : vector<8x8xf32>
    %cst_41 = arith.constant dense<0.000000e+00> : vector<8xf32>
    %134 = vector.multi_reduction <add>, %133, %cst_41 [1] : vector<8x8xf32> to vector<8xf32>
    %135 = vector.shape_cast %134 : vector<8xf32> to vector<8x1xf32>
    %136 = arith.truncf %133 : vector<8x8xf32> to vector<8x8xbf16>
    %cst_42 = arith.constant dense<0.000000e+00> : vector<8x64xf32>
    %137 = tpu.matmul %136, %125, %cst_42 {dimension_numbers = #tpu.dot_dimension_numbers<[1], [0], [0], [1], [0, 0, 1, 1], [], []>} : vector<8x8xbf16>, vector<8x64xbf16>, vector<8x64xf32> -> vector<8x64xf32>
    %138 = tpu.reciprocal %135 {approx = true} : vector<8x1xf32> -> vector<8x1xf32>
    %139 = vector.broadcast %138 : vector<8x1xf32> to vector<8x64xf32>
    %140 = arith.mulf %137, %139 : vector<8x64xf32>
    %141 = arith.truncf %140 : vector<8x64xf32> to vector<8x64xbf16>
    %c64_43 = arith.constant 64 : index
    %c0_44 = arith.constant 0 : index
    %142 = vector.load %arg7[%c64_43, %c0_44] : memref<128x128xbf16, #tpu.memory_space<vmem>>, vector<64x128xbf16>
    %cst_45 = arith.constant dense<0.000000e+00> : vector<8x128xf32>
    %143 = tpu.matmul %141, %142, %cst_45 {dimension_numbers = #tpu.dot_dimension_numbers<[1], [0], [0], [1], [0, 0, 1, 1], [], []>} : vector<8x64xbf16>, vector<64x128xbf16>, vector<8x128xf32> -> vector<8x128xf32>
    %144 = arith.addf %119, %143 : vector<8x128xf32>
    %145 = tpu.concatenate %88, %144 in 0 : vector<8x128xf32>, vector<8x128xf32> -> vector<16x128xf32>
    %c0_46 = arith.constant 0 : index
    %c0_47 = arith.constant 0 : index
    %146 = vector.load %arg8[%c0_46, %c0_47] : memref<1x128xf32, #tpu.memory_space<vmem>>, vector<1x128xf32>
    %147 = vector.broadcast %146 : vector<1x128xf32> to vector<16x128xf32>
    %148 = arith.addf %145, %147 : vector<16x128xf32>
    %149 = arith.addf %148, %26 : vector<16x128xf32>
    %c0_48 = arith.constant 0 : index
    %c0_49 = arith.constant 0 : index
    %150 = vector.load %arg9[%c0_48, %c0_49] : memref<1x128xf32, #tpu.memory_space<vmem>>, vector<1x128xf32>
    %c0_50 = arith.constant 0 : index
    %c0_51 = arith.constant 0 : index
    %151 = vector.load %arg10[%c0_50, %c0_51] : memref<1x128xf32, #tpu.memory_space<vmem>>, vector<1x128xf32>
    %cst_52 = arith.constant dense<0.000000e+00> : vector<16xf32>
    %152 = vector.multi_reduction <add>, %149, %cst_52 [1] : vector<16x128xf32> to vector<16xf32>
    %153 = vector.shape_cast %152 : vector<16xf32> to vector<16x1xf32>
    %cst_53 = arith.constant 1.280000e+02 : f32
    %154 = vector.broadcast %cst_53 : f32 to vector<16x1xf32>
    %155 = arith.divf %153, %154 : vector<16x1xf32>
    %156 = vector.broadcast %155 : vector<16x1xf32> to vector<16x128xf32>
    %157 = arith.subf %149, %156 : vector<16x128xf32>
    %158 = vector.broadcast %155 : vector<16x1xf32> to vector<16x128xf32>
    %159 = arith.subf %149, %158 : vector<16x128xf32>
    %160 = arith.mulf %157, %159 : vector<16x128xf32>
    %cst_54 = arith.constant dense<0.000000e+00> : vector<16xf32>
    %161 = vector.multi_reduction <add>, %160, %cst_54 [1] : vector<16x128xf32> to vector<16xf32>
    %162 = vector.shape_cast %161 : vector<16xf32> to vector<16x1xf32>
    %cst_55 = arith.constant 1.280000e+02 : f32
    %163 = vector.broadcast %cst_55 : f32 to vector<16x1xf32>
    %164 = arith.divf %162, %163 : vector<16x1xf32>
    %165 = vector.broadcast %155 : vector<16x1xf32> to vector<16x128xf32>
    %166 = arith.subf %149, %165 : vector<16x128xf32>
    %cst_56 = arith.constant 9.99999996E-13 : f32
    %167 = vector.broadcast %cst_56 : f32 to vector<16x1xf32>
    %168 = arith.addf %164, %167 : vector<16x1xf32>
    %169 = math.rsqrt %168 : vector<16x1xf32>
    %170 = vector.broadcast %169 : vector<16x1xf32> to vector<16x128xf32>
    %171 = arith.mulf %166, %170 : vector<16x128xf32>
    %172 = vector.broadcast %150 : vector<1x128xf32> to vector<16x128xf32>
    %173 = arith.mulf %171, %172 : vector<16x128xf32>
    %174 = vector.broadcast %151 : vector<1x128xf32> to vector<16x128xf32>
    %175 = arith.addf %173, %174 : vector<16x128xf32>
    %176 = arith.truncf %175 : vector<16x128xf32> to vector<16x128xbf16>
    %c0_57 = arith.constant 0 : index
    %c0_58 = arith.constant 0 : index
    %177 = vector.load %arg11[%c0_57, %c0_58] : memref<128x256xbf16, #tpu.memory_space<vmem>>, vector<128x256xbf16>
    %cst_59 = arith.constant dense<0.000000e+00> : vector<16x256xf32>
    %178 = tpu.matmul %176, %177, %cst_59 {dimension_numbers = #tpu.dot_dimension_numbers<[1], [0], [0], [1], [0, 0, 1, 1], [], []>} : vector<16x128xbf16>, vector<128x256xbf16>, vector<16x256xf32> -> vector<16x256xf32>
    %c0_60 = arith.constant 0 : index
    %c0_61 = arith.constant 0 : index
    %179 = vector.load %arg12[%c0_60, %c0_61] : memref<1x256xf32, #tpu.memory_space<vmem>>, vector<1x256xf32>
    %180 = vector.broadcast %179 : vector<1x256xf32> to vector<16x256xf32>
    %181 = arith.addf %178, %180 : vector<16x256xf32>
    %cst_62 = arith.constant 5.000000e-01 : f32
    %182 = vector.broadcast %cst_62 : f32 to vector<16x256xf32>
    %183 = arith.mulf %182, %181 : vector<16x256xf32>
    %cst_63 = arith.constant 4.471500e-02 : f32
    %184 = vector.broadcast %cst_63 : f32 to vector<16x256xf32>
    %185 = arith.mulf %184, %181 : vector<16x256xf32>
    %186 = arith.mulf %185, %181 : vector<16x256xf32>
    %187 = arith.mulf %186, %181 : vector<16x256xf32>
    %188 = arith.addf %181, %187 : vector<16x256xf32>
    %cst_64 = arith.constant 0.797884583 : f32
    %189 = vector.broadcast %cst_64 : f32 to vector<16x256xf32>
    %190 = arith.mulf %189, %188 : vector<16x256xf32>
    %191 = math.tanh %190 : vector<16x256xf32>
    %cst_65 = arith.constant 1.000000e+00 : f32
    %192 = vector.broadcast %cst_65 : f32 to vector<16x256xf32>
    %193 = arith.addf %192, %191 : vector<16x256xf32>
    %194 = arith.mulf %183, %193 : vector<16x256xf32>
    %195 = arith.truncf %194 : vector<16x256xf32> to vector<16x256xbf16>
    %c0_66 = arith.constant 0 : index
    %c0_67 = arith.constant 0 : index
    %196 = vector.load %arg13[%c0_66, %c0_67] : memref<256x128xbf16, #tpu.memory_space<vmem>>, vector<256x128xbf16>
    %cst_68 = arith.constant dense<0.000000e+00> : vector<16x128xf32>
    %197 = tpu.matmul %195, %196, %cst_68 {dimension_numbers = #tpu.dot_dimension_numbers<[1], [0], [0], [1], [0, 0, 1, 1], [], []>} : vector<16x256xbf16>, vector<256x128xbf16>, vector<16x128xf32> -> vector<16x128xf32>
    %c0_69 = arith.constant 0 : index
    %c0_70 = arith.constant 0 : index
    %198 = vector.load %arg14[%c0_69, %c0_70] : memref<1x128xf32, #tpu.memory_space<vmem>>, vector<1x128xf32>
    %199 = vector.broadcast %198 : vector<1x128xf32> to vector<16x128xf32>
    %200 = arith.addf %197, %199 : vector<16x128xf32>
    %201 = arith.addf %200, %175 : vector<16x128xf32>
    %c0_71 = arith.constant 0 : index
    %c0_72 = arith.constant 0 : index
    %202 = vector.load %arg15[%c0_71, %c0_72] : memref<1x128xf32, #tpu.memory_space<vmem>>, vector<1x128xf32>
    %c0_73 = arith.constant 0 : index
    %c0_74 = arith.constant 0 : index
    %203 = vector.load %arg16[%c0_73, %c0_74] : memref<1x128xf32, #tpu.memory_space<vmem>>, vector<1x128xf32>
    %cst_75 = arith.constant dense<0.000000e+00> : vector<16xf32>
    %204 = vector.multi_reduction <add>, %201, %cst_75 [1] : vector<16x128xf32> to vector<16xf32>
    %205 = vector.shape_cast %204 : vector<16xf32> to vector<16x1xf32>
    %cst_76 = arith.constant 1.280000e+02 : f32
    %206 = vector.broadcast %cst_76 : f32 to vector<16x1xf32>
    %207 = arith.divf %205, %206 : vector<16x1xf32>
    %208 = vector.broadcast %207 : vector<16x1xf32> to vector<16x128xf32>
    %209 = arith.subf %201, %208 : vector<16x128xf32>
    %210 = vector.broadcast %207 : vector<16x1xf32> to vector<16x128xf32>
    %211 = arith.subf %201, %210 : vector<16x128xf32>
    %212 = arith.mulf %209, %211 : vector<16x128xf32>
    %cst_77 = arith.constant dense<0.000000e+00> : vector<16xf32>
    %213 = vector.multi_reduction <add>, %212, %cst_77 [1] : vector<16x128xf32> to vector<16xf32>
    %214 = vector.shape_cast %213 : vector<16xf32> to vector<16x1xf32>
    %cst_78 = arith.constant 1.280000e+02 : f32
    %215 = vector.broadcast %cst_78 : f32 to vector<16x1xf32>
    %216 = arith.divf %214, %215 : vector<16x1xf32>
    %217 = vector.broadcast %207 : vector<16x1xf32> to vector<16x128xf32>
    %218 = arith.subf %201, %217 : vector<16x128xf32>
    %cst_79 = arith.constant 9.99999996E-13 : f32
    %219 = vector.broadcast %cst_79 : f32 to vector<16x1xf32>
    %220 = arith.addf %216, %219 : vector<16x1xf32>
    %221 = math.rsqrt %220 : vector<16x1xf32>
    %222 = vector.broadcast %221 : vector<16x1xf32> to vector<16x128xf32>
    %223 = arith.mulf %218, %222 : vector<16x128xf32>
    %224 = vector.broadcast %202 : vector<1x128xf32> to vector<16x128xf32>
    %225 = arith.mulf %223, %224 : vector<16x128xf32>
    %226 = vector.broadcast %203 : vector<1x128xf32> to vector<16x128xf32>
    %227 = arith.addf %225, %226 : vector<16x128xf32>
    %c0_80 = arith.constant 0 : index
    %c0_81 = arith.constant 0 : index
    %228 = vector.load %arg17[%c0_80, %c0_81] : memref<16x128xf32, #tpu.memory_space<vmem>>, vector<16x128xf32>
    tpu.vector_store %arg17[%c0_80, %c0_81], %227 {strides = array<i32>} : memref<16x128xf32, #tpu.memory_space<vmem>>, vector<16x128xf32>,
    return
  }
  func.func @transform_0(%arg0: i32, %arg1: memref<2xi32, #tpu.memory_space<smem>>) -> (i32, i32) {
    %c0_i32 = arith.constant 0 : i32
    %c0_i32_0 = arith.constant 0 : i32
    %c0_i32_1 = arith.constant 0 : i32
    return %c0_i32, %c0_i32_0 : i32, i32
  }
  func.func @transform_1(%arg0: i32, %arg1: memref<2xi32, #tpu.memory_space<smem>>) -> (i32, i32) {
    %c0_i32 = arith.constant 0 : i32
    %c0_i32_0 = arith.constant 0 : i32
    %c0_i32_1 = arith.constant 0 : i32
    return %c0_i32, %c0_i32_0 : i32, i32
  }
  func.func @transform_2(%arg0: i32, %arg1: memref<2xi32, #tpu.memory_space<smem>>) -> (i32, i32) {
    %c0_i32 = arith.constant 0 : i32
    %c0_i32_0 = arith.constant 0 : i32
    %c0_i32_1 = arith.constant 0 : i32
    return %c0_i32, %c0_i32_0 : i32, i32
  }
  func.func @transform_3(%arg0: i32, %arg1: memref<2xi32, #tpu.memory_space<smem>>) -> (i32, i32) {
    %c0_i32 = arith.constant 0 : i32
    %c0_i32_0 = arith.constant 0 : i32
    %c0_i32_1 = arith.constant 0 : i32
    return %c0_i32, %c0_i32_0 : i32, i32
  }
  func.func @transform_4(%arg0: i32, %arg1: memref<2xi32, #tpu.memory_space<smem>>) -> (i32, i32) {
    %c0_i32 = arith.constant 0 : i32
    %c0_i32_0 = arith.constant 0 : i32
    %c0_i32_1 = arith.constant 0 : i32
    return %c0_i32, %c0_i32_0 : i32, i32
  }
  func.func @transform_5(%arg0: i32, %arg1: memref<2xi32, #tpu.memory_space<smem>>) -> (i32, i32) {
    %c0_i32 = arith.constant 0 : i32
    %c0_i32_0 = arith.constant 0 : i32
    %c0_i32_1 = arith.constant 0 : i32
    return %c0_i32, %c0_i32_0 : i32, i32
  }
  func.func @transform_6(%arg0: i32, %arg1: memref<2xi32, #tpu.memory_space<smem>>) -> (i32, i32) {
    %c0_i32 = arith.constant 0 : i32
    %c0_i32_0 = arith.constant 0 : i32
    %c0_i32_1 = arith.constant 0 : i32
    return %c0_i32, %c0_i32_0 : i32, i32
  }
  func.func @transform_7(%arg0: i32, %arg1: memref<2xi32, #tpu.memory_space<smem>>) -> (i32, i32) {
    %c0_i32 = arith.constant 0 : i32
    %c0_i32_0 = arith.constant 0 : i32
    %c0_i32_1 = arith.constant 0 : i32
    return %c0_i32, %c0_i32_0 : i32, i32
  }
  func.func @transform_8(%arg0: i32, %arg1: memref<2xi32, #tpu.memory_space<smem>>) -> (i32, i32) {
    %c0_i32 = arith.constant 0 : i32
    %c0_i32_0 = arith.constant 0 : i32
    %c0_i32_1 = arith.constant 0 : i32
    return %c0_i32, %c0_i32_0 : i32, i32
  }
  func.func @transform_9(%arg0: i32, %arg1: memref<2xi32, #tpu.memory_space<smem>>) -> (i32, i32) {
    %c0_i32 = arith.constant 0 : i32
    %c0_i32_0 = arith.constant 0 : i32
    %c0_i32_1 = arith.constant 0 : i32
    return %c0_i32, %c0_i32_0 : i32, i32
  }
  func.func @transform_10(%arg0: i32, %arg1: memref<2xi32, #tpu.memory_space<smem>>) -> (i32, i32) {
    %c0_i32 = arith.constant 0 : i32
    %c0_i32_0 = arith.constant 0 : i32
    %c0_i32_1 = arith.constant 0 : i32
    return %c0_i32, %c0_i32_0 : i32, i32
  }
  func.func @transform_11(%arg0: i32, %arg1: memref<2xi32, #tpu.memory_space<smem>>) -> (i32, i32) {
    %c0_i32 = arith.constant 0 : i32
    %c0_i32_0 = arith.constant 0 : i32
    %c0_i32_1 = arith.constant 0 : i32
    return %c0_i32, %c0_i32_0 : i32, i32
  }
  func.func @transform_12(%arg0: i32, %arg1: memref<2xi32, #tpu.memory_space<smem>>) -> (i32, i32) {
    %c0_i32 = arith.constant 0 : i32
    %c0_i32_0 = arith.constant 0 : i32
    %c0_i32_1 = arith.constant 0 : i32
    return %c0_i32, %c0_i32_0 : i32, i32
  }
  func.func @transform_13(%arg0: i32, %arg1: memref<2xi32, #tpu.memory_space<smem>>) -> (i32, i32) {
    %c0_i32 = arith.constant 0 : i32
    %c0_i32_0 = arith.constant 0 : i32
    %c0_i32_1 = arith.constant 0 : i32
    return %c0_i32, %c0_i32_0 : i32, i32
  }
  func.func @transform_14(%arg0: i32, %arg1: memref<2xi32, #tpu.memory_space<smem>>) -> (i32, i32) {
    %c0_i32 = arith.constant 0 : i32
    %c0_i32_0 = arith.constant 0 : i32
    %c0_i32_1 = arith.constant 0 : i32
    return %c0_i32, %c0_i32_0 : i32, i32
  }
  func.func @transform_15(%arg0: i32, %arg1: memref<2xi32, #tpu.memory_space<smem>>) -> (i32, i32) {
    %c0_i32 = arith.constant 0 : i32
    %c0_i32_0 = arith.constant 0 : i32
    %c0_i32_1 = arith.constant 0 : i32
    return %c0_i32, %c0_i32_0 : i32, i32
  }
}

module attributes {stable_mosaic.version = 11 : i64} {
  func.func @_encoder_layer_kernel(%arg0: i32, %arg1: memref<2xi32, #tpu.memory_space<smem>>, %arg2: memref<16x128xf32, #tpu.memory_space<vmem>>, %arg3: memref<1x128xf32, #tpu.memory_space<vmem>>, %arg4: memref<1x128xf32, #tpu.memory_space<vmem>>, %arg5: memref<128x384xbf16, #tpu.memory_space<vmem>>, %arg6: memref<1x384xf32, #tpu.memory_space<vmem>>, %arg7: memref<128x128xbf16, #tpu.memory_space<vmem>>, %arg8: memref<1x128xf32, #tpu.memory_space<vmem>>, %arg9: memref<1x128xf32, #tpu.memory_space<vmem>>, %arg10: memref<1x128xf32, #tpu.memory_space<vmem>>, %arg11: memref<128x256xbf16, #tpu.memory_space<vmem>>, %arg12: memref<1x256xf32, #tpu.memory_space<vmem>>, %arg13: memref<256x128xbf16, #tpu.memory_space<vmem>>, %arg14: memref<1x128xf32, #tpu.memory_space<vmem>>, %arg15: memref<1x128xf32, #tpu.memory_space<vmem>>, %arg16: memref<1x128xf32, #tpu.memory_space<vmem>>, %arg17: memref<16x128xf32, #tpu.memory_space<vmem>>) attributes {dimension_semantics = [#tpu.dimension_semantics<arbitrary>], iteration_bounds = array<i64: 1>, scalar_prefetch = 1 : i64, scratch_operands = 0 : i64, tpu.core_type = #tpu.core_type<tc>, window_params = [{pipeline_mode = #tpu.pipeline_mode<synchronous>, transform_indices = @transform_0, window_bounds = array<i64: 16, 128>}, {pipeline_mode = #tpu.pipeline_mode<synchronous>, transform_indices = @transform_1, window_bounds = array<i64: 1, 128>}, {pipeline_mode = #tpu.pipeline_mode<synchronous>, transform_indices = @transform_2, window_bounds = array<i64: 1, 128>}, {pipeline_mode = #tpu.pipeline_mode<synchronous>, transform_indices = @transform_3, window_bounds = array<i64: 128, 384>}, {pipeline_mode = #tpu.pipeline_mode<synchronous>, transform_indices = @transform_4, window_bounds = array<i64: 1, 384>}, {pipeline_mode = #tpu.pipeline_mode<synchronous>, transform_indices = @transform_5, window_bounds = array<i64: 128, 128>}, {pipeline_mode = #tpu.pipeline_mode<synchronous>, transform_indices = @transform_6, window_bounds = array<i64: 1, 128>}, {pipeline_mode = #tpu.pipeline_mode<synchronous>, transform_indices = @transform_7, window_bounds = array<i64: 1, 128>}, {pipeline_mode = #tpu.pipeline_mode<synchronous>, transform_indices = @transform_8, window_bounds = array<i64: 1, 128>}, {pipeline_mode = #tpu.pipeline_mode<synchronous>, transform_indices = @transform_9, window_bounds = array<i64: 128, 256>}, {pipeline_mode = #tpu.pipeline_mode<synchronous>, transform_indices = @transform_10, window_bounds = array<i64: 1, 256>}, {pipeline_mode = #tpu.pipeline_mode<synchronous>, transform_indices = @transform_11, window_bounds = array<i64: 256, 128>}, {pipeline_mode = #tpu.pipeline_mode<synchronous>, transform_indices = @transform_12, window_bounds = array<i64: 1, 128>}, {pipeline_mode = #tpu.pipeline_mode<synchronous>, transform_indices = @transform_13, window_bounds = array<i64: 1, 128>}, {pipeline_mode = #tpu.pipeline_mode<synchronous>, transform_indices = @transform_14, window_bounds = array<i64: 1, 128>}, {pipeline_mode = #tpu.pipeline_mode<synchronous>, transform_indices = @transform_15, window_bounds = array<i64: 16, 128>}]} {
    %c0 = arith.constant 0 : index
    %c0_0 = arith.constant 0 : index
    %0 = vector.load %arg2[%c0, %c0_0] : memref<16x128xf32, #tpu.memory_space<vmem>>, vector<16x128xf32>
    %1 = arith.truncf %0 : vector<16x128xf32> to vector<16x128xbf16>
    %c0_1 = arith.constant 0 : index
    %c0_2 = arith.constant 0 : index
    %2 = vector.load %arg5[%c0_1, %c0_2] : memref<128x384xbf16, #tpu.memory_space<vmem>>, vector<128x384xbf16>
    %cst = arith.constant dense<0.000000e+00> : vector<16x384xf32>
    %3 = tpu.matmul %1, %2, %cst {dimension_numbers = #tpu.dot_dimension_numbers<[1], [0], [0], [1], [0, 0, 1, 1], [], []>} : vector<16x128xbf16>, vector<128x384xbf16>, vector<16x384xf32> -> vector<16x384xf32>
    %c0_3 = arith.constant 0 : index
    %c0_4 = arith.constant 0 : index
    %4 = vector.load %arg6[%c0_3, %c0_4] : memref<1x384xf32, #tpu.memory_space<vmem>>, vector<1x384xf32>
    %5 = vector.broadcast %4 : vector<1x384xf32> to vector<16x384xf32>
    %6 = arith.addf %3, %5 : vector<16x384xf32>
    %c0_5 = arith.constant 0 : index
    %7 = memref.load %arg1[%c0_5] : memref<2xi32, #tpu.memory_space<smem>>
    %8 = tpu.iota {dimensions = array<i32: 1>} : vector<1x8xi32>
    %9 = vector.broadcast %7 : i32 to vector<1x8xi32>
    %10 = arith.cmpi slt, %8, %9 : vector<1x8xi32>
    %cst_6 = arith.constant 0.000000e+00 : f32
    %cst_7 = arith.constant -1.000000e+04 : f32
    %11 = vector.broadcast %cst_6 : f32 to vector<1x8xf32>
    %12 = vector.broadcast %cst_7 : f32 to vector<1x8xf32>
    %13 = arith.select %10, %11, %12 : vector<1x8xi1>, vector<1x8xf32>
    %14 = vector.extract_strided_slice %6 {offsets = [0, 0], sizes = [8, 64], strides = [1, 1]} : vector<16x384xf32> to vector<8x64xf32>
    %15 = arith.truncf %14 : vector<8x64xf32> to vector<8x64xbf16>
    %16 = vector.extract_strided_slice %6 {offsets = [0, 128], sizes = [8, 64], strides = [1, 1]} : vector<16x384xf32> to vector<8x64xf32>
    %17 = arith.truncf %16 : vector<8x64xf32> to vector<8x64xbf16>
    %18 = vector.extract_strided_slice %6 {offsets = [0, 256], sizes = [8, 64], strides = [1, 1]} : vector<16x384xf32> to vector<8x64xf32>
    %19 = arith.truncf %18 : vector<8x64xf32> to vector<8x64xbf16>
    %cst_8 = arith.constant dense<0.000000e+00> : vector<8x8xf32>
    %20 = tpu.matmul %15, %17, %cst_8 {dimension_numbers = #tpu.dot_dimension_numbers<[1], [1], [0], [0], [0, 0, 1, 0], [], []>} : vector<8x64xbf16>, vector<8x64xbf16>, vector<8x8xf32> -> vector<8x8xf32>
    %21 = vector.broadcast %13 : vector<1x8xf32> to vector<8x8xf32>
    %22 = arith.addf %20, %21 : vector<8x8xf32>
    %cst_9 = arith.constant dense<0xFF800000> : vector<8xf32>
    %23 = vector.multi_reduction <maximumf>, %22, %cst_9 [1] : vector<8x8xf32> to vector<8xf32>
    %24 = vector.shape_cast %23 : vector<8xf32> to vector<8x1xf32>
    %25 = vector.broadcast %24 : vector<8x1xf32> to vector<8x8xf32>
    %26 = arith.subf %22, %25 : vector<8x8xf32>
    %27 = math.exp %26 : vector<8x8xf32>
    %cst_10 = arith.constant dense<0.000000e+00> : vector<8xf32>
    %28 = vector.multi_reduction <add>, %27, %cst_10 [1] : vector<8x8xf32> to vector<8xf32>
    %29 = vector.shape_cast %28 : vector<8xf32> to vector<8x1xf32>
    %30 = arith.truncf %27 : vector<8x8xf32> to vector<8x8xbf16>
    %cst_11 = arith.constant dense<0.000000e+00> : vector<8x64xf32>
    %31 = tpu.matmul %30, %19, %cst_11 {dimension_numbers = #tpu.dot_dimension_numbers<[1], [0], [0], [1], [0, 0, 1, 1], [], []>} : vector<8x8xbf16>, vector<8x64xbf16>, vector<8x64xf32> -> vector<8x64xf32>
    %32 = tpu.reciprocal %29 {approx = true} : vector<8x1xf32> -> vector<8x1xf32>
    %33 = vector.broadcast %32 : vector<8x1xf32> to vector<8x64xf32>
    %34 = arith.mulf %31, %33 : vector<8x64xf32>
    %35 = arith.truncf %34 : vector<8x64xf32> to vector<8x64xbf16>
    %c0_12 = arith.constant 0 : index
    %c0_13 = arith.constant 0 : index
    %36 = vector.load %arg7[%c0_12, %c0_13] : memref<128x128xbf16, #tpu.memory_space<vmem>>, vector<64x128xbf16>
    %cst_14 = arith.constant dense<0.000000e+00> : vector<8x128xf32>
    %37 = tpu.matmul %35, %36, %cst_14 {dimension_numbers = #tpu.dot_dimension_numbers<[1], [0], [0], [1], [0, 0, 1, 1], [], []>} : vector<8x64xbf16>, vector<64x128xbf16>, vector<8x128xf32> -> vector<8x128xf32>
    %38 = vector.extract_strided_slice %6 {offsets = [0, 64], sizes = [8, 64], strides = [1, 1]} : vector<16x384xf32> to vector<8x64xf32>
    %39 = arith.truncf %38 : vector<8x64xf32> to vector<8x64xbf16>
    %40 = vector.extract_strided_slice %6 {offsets = [0, 192], sizes = [8, 64], strides = [1, 1]} : vector<16x384xf32> to vector<8x64xf32>
    %41 = arith.truncf %40 : vector<8x64xf32> to vector<8x64xbf16>
    %42 = vector.extract_strided_slice %6 {offsets = [0, 320], sizes = [8, 64], strides = [1, 1]} : vector<16x384xf32> to vector<8x64xf32>
    %43 = arith.truncf %42 : vector<8x64xf32> to vector<8x64xbf16>
    %cst_15 = arith.constant dense<0.000000e+00> : vector<8x8xf32>
    %44 = tpu.matmul %39, %41, %cst_15 {dimension_numbers = #tpu.dot_dimension_numbers<[1], [1], [0], [0], [0, 0, 1, 0], [], []>} : vector<8x64xbf16>, vector<8x64xbf16>, vector<8x8xf32> -> vector<8x8xf32>
    %45 = vector.broadcast %13 : vector<1x8xf32> to vector<8x8xf32>
    %46 = arith.addf %44, %45 : vector<8x8xf32>
    %cst_16 = arith.constant dense<0xFF800000> : vector<8xf32>
    %47 = vector.multi_reduction <maximumf>, %46, %cst_16 [1] : vector<8x8xf32> to vector<8xf32>
    %48 = vector.shape_cast %47 : vector<8xf32> to vector<8x1xf32>
    %49 = vector.broadcast %48 : vector<8x1xf32> to vector<8x8xf32>
    %50 = arith.subf %46, %49 : vector<8x8xf32>
    %51 = math.exp %50 : vector<8x8xf32>
    %cst_17 = arith.constant dense<0.000000e+00> : vector<8xf32>
    %52 = vector.multi_reduction <add>, %51, %cst_17 [1] : vector<8x8xf32> to vector<8xf32>
    %53 = vector.shape_cast %52 : vector<8xf32> to vector<8x1xf32>
    %54 = arith.truncf %51 : vector<8x8xf32> to vector<8x8xbf16>
    %cst_18 = arith.constant dense<0.000000e+00> : vector<8x64xf32>
    %55 = tpu.matmul %54, %43, %cst_18 {dimension_numbers = #tpu.dot_dimension_numbers<[1], [0], [0], [1], [0, 0, 1, 1], [], []>} : vector<8x8xbf16>, vector<8x64xbf16>, vector<8x64xf32> -> vector<8x64xf32>
    %56 = tpu.reciprocal %53 {approx = true} : vector<8x1xf32> -> vector<8x1xf32>
    %57 = vector.broadcast %56 : vector<8x1xf32> to vector<8x64xf32>
    %58 = arith.mulf %55, %57 : vector<8x64xf32>
    %59 = arith.truncf %58 : vector<8x64xf32> to vector<8x64xbf16>
    %c64 = arith.constant 64 : index
    %c0_19 = arith.constant 0 : index
    %60 = vector.load %arg7[%c64, %c0_19] : memref<128x128xbf16, #tpu.memory_space<vmem>>, vector<64x128xbf16>
    %cst_20 = arith.constant dense<0.000000e+00> : vector<8x128xf32>
    %61 = tpu.matmul %59, %60, %cst_20 {dimension_numbers = #tpu.dot_dimension_numbers<[1], [0], [0], [1], [0, 0, 1, 1], [], []>} : vector<8x64xbf16>, vector<64x128xbf16>, vector<8x128xf32> -> vector<8x128xf32>
    %62 = arith.addf %37, %61 : vector<8x128xf32>
    %c1 = arith.constant 1 : index
    %63 = memref.load %arg1[%c1] : memref<2xi32, #tpu.memory_space<smem>>
    %64 = tpu.iota {dimensions = array<i32: 1>} : vector<1x8xi32>
    %65 = vector.broadcast %63 : i32 to vector<1x8xi32>
    %66 = arith.cmpi slt, %64, %65 : vector<1x8xi32>
    %cst_21 = arith.constant 0.000000e+00 : f32
    %cst_22 = arith.constant -1.000000e+04 : f32
    %67 = vector.broadcast %cst_21 : f32 to vector<1x8xf32>
    %68 = vector.broadcast %cst_22 : f32 to vector<1x8xf32>
    %69 = arith.select %66, %67, %68 : vector<1x8xi1>, vector<1x8xf32>
    %70 = vector.extract_strided_slice %6 {offsets = [8, 0], sizes = [8, 64], strides = [1, 1]} : vector<16x384xf32> to vector<8x64xf32>
    %71 = arith.truncf %70 : vector<8x64xf32> to vector<8x64xbf16>
    %72 = vector.extract_strided_slice %6 {offsets = [8, 128], sizes = [8, 64], strides = [1, 1]} : vector<16x384xf32> to vector<8x64xf32>
    %73 = arith.truncf %72 : vector<8x64xf32> to vector<8x64xbf16>
    %74 = vector.extract_strided_slice %6 {offsets = [8, 256], sizes = [8, 64], strides = [1, 1]} : vector<16x384xf32> to vector<8x64xf32>
    %75 = arith.truncf %74 : vector<8x64xf32> to vector<8x64xbf16>
    %cst_23 = arith.constant dense<0.000000e+00> : vector<8x8xf32>
    %76 = tpu.matmul %71, %73, %cst_23 {dimension_numbers = #tpu.dot_dimension_numbers<[1], [1], [0], [0], [0, 0, 1, 0], [], []>} : vector<8x64xbf16>, vector<8x64xbf16>, vector<8x8xf32> -> vector<8x8xf32>
    %77 = vector.broadcast %69 : vector<1x8xf32> to vector<8x8xf32>
    %78 = arith.addf %76, %77 : vector<8x8xf32>
    %cst_24 = arith.constant dense<0xFF800000> : vector<8xf32>
    %79 = vector.multi_reduction <maximumf>, %78, %cst_24 [1] : vector<8x8xf32> to vector<8xf32>
    %80 = vector.shape_cast %79 : vector<8xf32> to vector<8x1xf32>
    %81 = vector.broadcast %80 : vector<8x1xf32> to vector<8x8xf32>
    %82 = arith.subf %78, %81 : vector<8x8xf32>
    %83 = math.exp %82 : vector<8x8xf32>
    %cst_25 = arith.constant dense<0.000000e+00> : vector<8xf32>
    %84 = vector.multi_reduction <add>, %83, %cst_25 [1] : vector<8x8xf32> to vector<8xf32>
    %85 = vector.shape_cast %84 : vector<8xf32> to vector<8x1xf32>
    %86 = arith.truncf %83 : vector<8x8xf32> to vector<8x8xbf16>
    %cst_26 = arith.constant dense<0.000000e+00> : vector<8x64xf32>
    %87 = tpu.matmul %86, %75, %cst_26 {dimension_numbers = #tpu.dot_dimension_numbers<[1], [0], [0], [1], [0, 0, 1, 1], [], []>} : vector<8x8xbf16>, vector<8x64xbf16>, vector<8x64xf32> -> vector<8x64xf32>
    %88 = tpu.reciprocal %85 {approx = true} : vector<8x1xf32> -> vector<8x1xf32>
    %89 = vector.broadcast %88 : vector<8x1xf32> to vector<8x64xf32>
    %90 = arith.mulf %87, %89 : vector<8x64xf32>
    %91 = arith.truncf %90 : vector<8x64xf32> to vector<8x64xbf16>
    %c0_27 = arith.constant 0 : index
    %c0_28 = arith.constant 0 : index
    %92 = vector.load %arg7[%c0_27, %c0_28] : memref<128x128xbf16, #tpu.memory_space<vmem>>, vector<64x128xbf16>
    %cst_29 = arith.constant dense<0.000000e+00> : vector<8x128xf32>
    %93 = tpu.matmul %91, %92, %cst_29 {dimension_numbers = #tpu.dot_dimension_numbers<[1], [0], [0], [1], [0, 0, 1, 1], [], []>} : vector<8x64xbf16>, vector<64x128xbf16>, vector<8x128xf32> -> vector<8x128xf32>
    %94 = vector.extract_strided_slice %6 {offsets = [8, 64], sizes = [8, 64], strides = [1, 1]} : vector<16x384xf32> to vector<8x64xf32>
    %95 = arith.truncf %94 : vector<8x64xf32> to vector<8x64xbf16>
    %96 = vector.extract_strided_slice %6 {offsets = [8, 192], sizes = [8, 64], strides = [1, 1]} : vector<16x384xf32> to vector<8x64xf32>
    %97 = arith.truncf %96 : vector<8x64xf32> to vector<8x64xbf16>
    %98 = vector.extract_strided_slice %6 {offsets = [8, 320], sizes = [8, 64], strides = [1, 1]} : vector<16x384xf32> to vector<8x64xf32>
    %99 = arith.truncf %98 : vector<8x64xf32> to vector<8x64xbf16>
    %cst_30 = arith.constant dense<0.000000e+00> : vector<8x8xf32>
    %100 = tpu.matmul %95, %97, %cst_30 {dimension_numbers = #tpu.dot_dimension_numbers<[1], [1], [0], [0], [0, 0, 1, 0], [], []>} : vector<8x64xbf16>, vector<8x64xbf16>, vector<8x8xf32> -> vector<8x8xf32>
    %101 = vector.broadcast %69 : vector<1x8xf32> to vector<8x8xf32>
    %102 = arith.addf %100, %101 : vector<8x8xf32>
    %cst_31 = arith.constant dense<0xFF800000> : vector<8xf32>
    %103 = vector.multi_reduction <maximumf>, %102, %cst_31 [1] : vector<8x8xf32> to vector<8xf32>
    %104 = vector.shape_cast %103 : vector<8xf32> to vector<8x1xf32>
    %105 = vector.broadcast %104 : vector<8x1xf32> to vector<8x8xf32>
    %106 = arith.subf %102, %105 : vector<8x8xf32>
    %107 = math.exp %106 : vector<8x8xf32>
    %cst_32 = arith.constant dense<0.000000e+00> : vector<8xf32>
    %108 = vector.multi_reduction <add>, %107, %cst_32 [1] : vector<8x8xf32> to vector<8xf32>
    %109 = vector.shape_cast %108 : vector<8xf32> to vector<8x1xf32>
    %110 = arith.truncf %107 : vector<8x8xf32> to vector<8x8xbf16>
    %cst_33 = arith.constant dense<0.000000e+00> : vector<8x64xf32>
    %111 = tpu.matmul %110, %99, %cst_33 {dimension_numbers = #tpu.dot_dimension_numbers<[1], [0], [0], [1], [0, 0, 1, 1], [], []>} : vector<8x8xbf16>, vector<8x64xbf16>, vector<8x64xf32> -> vector<8x64xf32>
    %112 = tpu.reciprocal %109 {approx = true} : vector<8x1xf32> -> vector<8x1xf32>
    %113 = vector.broadcast %112 : vector<8x1xf32> to vector<8x64xf32>
    %114 = arith.mulf %111, %113 : vector<8x64xf32>
    %115 = arith.truncf %114 : vector<8x64xf32> to vector<8x64xbf16>
    %c64_34 = arith.constant 64 : index
    %c0_35 = arith.constant 0 : index
    %116 = vector.load %arg7[%c64_34, %c0_35] : memref<128x128xbf16, #tpu.memory_space<vmem>>, vector<64x128xbf16>
    %cst_36 = arith.constant dense<0.000000e+00> : vector<8x128xf32>
    %117 = tpu.matmul %115, %116, %cst_36 {dimension_numbers = #tpu.dot_dimension_numbers<[1], [0], [0], [1], [0, 0, 1, 1], [], []>} : vector<8x64xbf16>, vector<64x128xbf16>, vector<8x128xf32> -> vector<8x128xf32>
    %118 = arith.addf %93, %117 : vector<8x128xf32>
    %119 = tpu.concatenate %62, %118 in 0 : vector<8x128xf32>, vector<8x128xf32> -> vector<16x128xf32>
    %c0_37 = arith.constant 0 : index
    %c0_38 = arith.constant 0 : index
    %120 = vector.load %arg8[%c0_37, %c0_38] : memref<1x128xf32, #tpu.memory_space<vmem>>, vector<1x128xf32>
    %121 = vector.broadcast %120 : vector<1x128xf32> to vector<16x128xf32>
    %122 = arith.addf %119, %121 : vector<16x128xf32>
    %123 = arith.addf %122, %0 : vector<16x128xf32>
    %c0_39 = arith.constant 0 : index
    %c0_40 = arith.constant 0 : index
    %124 = vector.load %arg9[%c0_39, %c0_40] : memref<1x128xf32, #tpu.memory_space<vmem>>, vector<1x128xf32>
    %c0_41 = arith.constant 0 : index
    %c0_42 = arith.constant 0 : index
    %125 = vector.load %arg10[%c0_41, %c0_42] : memref<1x128xf32, #tpu.memory_space<vmem>>, vector<1x128xf32>
    %cst_43 = arith.constant dense<0.000000e+00> : vector<16xf32>
    %126 = vector.multi_reduction <add>, %123, %cst_43 [1] : vector<16x128xf32> to vector<16xf32>
    %127 = vector.shape_cast %126 : vector<16xf32> to vector<16x1xf32>
    %cst_44 = arith.constant 1.280000e+02 : f32
    %128 = vector.broadcast %cst_44 : f32 to vector<16x1xf32>
    %129 = arith.divf %127, %128 : vector<16x1xf32>
    %130 = vector.broadcast %129 : vector<16x1xf32> to vector<16x128xf32>
    %131 = arith.subf %123, %130 : vector<16x128xf32>
    %132 = vector.broadcast %129 : vector<16x1xf32> to vector<16x128xf32>
    %133 = arith.subf %123, %132 : vector<16x128xf32>
    %134 = arith.mulf %131, %133 : vector<16x128xf32>
    %cst_45 = arith.constant dense<0.000000e+00> : vector<16xf32>
    %135 = vector.multi_reduction <add>, %134, %cst_45 [1] : vector<16x128xf32> to vector<16xf32>
    %136 = vector.shape_cast %135 : vector<16xf32> to vector<16x1xf32>
    %cst_46 = arith.constant 1.280000e+02 : f32
    %137 = vector.broadcast %cst_46 : f32 to vector<16x1xf32>
    %138 = arith.divf %136, %137 : vector<16x1xf32>
    %139 = vector.broadcast %129 : vector<16x1xf32> to vector<16x128xf32>
    %140 = arith.subf %123, %139 : vector<16x128xf32>
    %cst_47 = arith.constant 9.99999996E-13 : f32
    %141 = vector.broadcast %cst_47 : f32 to vector<16x1xf32>
    %142 = arith.addf %138, %141 : vector<16x1xf32>
    %143 = math.rsqrt %142 : vector<16x1xf32>
    %144 = vector.broadcast %143 : vector<16x1xf32> to vector<16x128xf32>
    %145 = arith.mulf %140, %144 : vector<16x128xf32>
    %146 = vector.broadcast %124 : vector<1x128xf32> to vector<16x128xf32>
    %147 = arith.mulf %145, %146 : vector<16x128xf32>
    %148 = vector.broadcast %125 : vector<1x128xf32> to vector<16x128xf32>
    %149 = arith.addf %147, %148 : vector<16x128xf32>
    %150 = arith.truncf %149 : vector<16x128xf32> to vector<16x128xbf16>
    %c0_48 = arith.constant 0 : index
    %c0_49 = arith.constant 0 : index
    %151 = vector.load %arg11[%c0_48, %c0_49] : memref<128x256xbf16, #tpu.memory_space<vmem>>, vector<128x256xbf16>
    %cst_50 = arith.constant dense<0.000000e+00> : vector<16x256xf32>
    %152 = tpu.matmul %150, %151, %cst_50 {dimension_numbers = #tpu.dot_dimension_numbers<[1], [0], [0], [1], [0, 0, 1, 1], [], []>} : vector<16x128xbf16>, vector<128x256xbf16>, vector<16x256xf32> -> vector<16x256xf32>
    %c0_51 = arith.constant 0 : index
    %c0_52 = arith.constant 0 : index
    %153 = vector.load %arg12[%c0_51, %c0_52] : memref<1x256xf32, #tpu.memory_space<vmem>>, vector<1x256xf32>
    %154 = vector.broadcast %153 : vector<1x256xf32> to vector<16x256xf32>
    %155 = arith.addf %152, %154 : vector<16x256xf32>
    %cst_53 = arith.constant 5.000000e-01 : f32
    %156 = vector.broadcast %cst_53 : f32 to vector<16x256xf32>
    %157 = arith.mulf %156, %155 : vector<16x256xf32>
    %cst_54 = arith.constant 4.471500e-02 : f32
    %158 = vector.broadcast %cst_54 : f32 to vector<16x256xf32>
    %159 = arith.mulf %158, %155 : vector<16x256xf32>
    %160 = arith.mulf %159, %155 : vector<16x256xf32>
    %161 = arith.mulf %160, %155 : vector<16x256xf32>
    %162 = arith.addf %155, %161 : vector<16x256xf32>
    %cst_55 = arith.constant 0.797884583 : f32
    %163 = vector.broadcast %cst_55 : f32 to vector<16x256xf32>
    %164 = arith.mulf %163, %162 : vector<16x256xf32>
    %165 = math.tanh %164 : vector<16x256xf32>
    %cst_56 = arith.constant 1.000000e+00 : f32
    %166 = vector.broadcast %cst_56 : f32 to vector<16x256xf32>
    %167 = arith.addf %166, %165 : vector<16x256xf32>
    %168 = arith.mulf %157, %167 : vector<16x256xf32>
    %169 = arith.truncf %168 : vector<16x256xf32> to vector<16x256xbf16>
    %c0_57 = arith.constant 0 : index
    %c0_58 = arith.constant 0 : index
    %170 = vector.load %arg13[%c0_57, %c0_58] : memref<256x128xbf16, #tpu.memory_space<vmem>>, vector<256x128xbf16>
    %cst_59 = arith.constant dense<0.000000e+00> : vector<16x128xf32>
    %171 = tpu.matmul %169, %170, %cst_59 {dimension_numbers = #tpu.dot_dimension_numbers<[1], [0], [0], [1], [0, 0, 1, 1], [], []>} : vector<16x256xbf16>, vector<256x128xbf16>, vector<16x128xf32> -> vector<16x128xf32>
    %c0_60 = arith.constant 0 : index
    %c0_61 = arith.constant 0 : index
    %172 = vector.load %arg14[%c0_60, %c0_61] : memref<1x128xf32, #tpu.memory_space<vmem>>, vector<1x128xf32>
    %173 = vector.broadcast %172 : vector<1x128xf32> to vector<16x128xf32>
    %174 = arith.addf %171, %173 : vector<16x128xf32>
    %175 = arith.addf %174, %149 : vector<16x128xf32>
    %c0_62 = arith.constant 0 : index
    %c0_63 = arith.constant 0 : index
    %176 = vector.load %arg15[%c0_62, %c0_63] : memref<1x128xf32, #tpu.memory_space<vmem>>, vector<1x128xf32>
    %c0_64 = arith.constant 0 : index
    %c0_65 = arith.constant 0 : index
    %177 = vector.load %arg16[%c0_64, %c0_65] : memref<1x128xf32, #tpu.memory_space<vmem>>, vector<1x128xf32>
    %cst_66 = arith.constant dense<0.000000e+00> : vector<16xf32>
    %178 = vector.multi_reduction <add>, %175, %cst_66 [1] : vector<16x128xf32> to vector<16xf32>
    %179 = vector.shape_cast %178 : vector<16xf32> to vector<16x1xf32>
    %cst_67 = arith.constant 1.280000e+02 : f32
    %180 = vector.broadcast %cst_67 : f32 to vector<16x1xf32>
    %181 = arith.divf %179, %180 : vector<16x1xf32>
    %182 = vector.broadcast %181 : vector<16x1xf32> to vector<16x128xf32>
    %183 = arith.subf %175, %182 : vector<16x128xf32>
    %184 = vector.broadcast %181 : vector<16x1xf32> to vector<16x128xf32>
    %185 = arith.subf %175, %184 : vector<16x128xf32>
    %186 = arith.mulf %183, %185 : vector<16x128xf32>
    %cst_68 = arith.constant dense<0.000000e+00> : vector<16xf32>
    %187 = vector.multi_reduction <add>, %186, %cst_68 [1] : vector<16x128xf32> to vector<16xf32>
    %188 = vector.shape_cast %187 : vector<16xf32> to vector<16x1xf32>
    %cst_69 = arith.constant 1.280000e+02 : f32
    %189 = vector.broadcast %cst_69 : f32 to vector<16x1xf32>
    %190 = arith.divf %188, %189 : vector<16x1xf32>
    %191 = vector.broadcast %181 : vector<16x1xf32> to vector<16x128xf32>
    %192 = arith.subf %175, %191 : vector<16x128xf32>
    %cst_70 = arith.constant 9.99999996E-13 : f32
    %193 = vector.broadcast %cst_70 : f32 to vector<16x1xf32>
    %194 = arith.addf %190, %193 : vector<16x1xf32>
    %195 = math.rsqrt %194 : vector<16x1xf32>
    %196 = vector.broadcast %195 : vector<16x1xf32> to vector<16x128xf32>
    %197 = arith.mulf %192, %196 : vector<16x128xf32>
    %198 = vector.broadcast %176 : vector<1x128xf32> to vector<16x128xf32>
    %199 = arith.mulf %197, %198 : vector<16x128xf32>
    %200 = vector.broadcast %177 : vector<1x128xf32> to vector<16x128xf32>
    %201 = arith.addf %199, %200 : vector<16x128xf32>
    %c0_71 = arith.constant 0 : index
    %c0_72 = arith.constant 0 : index
    %202 = vector.load %arg17[%c0_71, %c0_72] : memref<16x128xf32, #tpu.memory_space<vmem>>, vector<16x128xf32>
    tpu.vector_store %arg17[%c0_71, %c0_72], %201 {strides = array<i32>} : memref<16x128xf32, #tpu.memory_space<vmem>>, vector<16x128xf32>,
    return
  }
  func.func @transform_0(%arg0: i32, %arg1: memref<2xi32, #tpu.memory_space<smem>>) -> (i32, i32) {
    %c0_i32 = arith.constant 0 : i32
    %c0_i32_0 = arith.constant 0 : i32
    %c0_i32_1 = arith.constant 0 : i32
    return %c0_i32, %c0_i32_0 : i32, i32
  }
  func.func @transform_1(%arg0: i32, %arg1: memref<2xi32, #tpu.memory_space<smem>>) -> (i32, i32) {
    %c0_i32 = arith.constant 0 : i32
    %c0_i32_0 = arith.constant 0 : i32
    %c0_i32_1 = arith.constant 0 : i32
    return %c0_i32, %c0_i32_0 : i32, i32
  }
  func.func @transform_2(%arg0: i32, %arg1: memref<2xi32, #tpu.memory_space<smem>>) -> (i32, i32) {
    %c0_i32 = arith.constant 0 : i32
    %c0_i32_0 = arith.constant 0 : i32
    %c0_i32_1 = arith.constant 0 : i32
    return %c0_i32, %c0_i32_0 : i32, i32
  }
  func.func @transform_3(%arg0: i32, %arg1: memref<2xi32, #tpu.memory_space<smem>>) -> (i32, i32) {
    %c0_i32 = arith.constant 0 : i32
    %c0_i32_0 = arith.constant 0 : i32
    %c0_i32_1 = arith.constant 0 : i32
    return %c0_i32, %c0_i32_0 : i32, i32
  }
  func.func @transform_4(%arg0: i32, %arg1: memref<2xi32, #tpu.memory_space<smem>>) -> (i32, i32) {
    %c0_i32 = arith.constant 0 : i32
    %c0_i32_0 = arith.constant 0 : i32
    %c0_i32_1 = arith.constant 0 : i32
    return %c0_i32, %c0_i32_0 : i32, i32
  }
  func.func @transform_5(%arg0: i32, %arg1: memref<2xi32, #tpu.memory_space<smem>>) -> (i32, i32) {
    %c0_i32 = arith.constant 0 : i32
    %c0_i32_0 = arith.constant 0 : i32
    %c0_i32_1 = arith.constant 0 : i32
    return %c0_i32, %c0_i32_0 : i32, i32
  }
  func.func @transform_6(%arg0: i32, %arg1: memref<2xi32, #tpu.memory_space<smem>>) -> (i32, i32) {
    %c0_i32 = arith.constant 0 : i32
    %c0_i32_0 = arith.constant 0 : i32
    %c0_i32_1 = arith.constant 0 : i32
    return %c0_i32, %c0_i32_0 : i32, i32
  }
  func.func @transform_7(%arg0: i32, %arg1: memref<2xi32, #tpu.memory_space<smem>>) -> (i32, i32) {
    %c0_i32 = arith.constant 0 : i32
    %c0_i32_0 = arith.constant 0 : i32
    %c0_i32_1 = arith.constant 0 : i32
    return %c0_i32, %c0_i32_0 : i32, i32
  }
  func.func @transform_8(%arg0: i32, %arg1: memref<2xi32, #tpu.memory_space<smem>>) -> (i32, i32) {
    %c0_i32 = arith.constant 0 : i32
    %c0_i32_0 = arith.constant 0 : i32
    %c0_i32_1 = arith.constant 0 : i32
    return %c0_i32, %c0_i32_0 : i32, i32
  }
  func.func @transform_9(%arg0: i32, %arg1: memref<2xi32, #tpu.memory_space<smem>>) -> (i32, i32) {
    %c0_i32 = arith.constant 0 : i32
    %c0_i32_0 = arith.constant 0 : i32
    %c0_i32_1 = arith.constant 0 : i32
    return %c0_i32, %c0_i32_0 : i32, i32
  }
  func.func @transform_10(%arg0: i32, %arg1: memref<2xi32, #tpu.memory_space<smem>>) -> (i32, i32) {
    %c0_i32 = arith.constant 0 : i32
    %c0_i32_0 = arith.constant 0 : i32
    %c0_i32_1 = arith.constant 0 : i32
    return %c0_i32, %c0_i32_0 : i32, i32
  }
  func.func @transform_11(%arg0: i32, %arg1: memref<2xi32, #tpu.memory_space<smem>>) -> (i32, i32) {
    %c0_i32 = arith.constant 0 : i32
    %c0_i32_0 = arith.constant 0 : i32
    %c0_i32_1 = arith.constant 0 : i32
    return %c0_i32, %c0_i32_0 : i32, i32
  }
  func.func @transform_12(%arg0: i32, %arg1: memref<2xi32, #tpu.memory_space<smem>>) -> (i32, i32) {
    %c0_i32 = arith.constant 0 : i32
    %c0_i32_0 = arith.constant 0 : i32
    %c0_i32_1 = arith.constant 0 : i32
    return %c0_i32, %c0_i32_0 : i32, i32
  }
  func.func @transform_13(%arg0: i32, %arg1: memref<2xi32, #tpu.memory_space<smem>>) -> (i32, i32) {
    %c0_i32 = arith.constant 0 : i32
    %c0_i32_0 = arith.constant 0 : i32
    %c0_i32_1 = arith.constant 0 : i32
    return %c0_i32, %c0_i32_0 : i32, i32
  }
  func.func @transform_14(%arg0: i32, %arg1: memref<2xi32, #tpu.memory_space<smem>>) -> (i32, i32) {
    %c0_i32 = arith.constant 0 : i32
    %c0_i32_0 = arith.constant 0 : i32
    %c0_i32_1 = arith.constant 0 : i32
    return %c0_i32, %c0_i32_0 : i32, i32
  }
  func.func @transform_15(%arg0: i32, %arg1: memref<2xi32, #tpu.memory_space<smem>>) -> (i32, i32) {
    %c0_i32 = arith.constant 0 : i32
    %c0_i32_0 = arith.constant 0 : i32
    %c0_i32_1 = arith.constant 0 : i32
    return %c0_i32, %c0_i32_0 : i32, i32
  }
}

</mosaic_0001>

<bundles_post_ra>
// kernel: bert_classifier_forward.3
= control target key start
LH: loop header
LB: loop body
LE: loop exit
PB: predicated region body
PF: predicated region fallthrough
CT: control target
= control target key end

     0   :  { %s1666_s3 = smov [#allocation3]   ;;  %s1907_s0 = inlined_call_operand.vmem [shape: s32[2], index: 0, kind: input, shape index: {}]   ;;  %s1908_s1 = inlined_call_operand.vmem [shape: f32[16,128], index: 1, kind: input, shape index: {}]   ;;  %s1909_s2 = inlined_call_operand.vmem [shape: f32[1,128], index: 2, kind: input, shape index: {}]   ;;  %s1910_s3 = inlined_call_operand.vmem [shape: f32[1,128], index: 3, kind: input, shape index: {}]   ;;  %s1911_s4 = inlined_call_operand.hbm [shape: bf16[128,384], index: 4, kind: input, shape index: {}]   ;;  %s1912_s5 = inlined_call_operand.vmem [shape: f32[1,384], index: 5, kind: input, shape index: {}]   ;;  %s1913_s6 = inlined_call_operand.hbm [shape: bf16[128,128], index: 6, kind: input, shape index: {}]   ;;  %s1914_s7 = inlined_call_operand.vmem [shape: f32[1,128], index: 7, kind: input, shape index: {}]   ;;  %s1915_s8 = inlined_call_operand.vmem [shape: f32[1,128], index: 8, kind: input, shape index: {}]   ;;  %s1916_s9 = inlined_call_operand.vmem [shape: f32[1,128], index: 9, kind: input, shape index: {}]   ;;  %s1917_s10 = inlined_call_operand.hbm [shape: bf16[128,256], index: 10, kind: input, shape index: {}]   ;;  %s1918_s11 = inlined_call_operand.vmem [shape: f32[1,256], index: 11, kind: input, shape index: {}]   ;;  %s1919_s12 = inlined_call_operand.hbm [shape: bf16[256,128], index: 12, kind: input, shape index: {}]   ;;  %s1920_s13 = inlined_call_operand.vmem [shape: f32[1,128], index: 13, kind: input, shape index: {}]   ;;  %s1921_s14 = inlined_call_operand.vmem [shape: f32[1,128], index: 14, kind: input, shape index: {}]   ;;  %s1922_s15 = inlined_call_operand.vmem [shape: f32[1,128], index: 15, kind: input, shape index: {}]   ;;  %s1923_s16 = inlined_call_operand.vmem [shape: f32[16,128], index: 16, kind: output, shape index: {}]  }
   0x1   :  { %1924 = sst [smem:[#allocation15_spill]] %s1907_s0 }
   0x2   :  { %s1925_s2 = sld [smem:[#allocation15_spill]] }
   0x8   :  { %s22_s21 = sshll.u32 %s1925_s2, 4  ;;  %s23_s21 = int_to_ptr.vmem [resolvable:$true] %s22_s21 }
   0x9   :  { %25 = dma.vmem_to_smem %s23_s21, 16, %s1666_s3, [#allocation2] }
   0xa   :  { %1658 = dma.done.wait [#allocation2], 16 }
   0xb   :  { %1659 = vsyncadd [#allocation2], 4294967280 }
   0xc   :  { %28 = sfence }
   0xd   :  { %29 = vsyncpa [#allocation5], 0 }
   0xe   :  { %30 = vsyncpa [#allocation7], 0  ;;  %s57_s24 = sshll.u32 %s1913_s6, 4  ;;  %s58_s24 = int_to_ptr.hbm [resolvable:$true] %s57_s24 }
   0xf   :  { %31 = vsyncpa [#allocation10], 0  ;;  %s1667_s25 = smov [#allocation6]   ;;  %s42_s0 = sshll.u32 %s1911_s4, 4  ;;  %s43_s0 = int_to_ptr.hbm [resolvable:$true] %s42_s0 }
  0x10   :  { %s59_s26 = sshll.u32 %s1667_s25, 4  ;;  %s1668_s29 = smov 64   ;;  %s60_s26 = int_to_ptr.vmem [resolvable:$true] %s59_s26 }
  0x11   :  { %s1669_s30 = smov 4   ;;  %s1670_s17 = smov [#allocation4]  }
  0x12   :  { %65 = dma.hbm_to_vmem [thread:$0]  %s58_s24, 1024, %s60_s26, [#allocation7], %s1668_s29, %s1668_s29, %s1669_s30  }
  0x13   :  { %s44_s18 = sshll.u32 %s1670_s17, 4  ;;  %s1671_s19 = smov 192   ;;  %s45_s18 = int_to_ptr.vmem [resolvable:$true] %s44_s18 }
  0x14   :  { %s1672_s6 = smov 12   ;;  %s76_s21 = sshll.u32 %s1917_s10, 4  ;;  %s77_s21 = int_to_ptr.hbm [resolvable:$true] %s76_s21 }
  0x15   :  { %50 = dma.hbm_to_vmem [thread:$0]  %s43_s0, 3072, %s45_s18, [#allocation5], %s1671_s19, %s1671_s19, %s1672_s6  }
  0x16   :  { %s1673_s3 = smov [#allocation8]   ;;  %s91_s25 = sshll.u32 %s1919_s12, 4  ;;  %s92_s25 = int_to_ptr.hbm [resolvable:$true] %s91_s25 }
  0x17   :  { %s78_s22 = sshll.u32 %s1673_s3, 4  ;;  %s1674_s24 = smov 128   ;;  %s79_s22 = int_to_ptr.vmem [resolvable:$true] %s78_s22 }
  0x18   :  { %s1675_s26 = smov 8   ;;  %s1676_s27 = smov [#allocation9]  }
  0x19   :  { %84 = dma.hbm_to_vmem [thread:$0]  %s77_s21, 2048, %s79_s22, [#allocation7], %s1674_s24, %s1674_s24, %s1675_s26  }
  0x1a   :  { %s93_s28 = sshll.u32 %s1676_s27, 4  ;;  %s94_s28 = int_to_ptr.vmem [resolvable:$true] %s93_s28 }
  0x1b   :  { %99 = dma.hbm_to_vmem [thread:$0]  %s92_s25, 2048, %s94_s28, [#allocation10], %s1668_s29, %s1668_s29, %s1669_s30  }
  0x1c   :  { %1660 = dma.done.wait [#allocation5], 3072  }
  0x1d   :  { %1661 = vsyncadd [#allocation5], 4294964224 }
  0x1e   :  { %1662 = dma.done.wait [#allocation7], 3072  }
  0x1f   :  { %1663 = vsyncadd [#allocation7], 4294964224 }
  0x20   :  { %1664 = dma.done.wait [#allocation10], 2048  }
  0x21   :  { %1665 = vsyncadd [#allocation10], 4294965248  ;;  %v1250_v0 = vld [vmem:[#allocation4 + $0xa8] sm:$0xf]  ;;  %v1455_v1 = vld [vmem:[#allocation4 + $0xb0] sm:$0xf0] }
  0x22   :  { %v1454_v2 = vld [vmem:[#allocation4 + $0xac] sm:$0xf]  ;;  %v1251_v3 = vor.u32 %v1455_v1, %v1250_v0  ;;  %v1252_v4 = vld [vmem:[#allocation4 + $0xb4] sm:$0xf0]  ;;  %v1238_v5 = vld [vmem:[#allocation4 + $0x90] sm:$0xf] }
  0x23   :  { %v1452_v6 = vld [vmem:[#allocation4 + $0x98] sm:$0xf0]  ;;  %v1255_v7 = vor.u32 %v1454_v2, %v1252_v4  ;;  %v1451_v8 = vld [vmem:[#allocation4 + $0x94] sm:$0xf]  ;;  %v1240_v9 = vld [vmem:[#allocation4 + $0x9c] sm:$0xf0] }
  0x24   :  { %294 = vmatpush.bf16.msra.mxu0 %v1251_v3  ;;  %v1239_v10 = vor.u32 %v1452_v6, %v1238_v5  ;;  %v1243_v11 = vor.u32 %v1451_v8, %v1240_v9  ;;  %v1226_v12 = vld [vmem:[#allocation4 + $0x78] sm:$0xf]  ;;  %v1449_v13 = vld [vmem:[#allocation4 + $0x80] sm:$0xf0]  ;;  %v1448_v14 = vld [vmem:[#allocation4 + $0x7c] sm:$0xf] }
  0x25   :  { %308 = vmatpush.bf16.msra.mxu1 %v1255_v7  ;;  %v1228_v15 = vld [vmem:[#allocation4 + $0x84] sm:$0xf0]  ;;  %v1227_v16 = vor.u32 %v1449_v13, %v1226_v12  ;;  %v1214_v18 = vld [vmem:[#allocation4 + $0x60] sm:$0xf]  ;;  %v1446_v19 = vld [vmem:[#allocation4 + $0x68] sm:$0xf0] }
  0x26   :  { %v1231_v17 = vor.u32 %v1448_v14, %v1228_v15  ;;  %v1445_v20 = vld [vmem:[#allocation4 + $0x64] sm:$0xf]  ;;  %v1216_v21 = vld [vmem:[#allocation4 + $0x6c] sm:$0xf0]  ;;  %v1202_v22 = vld [vmem:[#allocation4 + $0x48] sm:$0xf]  ;;  %v1215_v23 = vor.u32 %v1446_v19, %v1214_v18 }
  0x27   :  { %v1443_v24 = vld [vmem:[#allocation4 + $0x50] sm:$0xf0]  ;;  %v1442_v25 = vld [vmem:[#allocation4 + $0x4c] sm:$0xf]  ;;  %v1219_v26 = vor.u32 %v1445_v20, %v1216_v21  ;;  %v1204_v27 = vld [vmem:[#allocation4 + $0x54] sm:$0xf0]  ;;  %v337_v21 = vlaneseq }
  0x28   :  { %295 = vmatpush.bf16.msra.mxu0 %v1239_v10  ;;  %v1203_v28 = vor.u32 %v1443_v24, %v1202_v22  ;;  %v1207_v29 = vor.u32 %v1442_v25, %v1204_v27  ;;  %v1190_v30 = vld [vmem:[#allocation4 + $0x30] sm:$0xf]  ;;  %v1440_v31 = vld [vmem:[#allocation4 + $0x38] sm:$0xf0]  ;;  %v1439_v32 = vld [vmem:[#allocation4 + $0x34] sm:$0xf] }
  0x29   :  { %309 = vmatpush.bf16.msra.mxu1 %v1243_v11  ;;  %v1192_v33 = vld [vmem:[#allocation4 + $0x3c] sm:$0xf0]  ;;  %v1191_v34 = vor.u32 %v1440_v31, %v1190_v30  ;;  %v1178_v36 = vld [vmem:[#allocation4 + $0x18] sm:$0xf]  ;;  %v1437_v37 = vld [vmem:[#allocation4 + $0x20] sm:$0xf0] }
  0x2a   :  { %v1195_v35 = vor.u32 %v1439_v32, %v1192_v33  ;;  %v1436_v38 = vld [vmem:[#allocation4 + $0x1c] sm:$0xf]  ;;  %v1180_v39 = vld [vmem:[#allocation4 + $0x24] sm:$0xf0]  ;;  %v1179_v40 = vor.u32 %v1437_v37, %v1178_v36  ;;  %v1166_v42 = vld [vmem:[#allocation4] sm:$0xf] }
  0x2b   :  { %v1183_v41 = vor.u32 %v1436_v38, %v1180_v39  ;;  %v1434_v43 = vld [vmem:[#allocation4 + $0x8] sm:$0xf0]  ;;  %v1433_v44 = vld [vmem:[#allocation4 + $0x4] sm:$0xf]  ;;  %v1168_v45 = vld [vmem:[#allocation4 + $0xc] sm:$0xf0] }
  0x2c   :  { %296 = vmatpush.bf16.msra.mxu0 %v1227_v16  ;;  %v1167_v46 = vor.u32 %v1434_v43, %v1166_v42  ;;  %v1786_v47 = vld [vmem:[%s1908_s1] sm:$0xff]  ;;  %v1791_v48 = vld [vmem:[%s1908_s1 + $0x8] sm:$0xff]  ;;  %v1171_v49 = vor.u32 %v1433_v44, %v1168_v45  ;;  %v1258_v51 = vld [vmem:[#allocation4 + $0xb0] sm:$0xf]  ;;  %vm345_vm0 = vcmask 523264   ;;  %v1801_v22 = vand.u32 127, %v337_v21 }
  0x2d   :  { %310 = vmatpush.bf16.msra.mxu1 %v1231_v17  ;;  %v125_v50 = vpack.c.bf16 %v1791_v48, %v1786_v47  ;;  %v1456_v52 = vld [vmem:[#allocation4 + $0xb8] sm:$0xf0]  ;;  %v1246_v54 = vld [vmem:[#allocation4 + $0x98] sm:$0xf]  ;;  %v1453_v55 = vld [vmem:[#allocation4 + $0xa0] sm:$0xf0] }
  0x2e   :  { %v1259_v53 = vor.u32 %v1456_v52, %v1258_v51  ;;  %v1247_v56 = vor.u32 %v1453_v55, %v1246_v54  ;;  %v1234_v57 = vld [vmem:[#allocation4 + $0x80] sm:$0xf]  ;;  %v1450_v58 = vld [vmem:[#allocation4 + $0x88] sm:$0xf0]  ;;  %v1222_v60 = vld [vmem:[#allocation4 + $0x68] sm:$0xf] }
  0x2f   :  { %v1235_v59 = vor.u32 %v1450_v58, %v1234_v57  ;;  %v1447_v61 = vld [vmem:[#allocation4 + $0x70] sm:$0xf0]  ;;  %v1210_v63 = vld [vmem:[#allocation4 + $0x50] sm:$0xf]  ;;  %v1444_v0 = vld [vmem:[#allocation4 + $0x58] sm:$0xf0] }
  0x30   :  { %297 = vmatpush.bf16.msra.mxu0 %v1215_v23  ;;  %322 = vmatpush.bf16.msra.mxu2 %v1259_v53  ;;  %v1223_v62 = vor.u32 %v1447_v61, %v1222_v60  ;;  %v158_v1 = vld [vmem:[%s1912_s5] sm:$0x7]  ;;  %v1211_v2 = vor.u32 %v1444_v0, %v1210_v63  ;;  %v1198_v3 = vld [vmem:[#allocation4 + $0x38] sm:$0xf]  ;;  %v1441_v4 = vld [vmem:[#allocation4 + $0x40] sm:$0xf0] }
  0x31   :  { %311 = vmatpush.bf16.msra.mxu1 %v1219_v26  ;;  %v160_v5 = vperm.slane %v158_v1, 0  ;;  %v161_v6 = vperm.slane %v158_v1, 1  ;;  %v1199_v7 = vor.u32 %v1441_v4, %v1198_v3  ;;  %v1186_v9 = vld [vmem:[#allocation4 + $0x20] sm:$0xf]  ;;  %v1438_v10 = vld [vmem:[#allocation4 + $0x28] sm:$0xf0] }
  0x32   :  { %v1187_v15 = vor.u32 %v1438_v10, %v1186_v9  ;;  %v1174_v17 = vld [vmem:[#allocation4 + $0x8] sm:$0xf]  ;;  %v1435_v18 = vld [vmem:[#allocation4 + $0x10] sm:$0xf0]  ;;  %s336_s5 = sld [smem:[#allocation3]]  ;;  %v162_v24 = vperm.slane %v158_v1, 2 }
  0x33   :  { %v1175_v20 = vor.u32 %v1435_v18, %v1174_v17  ;;  %v1677_v25 = vmov -10000.0   ;;  %vm365_vm2 = vcmask 64512   ;;  %vm379_vm3 = vcmask 1043456   ;;  %v1462_v51 = vld [vmem:[#allocation6 + $0x28] sm:$0xff]  ;;  %v1461_v52 = vld [vmem:[#allocation6 + $0x20] sm:$0xff]  ;;  %v1460_v1 = vld [vmem:[#allocation6 + $0x18] sm:$0xff] }
  0x34   :  { %298 = vmatpush.bf16.msra.mxu0 %v1203_v28  ;;  %323 = vmatpush.bf16.msra.mxu2 %v1247_v56  ;;  %v1458_v3 = vld [vmem:[#allocation6 + $0x8] sm:$0xff]  ;;  %v1457_v4 = vld [vmem:[#allocation6] sm:$0xff]  ;;  %s1298_s19 = sld [smem:[#allocation3 + $0x1]] }
  0x35   :  { %312 = vmatpush.bf16.msra.mxu1 %v1207_v29 }
  0x38   :  { %299 = vmatpush.bf16.msra.mxu0 %v1191_v34  ;;  %324 = vmatpush.bf16.msra.mxu2 %v1235_v59  ;;  %v339_v23 = vstv %s336_s5 }
  0x39   :  { %313 = vmatpush.bf16.msra.mxu1 %v1195_v35  ;;  %vm340_vm1 = vcmp.lt.s32.totalorder %v1801_v22, %v339_v23 }
  0x3a   :  { %v1805_v26 = vsel %vm340_vm1, 0.0, %v1677_v25 }
  0x3c   :  { %300 = vmatpush.bf16.msra.mxu0 %v1179_v40  ;;  %325 = vmatpush.bf16.msra.mxu2 %v1223_v62 }
  0x3d   :  { %314 = vmatpush.bf16.msra.mxu1 %v1183_v41 }
  0x40   :  { %301 = vmatpush.bf16.msra.mxu0 %v1167_v46  ;;  %326 = vmatpush.bf16.msra.mxu2 %v1211_v2  ;;  %v1459_v2 = vld [vmem:[#allocation6 + $0x10] sm:$0xff] }
  0x41   :  { %315 = vmatpush.bf16.msra.mxu1 %v1171_v49  ;;  %v1464_v49 = vld [vmem:[#allocation6 + $0x38] sm:$0xff] }
  0x43   :  { %302 = vmatmul.bf16.vlgmr.msra.gmra.mxu0 %v125_v50 }
  0x44   :  { %316 = vmatmul.bf16.vlgmr.msra.gmra.mxu1 %v125_v50  ;;  %327 = vmatpush.bf16.msra.mxu2 %v1199_v7 }
  0x45   :  { %506 = vmatpush.bf16.msrb.mxu1 %v1464_v49 }
  0x48   :  { %328 = vmatpush.bf16.msra.mxu2 %v1187_v15 }
  0x4c   :  { %329 = vmatpush.bf16.msra.mxu2 %v1175_v20 }
  0x4f   :  { %330 = vmatmul.bf16.vlgmr.msra.gmra.mxu2 %v125_v50  ;;  %v1463_v50 = vld [vmem:[#allocation6 + $0x30] sm:$0xff] }
  0x50   :  { %507 = vmatpush.bf16.msrb.mxu1 %v1463_v50  ;;  %546 = vmatpush.bf16.msrb.mxu2 %v1460_v1 }
  0x54   :  { %508 = vmatpush.bf16.msrb.mxu1 %v1462_v51  ;;  %547 = vmatpush.bf16.msrb.mxu2 %v1459_v2 }
  0x58   :  { %509 = vmatpush.bf16.msrb.mxu1 %v1461_v52  ;;  %548 = vmatpush.bf16.msrb.mxu2 %v1458_v3 }
  0x5c   :  { %549 = vmatpush.bf16.msrb.mxu2 %v1457_v4 }
  0xc0   :  { %v303_v8 = vpop.f32.mrf.mxu0 }
  0xc1   :  { %v304_v11 = vadd.f32 %v303_v8, %v160_v5  ;;  %v317_v12 = vpop.f32.mrf.mxu1 }
  0xc2   :  { %v318_v13 = vadd.f32 %v317_v12, %v161_v6 }
  0xc3   :  { %v342_v14 = vpack.c.bf16 %v304_v11, %v304_v11 }
  0xc4   :  { %v343_v16 = vpack.c.bf16 %v318_v13, %v318_v13 }
  0xc5   :  { %408 = vrot.lane.b32.xlu1 %v342_v14, %s1668_s29 }
  0xc6   :  { %v350_v19 = vsel %vm345_vm0, %v343_v16, 0 }
  0xc7   :  { %359 = vmatpush.bf16.xpose.msra.mxu3 %v350_v19 }
  0xc8   :  { %v305_v37 = vpop.f32.mrf.mxu0 }
  0xc9   :  { %v319_v34 = vpop.f32.mrf.mxu1  ;;  %v306_v38 = vadd.f32 %v305_v37, %v160_v5 }
  0xca   :  { %v320_v35 = vadd.f32 %v319_v34, %v161_v6 }
  0xcb   :  { %v559_v39 = vpack.c.bf16 %v306_v38, %v306_v38 }
  0xcc   :  { %v560_v36 = vpack.c.bf16 %v320_v35, %v320_v35 }
  0xce   :  { %1260 = vmatmul.msk.bf16.vlgmr.msra.gmra.mxu3 %vm345_vm0, %v342_v14  ;;  %v566_v61 = vsel %vm345_vm0, %v560_v36, 0 }
  0xd2   :  { %v331_v28 = vpop.f32.mrf.mxu2 }
  0xd3   :  { %v332_v30 = vadd.f32 %v331_v28, %v162_v24 }
  0xd5   :  { %v344_v32 = vpack.c.bf16 %v332_v30, %v332_v30 }
  0xd7   :  { %443 = vrot.lane.b32.xlu2 %v344_v32, %s1668_s29  ;;  %v381_v43 = vsel %vm379_vm3, %v344_v32, 0 }
  0xd8   :  { %390 = vmatpush.bf16.msrb.mxu3 %v381_v43 }
  0xda   :  { %v333_v40 = vpop.f32.mrf.mxu2 }
  0xdb   :  { %v334_v41 = vadd.f32 %v333_v40, %v162_v24 }
  0xdd   :  { %v1813_v42 = vpack.c.bf16 %v334_v41, %v334_v41 }
  0xdf   :  { %v595_v44 = vsel %vm379_vm3, %v1813_v42, 0 }
 0x131   :  { %v444_v45 = vpop.permute.xlu2 %443 }
 0x132   :  { %v449_v46 = vsel %vm379_vm3, %v444_v45, 0 }
 0x133   :  { %458 = vmatpush.bf16.msrb.mxu0 %v449_v46 }
 0x137   :  { %604 = vmatpush.bf16.msra.mxu0 %v595_v44  ;;  %v409_v0 = vpop.permute.xlu1 %408 }
 0x151   :  { %v361_v27 = vpop.f32.mrf.mxu3 }
 0x152   :  { %v362_v29 = vadd.f32 %v361_v27, %v1805_v26 }
 0x154   :  { %v366_v31 = vsel %vm365_vm2, %v362_v29, -inf }
 0x155   :  { %367 = vmax.xlane.f32.xlu0 %v366_v31 }
 0x159   :  { %v363_v33 = vpop.f32.mrf.mxu3 }
 0x169   :  { %411 = vrot.lane.b32.xlu0 %v343_v16, %s1668_s29 }
 0x171   :  { %617 = vrot.lane.b32.xlu0 %v560_v36, %s1668_s29  ;;  %v1839_v36 = vld [vmem:[%s1914_s7] ss:$0 sm:$0xff] }
 0x179   :  { %614 = vrot.lane.b32.xlu0 %v559_v39, %s1668_s29 }
 0x1c8   :  { %v368_v53 = vpop.xlane.xlu0 %367 }
 0x1c9   :  { %v369_v54 = vsub.f32 %v362_v29, %v368_v53 }
 0x1cb   :  { %v370_v55 = vmul.f32 1.442695, %v369_v54 }
 0x1cd   :  { %1516 = vpow2.f32 %v370_v55 }
 0x1d3   :  { %v1517_v56 = vpop.eup %1516 }
 0x1d4   :  { %v372_v57 = vsel %vm365_vm2, %v1517_v56, 0.0  ;;  %v375_v58 = vpack.c.bf16 %v1517_v56, %v1517_v56 }
 0x1d5   :  { %373 = vadd.xlane.f32.xlu0 %v372_v57 }
 0x1d6   :  { %1261 = vmatmul.msk.bf16.vlgmr.msrb.gmra.mxu3 %vm365_vm2, %v375_v58 }
 0x1db   :  { %v412_v59 = vpop.permute.xlu0 %411 }
 0x1dc   :  { %v417_v60 = vsel %vm345_vm0, %v412_v59, 0 }
 0x1dd   :  { %426 = vmatpush.bf16.xpose.msra.mxu3 %v417_v60 }
 0x1e3   :  { %v618_v62 = vpop.permute.xlu0 %617 }
 0x1e4   :  { %v623_v63 = vsel %vm345_vm0, %v618_v62, 0 }
 0x1e5   :  { %575 = vmatpush.bf16.xpose.msrb.mxu3 %v566_v61  ;;  %632 = vmatpush.bf16.xpose.msra.mxu1 %v623_v63 }
 0x1e6   :  { %1262 = vmatmul.msk.bf16.vlgmr.msra.gmra.mxu3 %vm345_vm0, %v409_v0 }
 0x1eb   :  { %v615_v5 = vpop.permute.xlu0 %614 }
 0x1ed   :  { %680 = vmatpush.bf16.msra.mxu3 %v1464_v49 }
 0x1f1   :  { %681 = vmatpush.bf16.msra.mxu3 %v1463_v50 }
 0x1f5   :  { %682 = vmatpush.bf16.msra.mxu3 %v1462_v51 }
 0x1f6   :  { %1299 = vmatmul.msk.bf16.vlgmr.msrb.gmra.mxu3 %vm345_vm0, %v559_v39 }
 0x1f9   :  { %683 = vmatpush.bf16.msra.mxu3 %v1461_v52  ;;  %v1678_v52 = vmov 128.0  }
 0x248   :  { %v374_v6 = vpop.xlane.xlu0 %373 }
 0x249   :  { %1518 = vrcp.f32 %v374_v6 }
 0x24f   :  { %v1519_v7 = vpop.eup %1518 }
 0x259   :  { %v392_v8 = vpop.f32.mrf.mxu3 }
 0x25a   :  { %v397_v9 = vmul.f32 %v1519_v7, %v392_v8 }
 0x25c   :  { %v398_v10 = vpack.c.bf16 %v397_v9, %v397_v9 }
 0x25e   :  { %1297 = vmatmul.msk.bf16.vlgmr.msrb.gmra.mxu2 %vm345_vm0, %v398_v10 }
 0x261   :  { %v394_v11 = vpop.f32.mrf.mxu3 }
 0x269   :  { %v428_v12 = vpop.f32.mrf.mxu3 }
 0x26a   :  { %v429_v13 = vadd.f32 %v428_v12, %v1805_v26 }
 0x26c   :  { %v432_v14 = vsel %vm365_vm2, %v429_v13, -inf }
 0x26d   :  { %433 = vmax.xlane.f32.xlu1 %v432_v14 }
 0x271   :  { %v430_v15 = vpop.f32.mrf.mxu3 }
 0x279   :  { %v577_v16 = vpop.f32.mrf.mxu3 }
 0x281   :  { %v579_v17 = vpop.f32.mrf.mxu3 }
 0x286   :  { %649 = vrot.lane.b32.xlu1 %v1813_v42, %s1668_s29  ;;  %v556_v42 = vstv %s1298_s19 }
 0x287   :  { %vm557_vm4 = vcmp.lt.s32.totalorder %v1801_v22, %v556_v42  ;;  %v1357_v42 = vld [vmem:[#allocation8 + $0x68] sm:$0xf0] }
 0x288   :  { %v558_v43 = vsel %vm557_vm4, 0.0, %v1677_v25 }
 0x289   :  { %v578_v49 = vadd.f32 %v577_v16, %v558_v43 }
 0x28b   :  { %v581_v51 = vsel %vm365_vm2, %v578_v49, -inf }
 0x2e0   :  { %v434_v18 = vpop.xlane.xlu1 %433 }
 0x2e1   :  { %v435_v19 = vsub.f32 %v429_v13, %v434_v18  ;;  %v551_v20 = vpop.f32.mrf.mxu2 }
 0x2e3   :  { %v436_v21 = vmul.f32 1.442695, %v435_v19 }
 0x2e5   :  { %1520 = vpow2.f32 %v436_v21 }
 0x2e9   :  { %v553_v23 = vpop.f32.mrf.mxu2 }
 0x2eb   :  { %v1521_v24 = vpop.eup %1520 }
 0x2ec   :  { %v438_v27 = vsel %vm365_vm2, %v1521_v24, 0.0  ;;  %v441_v28 = vpack.c.bf16 %v1521_v24, %v1521_v24 }
 0x2ed   :  { %439 = vadd.xlane.f32.xlu2 %v438_v27 }
 0x2ee   :  { %1263 = vmatmul.msk.bf16.vlgmr.msrb.gmra.mxu0 %vm365_vm2, %v441_v28 }
 0x2ef   :  { %696 = vmatpush.bf16.msrb.mxu0 %v1460_v1 }
 0x2f3   :  { %697 = vmatpush.bf16.msrb.mxu0 %v1459_v2 }
 0x2f7   :  { %698 = vmatpush.bf16.msrb.mxu0 %v1458_v3 }
 0x2f8   :  { %v650_v26 = vpop.permute.xlu1 %649 }
 0x2f9   :  { %v655_v29 = vsel %vm379_vm3, %v650_v26, 0 }
 0x2fa   :  { %664 = vmatpush.bf16.msra.mxu2 %v655_v29  ;;  %v1363_v29 = vld [vmem:[#allocation8 + $0x70] sm:$0xf] }
 0x2fb   :  { %699 = vmatpush.bf16.msrb.mxu0 %v1457_v4 }
 0x360   :  { %v440_v30 = vpop.xlane.xlu2 %439 }
 0x361   :  { %1522 = vrcp.f32 %v440_v30  ;;  %v1480_v30 = vld [vmem:[#allocation8 + $0x74] sm:$0xf0] }
 0x362   :  { %1524 = vrcp.f32 %v1678_v52 }
 0x367   :  { %v1523_v31 = vpop.eup %1522 }
 0x36b   :  { %v460_v32 = vpop.f32.mrf.mxu0 }
 0x36c   :  { %v465_v33 = vmul.f32 %v1523_v31, %v460_v32  ;;  %v1479_v31 = vld [vmem:[#allocation8 + $0x74] sm:$0xf]  ;;  %v1364_v32 = vor.u32 %v1480_v30, %v1363_v29 }
 0x36e   :  { %v466_v34 = vpack.c.bf16 %v465_v33, %v465_v33  ;;  %v1365_v33 = vld [vmem:[#allocation8 + $0x78] sm:$0xf0] }
 0x370   :  { %1280 = vmatmul.msk.bf16.vlgmr.msrb.gmra.mxu1 %vm345_vm0, %v466_v34  ;;  %v1368_v34 = vor.u32 %v1479_v31, %v1365_v33 }
 0x371   :  { %875 = vmatpush.bf16.msrb.mxu1 %v1364_v32 }
 0x372   :  { %889 = vmatpush.bf16.msrb.mxu2 %v1368_v34 }
 0x373   :  { %v462_v35 = vpop.f32.mrf.mxu0 }
 0x380   :  { %1301 = vmatmul.msk.bf16.vlgmr.msra.gmra.mxu1 %vm345_vm0, %v615_v5 }
 0x3ed   :  { %v511_v37 = vpop.f32.mrf.mxu1 }
 0x3ee   :  { %v552_v38 = vadd.f32 %v551_v20, %v511_v37 }
 0x3f0   :  { %v709_v39 = vadd.f32 %v1839_v36, %v552_v38 }
 0x3f2   :  { %v711_v40 = vadd.f32 %v709_v39, %v1786_v47  ;;  %v1525_v47 = vpop.eup %1524  ;;  %v1478_v39 = vld [vmem:[#allocation8 + $0x64] sm:$0xf0] }
 0x3f3   :  { %v720_v53 = vmul.f32 128.0, %v1525_v47  ;;  %vm724_vm5 = vweird.f32 %v1525_v47 }
 0x3f4   :  { %715 = vadd.xlane.f32.xlu1 %v711_v40 }
 0x3f5   :  { %v513_v41 = vpop.f32.mrf.mxu1  ;;  %v721_v54 = vsub.f32 1.0, %v720_v53  ;;  %v1474_v53 = vld [vmem:[#allocation8 + $0x44] sm:$0xf0] }
 0x3f7   :  { %v722_v55 = vmul.f32 %v1525_v47, %v721_v54  ;;  %v1473_v54 = vld [vmem:[#allocation8 + $0x44] sm:$0xf] }
 0x3f9   :  { %v723_v56 = vadd.f32 %v1525_v47, %v722_v55 }
 0x3fb   :  { %v1847_v22 = vsel %vm724_vm5, %v1525_v47, %v723_v56  ;;  %v1339_v47 = vld [vmem:[#allocation8 + $0x40] sm:$0xf]  ;;  %v1341_v56 = vld [vmem:[#allocation8 + $0x48] sm:$0xf0] }
 0x3fc   :  { %v1340_v55 = vor.u32 %v1474_v53, %v1339_v47  ;;  %v1485_v47 = vld [vmem:[#allocation9 + $0x20] sm:$0xff]  ;;  %v1494_v53 = vld [vmem:[#allocation9 + $0x68] sm:$0xff] }
 0x3fd   :  { %v634_v44 = vpop.f32.mrf.mxu1 }
 0x3fe   :  { %v635_v45 = vadd.f32 %v634_v44, %v558_v43  ;;  %v1347_v44 = vld [vmem:[#allocation8 + $0x50] sm:$0xf] }
 0x400   :  { %v638_v46 = vsel %vm365_vm2, %v635_v45, -inf }
 0x401   :  { %639 = vmax.xlane.f32.xlu2 %v638_v46  ;;  %v1475_v46 = vld [vmem:[#allocation8 + $0x54] sm:$0xf] }
 0x405   :  { %v636_v50 = vpop.f32.mrf.mxu1 }
 0x406   :  { %v1349_v50 = vld [vmem:[#allocation8 + $0x58] sm:$0xf0] }
 0x409   :  { %582 = vmax.xlane.f32.xlu2 %v581_v51  ;;  %v1352_v51 = vor.u32 %v1475_v46, %v1349_v50  ;;  %v1487_v50 = vld [vmem:[#allocation9 + $0x30] sm:$0xff] }
 0x467   :  { %v716_v25 = vpop.xlane.xlu1 %715 }
 0x468   :  { %v726_v57 = vmul.f32 %v1847_v22, %v716_v25 }
 0x46a   :  { %v1850_v58 = vsub.f32 %v711_v40, %v726_v57  ;;  %v1477_v40 = vld [vmem:[#allocation8 + $0x64] sm:$0xf]  ;;  %v1344_v57 = vor.u32 %v1473_v54, %v1341_v56  ;;  %v1484_v54 = vld [vmem:[#allocation9 + $0x18] sm:$0xff]  ;;  %v1483_v56 = vld [vmem:[#allocation9 + $0x10] sm:$0xff] }
 0x46b   :  { %v1360_v43 = vor.u32 %v1477_v40, %v1357_v42 }
 0x46c   :  { %v730_v59 = vmul.f32 %v1850_v58, %v1850_v58 }
 0x46d   :  { %890 = vmatpush.bf16.msrb.mxu2 %v1360_v43  ;;  %v1512_v43 = vld [vmem:[%s1916_s9] ss:$0 sm:$0xff] }
 0x46e   :  { %732 = vadd.xlane.f32.xlu0 %v730_v59  ;;  %v1331_v59 = vld [vmem:[#allocation8 + $0x30] sm:$0xf] }
 0x471   :  { %891 = vmatpush.bf16.msrb.mxu2 %v1352_v51  ;;  %v1486_v51 = vld [vmem:[#allocation9 + $0x28] sm:$0xff] }
 0x474   :  { %v640_v60 = vpop.xlane.xlu2 %639 }
 0x475   :  { %v641_v61 = vsub.f32 %v635_v45, %v640_v60  ;;  %v1476_v45 = vld [vmem:[#allocation8 + $0x54] sm:$0xf0]  ;;  %892 = vmatpush.bf16.msrb.mxu2 %v1344_v57  ;;  %v1482_v57 = vld [vmem:[#allocation9 + $0x8] sm:$0xff] }
 0x476   :  { %v1472_v60 = vld [vmem:[#allocation8 + $0x34] sm:$0xf0] }
 0x477   :  { %v642_v62 = vmul.f32 1.442695, %v641_v61  ;;  %v1471_v61 = vld [vmem:[#allocation8 + $0x34] sm:$0xf] }
 0x479   :  { %1526 = vpow2.f32 %v642_v62  ;;  %v1332_v62 = vor.u32 %v1472_v60, %v1331_v59  ;;  %v1491_v59 = vld [vmem:[#allocation9 + $0x50] sm:$0xff]  ;;  %v789_v60 = vld [vmem:[%s1918_s11] sm:$0x3] }
 0x47c   :  { %v583_v63 = vpop.xlane.xlu2 %582 }
 0x47d   :  { %v584_v0 = vsub.f32 %v578_v49, %v583_v63  ;;  %v1348_v49 = vor.u32 %v1476_v45, %v1347_v44  ;;  %v1333_v63 = vld [vmem:[#allocation8 + $0x38] sm:$0xf0] }
 0x47f   :  { %v1527_v1 = vpop.eup %1526  ;;  %v585_v2 = vmul.f32 1.442695, %v584_v0 }
 0x480   :  { %v647_v3 = vpack.c.bf16 %v1527_v1, %v1527_v1  ;;  %v644_v4 = vsel %vm365_vm2, %v1527_v1, 0.0  ;;  %v1336_v1 = vor.u32 %v1471_v61, %v1333_v63  ;;  %v1481_v61 = vld [vmem:[#allocation9] sm:$0xff]  ;;  %v1490_v63 = vld [vmem:[#allocation9 + $0x48] sm:$0xff] }
 0x481   :  { %1528 = vpow2.f32 %v585_v2  ;;  %645 = vadd.xlane.f32.xlu2 %v644_v4  ;;  %v1323_v2 = vld [vmem:[#allocation8 + $0x20] sm:$0xf]  ;;  %v1469_v4 = vld [vmem:[#allocation8 + $0x24] sm:$0xf] }
 0x482   :  { %1302 = vmatmul.msk.bf16.vlgmr.msra.gmra.mxu2 %vm365_vm2, %v647_v3  ;;  %v1470_v3 = vld [vmem:[#allocation8 + $0x24] sm:$0xf0] }
 0x483   :  { %893 = vmatpush.bf16.msrb.mxu2 %v1336_v1 }
 0x487   :  { %v1529_v5 = vpop.eup %1528 }
 0x488   :  { %v590_v6 = vpack.c.bf16 %v1529_v5, %v1529_v5  ;;  %v587_v7 = vsel %vm365_vm2, %v1529_v5, 0.0  ;;  %v1324_v5 = vor.u32 %v1470_v3, %v1323_v2  ;;  %v1489_v2 = vld [vmem:[#allocation9 + $0x40] sm:$0xff] }
 0x489   :  { %588 = vadd.xlane.f32.xlu2 %v587_v7 }
 0x48a   :  { %1300 = vmatmul.msk.bf16.vlgmr.msra.gmra.mxu0 %vm365_vm2, %v590_v6  ;;  %v1325_v6 = vld [vmem:[#allocation8 + $0x28] sm:$0xf0] }
 0x48b   :  { %v1328_v7 = vor.u32 %v1469_v4, %v1325_v6  ;;  %v792_v4 = vperm.slane %v789_v60, 1 }
 0x48d   :  { %894 = vmatpush.bf16.msrb.mxu2 %v1328_v7 }
 0x4e1   :  { %v733_v52 = vpop.xlane.xlu0 %732 }
 0x4e2   :  { %v736_v25 = vmul.f32 %v733_v52, %v1847_v22  ;;  %v1495_v52 = vld [vmem:[#allocation9 + $0x70] sm:$0xff] }
 0x4e4   :  { %v738_v0 = vadd.f32 1e-12, %v736_v25  ;;  %v1492_v25 = vld [vmem:[#allocation9 + $0x58] sm:$0xff] }
 0x4e6   :  { %vm746_vm7 = vweird.f32 %v738_v0 }
 0x4f4   :  { %v646_v8 = vpop.xlane.xlu2 %645 }
 0x4f5   :  { %1530 = vrcp.f32 %v646_v8  ;;  %v1315_v8 = vld [vmem:[#allocation8 + $0x10] sm:$0xf] }
 0x4fb   :  { %v1531_v10 = vpop.eup %1530 }
 0x4fc   :  { %v589_v9 = vpop.xlane.xlu2 %588 }
 0x4fd   :  { %1532 = vrcp.f32 %v589_v9  ;;  %v1468_v9 = vld [vmem:[#allocation8 + $0x14] sm:$0xf0] }
 0x4fe   :  { %1534 = vrsqrt.f32 %v738_v0 }
 0x503   :  { %v1533_v13 = vpop.eup %1532 }
 0x505   :  { %v666_v11 = vpop.f32.mrf.mxu2 }
 0x506   :  { %v671_v12 = vmul.f32 %v1531_v10, %v666_v11  ;;  %v1467_v10 = vld [vmem:[#allocation8 + $0x14] sm:$0xf]  ;;  %v1316_v11 = vor.u32 %v1468_v9, %v1315_v8 }
 0x507   :  { %v606_v14 = vpop.f32.mrf.mxu0 }
 0x508   :  { %v672_v15 = vpack.c.bf16 %v671_v12, %v671_v12  ;;  %v611_v16 = vmul.f32 %v1533_v13, %v606_v14  ;;  %v1317_v12 = vld [vmem:[#allocation8 + $0x18] sm:$0xf0]  ;;  %v1307_v14 = vld [vmem:[#allocation8] sm:$0xf] }
 0x509   :  { %v1320_v13 = vor.u32 %v1467_v10, %v1317_v12 }
 0x50a   :  { %v612_v17 = vpack.c.bf16 %v611_v16, %v611_v16  ;;  %1303 = vmatmul.msk.bf16.vlgmr.msra.gmra.mxu3 %vm345_vm0, %v672_v15  ;;  %v1466_v15 = vld [vmem:[#allocation8 + $0x4] sm:$0xf0]  ;;  %v1465_v16 = vld [vmem:[#allocation8 + $0x4] sm:$0xf] }
 0x50b   :  { %895 = vmatpush.bf16.msrb.mxu2 %v1320_v13 }
 0x50c   :  { %1304 = vmatmul.msk.bf16.vlgmr.msrb.gmra.mxu0 %vm345_vm0, %v612_v17  ;;  %v1308_v17 = vor.u32 %v1466_v15, %v1307_v14 }
 0x50d   :  { %v668_v18 = vpop.f32.mrf.mxu2 }
 0x50e   :  { %v1309_v18 = vld [vmem:[#allocation8 + $0x8] sm:$0xf0] }
 0x50f   :  { %v608_v19 = vpop.f32.mrf.mxu0 }
 0x510   :  { %v1535_v19 = vpop.eup %1534 }
 0x511   :  { %vm747_vm6 = vweird.f32 %v1535_v19 }
 0x512   :  { %vm748_vm8 = vmor %vm746_vm7, %vm747_vm6 }
 0x589   :  { %v701_v20 = vpop.f32.mrf.mxu0 }
 0x58d   :  { %v685_v21 = vpop.f32.mrf.mxu3 }
 0x58e   :  { %v702_v23 = vadd.f32 %v701_v20, %v685_v21  ;;  %v1312_v20 = vor.u32 %v1465_v16, %v1309_v18  ;;  %v741_v21 = vmul.f32 %v1535_v19, %v738_v0 }
 0x590   :  { %v710_v24 = vadd.f32 %v1839_v36, %v702_v23  ;;  %896 = vmatpush.bf16.msrb.mxu2 %v1312_v20  ;;  %v742_v23 = vmul.f32 %v1535_v19, %v741_v21 }
 0x591   :  { %v703_v27 = vpop.f32.mrf.mxu0 }
 0x592   :  { %v712_v28 = vadd.f32 %v710_v24, %v1791_v48  ;;  %v1355_v48 = vld [vmem:[#allocation8 + $0x60] sm:$0xf] }
 0x593   :  { %v1356_v41 = vor.u32 %v1478_v39, %v1355_v48  ;;  %v1511_v48 = vld [vmem:[%s1915_s8] ss:$0 sm:$0xff] }
 0x594   :  { %717 = vadd.xlane.f32.xlu2 %v712_v28 }
 0x595   :  { %v687_v26 = vpop.f32.mrf.mxu3  ;;  %876 = vmatpush.bf16.msrb.mxu1 %v1356_v41 }
 0x596   :  { %v743_v26 = vmul.f32 0.5, %v742_v23 }
 0x598   :  { %v744_v29 = vsub.f32 1.5, %v743_v26 }
 0x599   :  { %877 = vmatpush.bf16.msrb.mxu1 %v1348_v49  ;;  %v1488_v49 = vld [vmem:[#allocation9 + $0x38] sm:$0xff] }
 0x59a   :  { %v745_v31 = vmul.f32 %v1535_v19, %v744_v29  ;;  %1073 = vmatpush.bf16.msrb.mxu3 %v1488_v49 }
 0x59c   :  { %v749_v34 = vsel %vm748_vm8, %v1535_v19, %v745_v31 }
 0x59d   :  { %878 = vmatpush.bf16.msrb.mxu1 %v1340_v55  ;;  %v1493_v55 = vld [vmem:[#allocation9 + $0x60] sm:$0xff] }
 0x59e   :  { %1074 = vmatpush.bf16.msrb.mxu3 %v1487_v50 }
 0x5a1   :  { %879 = vmatpush.bf16.msrb.mxu1 %v1332_v62  ;;  %v791_v62 = vperm.slane %v789_v60, 0 }
 0x5a2   :  { %1075 = vmatpush.bf16.msrb.mxu3 %v1486_v51 }
 0x5a5   :  { %880 = vmatpush.bf16.msrb.mxu1 %v1324_v5 }
 0x5a6   :  { %1076 = vmatpush.bf16.msrb.mxu3 %v1485_v47 }
 0x5a9   :  { %881 = vmatpush.bf16.msrb.mxu1 %v1316_v11 }
 0x5aa   :  { %1077 = vmatpush.bf16.msrb.mxu3 %v1484_v54 }
 0x5ad   :  { %882 = vmatpush.bf16.msrb.mxu1 %v1308_v17 }
 0x5ae   :  { %1078 = vmatpush.bf16.msrb.mxu3 %v1483_v56 }
 0x5b2   :  { %1079 = vmatpush.bf16.msrb.mxu3 %v1482_v57 }
 0x5b6   :  { %1080 = vmatpush.bf16.msrb.mxu3 %v1481_v61 }
 0x607   :  { %v718_v35 = vpop.xlane.xlu2 %717 }
 0x608   :  { %v727_v37 = vmul.f32 %v1847_v22, %v718_v35 }
 0x60a   :  { %v1863_v38 = vsub.f32 %v712_v28, %v727_v37 }
 0x60c   :  { %v731_v36 = vmul.f32 %v1863_v38, %v1863_v38 }
 0x60e   :  { %734 = vadd.xlane.f32.xlu2 %v731_v36  ;;  %v760_v36 = vmul.f32 %v749_v34, %v1850_v58 }
 0x610   :  { %v765_v42 = vmul.f32 %v1511_v48, %v760_v36 }
 0x612   :  { %v1877_v45 = vadd.f32 %v1512_v43, %v765_v42 }
 0x681   :  { %v735_v24 = vpop.xlane.xlu2 %734 }
 0x682   :  { %v737_v27 = vmul.f32 %v735_v24, %v1847_v22 }
 0x684   :  { %v739_v28 = vadd.f32 1e-12, %v737_v27 }
 0x686   :  { %1536 = vrsqrt.f32 %v739_v28  ;;  %vm756_vm10 = vweird.f32 %v739_v28 }
 0x68c   :  { %v1537_v30 = vpop.eup %1536 }
 0x68d   :  { %v751_v32 = vmul.f32 %v1537_v30, %v739_v28  ;;  %vm757_vm9 = vweird.f32 %v1537_v30 }
 0x68e   :  { %vm758_vm11 = vmor %vm756_vm10, %vm757_vm9 }
 0x68f   :  { %v752_v33 = vmul.f32 %v1537_v30, %v751_v32 }
 0x691   :  { %v753_v35 = vmul.f32 0.5, %v752_v33 }
 0x693   :  { %v754_v37 = vsub.f32 1.5, %v753_v35 }
 0x695   :  { %v755_v39 = vmul.f32 %v1537_v30, %v754_v37 }
 0x697   :  { %v759_v40 = vsel %vm758_vm11, %v1537_v30, %v755_v39 }
 0x698   :  { %v761_v41 = vmul.f32 %v759_v40, %v1863_v38  ;;  %v1496_v38 = vld [vmem:[#allocation9 + $0x78] sm:$0xff] }
 0x699   :  { %1087 = vmatpush.bf16.msra.mxu0 %v1496_v38 }
 0x69a   :  { %v766_v44 = vmul.f32 %v1511_v48, %v761_v41 }
 0x69c   :  { %v1879_v46 = vadd.f32 %v1512_v43, %v766_v44 }
 0x69d   :  { %1088 = vmatpush.bf16.msra.mxu0 %v1495_v52  ;;  %v1513_v52 = vld [vmem:[%s1920_s13] ss:$0 sm:$0xff] }
 0x69e   :  { %v772_v58 = vpack.c.bf16 %v1879_v46, %v1877_v45 }
 0x6a0   :  { %883 = vmatmul.bf16.vlgmr.msrb.gmra.mxu1 %v772_v58  ;;  %897 = vmatmul.bf16.vlgmr.msrb.gmra.mxu2 %v772_v58 }
 0x6a1   :  { %1089 = vmatpush.bf16.msra.mxu0 %v1494_v53 }
 0x6a5   :  { %1090 = vmatpush.bf16.msra.mxu0 %v1493_v55 }
 0x6a9   :  { %1091 = vmatpush.bf16.msra.mxu0 %v1492_v25 }
 0x6ad   :  { %1092 = vmatpush.bf16.msra.mxu0 %v1491_v59 }
 0x6b1   :  { %1093 = vmatpush.bf16.msra.mxu0 %v1490_v63 }
 0x6b5   :  { %1094 = vmatpush.bf16.msra.mxu0 %v1489_v2 }
 0x71d   :  { %v884_v0 = vpop.f32.mrf.mxu1 }
 0x71e   :  { %v885_v1 = vadd.f32 %v884_v0, %v791_v62 }
 0x720   :  { %v907_v3 = vmul.f32 0.044715, %v885_v1  ;;  %v903_v35 = vmul.f32 0.5, %v885_v1 }
 0x722   :  { %v911_v5 = vmul.f32 %v907_v3, %v885_v1 }
 0x723   :  { %v898_v6 = vpop.f32.mrf.mxu2 }
 0x724   :  { %v915_v7 = vmul.f32 %v911_v5, %v885_v1  ;;  %v899_v8 = vadd.f32 %v898_v6, %v792_v4 }
 0x725   :  { %v886_v9 = vpop.f32.mrf.mxu1 }
 0x726   :  { %v919_v10 = vadd.f32 %v915_v7, %v885_v1  ;;  %v908_v11 = vmul.f32 0.044715, %v899_v8  ;;  %v887_v12 = vadd.f32 %v886_v9, %v791_v62  ;;  %v904_v44 = vmul.f32 0.5, %v899_v8 }
 0x728   :  { %v912_v13 = vmul.f32 %v908_v11, %v899_v8  ;;  %v909_v14 = vmul.f32 0.044715, %v887_v12  ;;  %v923_v15 = vmul.f32 0.7978846, %v919_v10  ;;  %v905_v37 = vmul.f32 0.5, %v887_v12 }
 0x72a   :  { %v916_v16 = vmul.f32 %v912_v13, %v899_v8  ;;  %v913_v17 = vmul.f32 %v909_v14, %v887_v12  ;;  %1538 = vtanh.f32 %v923_v15 }
 0x72b   :  { %v900_v18 = vpop.f32.mrf.mxu2 }
 0x72c   :  { %v920_v19 = vadd.f32 %v916_v16, %v899_v8  ;;  %v917_v20 = vmul.f32 %v913_v17, %v887_v12  ;;  %v901_v21 = vadd.f32 %v900_v18, %v792_v4  ;;  %v1514_v18 = vld [vmem:[%s1921_s14] ss:$0 sm:$0xff] }
 0x72e   :  { %v921_v23 = vadd.f32 %v917_v20, %v887_v12  ;;  %v910_v24 = vmul.f32 0.044715, %v901_v21  ;;  %v924_v27 = vmul.f32 0.7978846, %v920_v19  ;;  %v906_v58 = vmul.f32 0.5, %v901_v21 }
 0x730   :  { %v925_v28 = vmul.f32 0.7978846, %v921_v23  ;;  %v914_v26 = vmul.f32 %v910_v24, %v901_v21  ;;  %v1539_v30 = vpop.eup %1538 }
 0x731   :  { %v931_v33 = vadd.f32 1.0, %v1539_v30 }
 0x732   :  { %v918_v29 = vmul.f32 %v914_v26, %v901_v21  ;;  %1540 = vtanh.f32 %v925_v28 }
 0x733   :  { %1542 = vtanh.f32 %v924_v27  ;;  %v935_v39 = vmul.f32 %v931_v33, %v903_v35 }
 0x734   :  { %v922_v31 = vadd.f32 %v918_v29, %v901_v21 }
 0x736   :  { %v926_v32 = vmul.f32 0.7978846, %v922_v31 }
 0x738   :  { %v1541_v34 = vpop.eup %1540  ;;  %1544 = vtanh.f32 %v926_v32 }
 0x739   :  { %v933_v36 = vadd.f32 1.0, %v1541_v34  ;;  %v1543_v48 = vpop.eup %1542 }
 0x73a   :  { %v932_v42 = vadd.f32 1.0, %v1543_v48 }
 0x73b   :  { %v937_v40 = vmul.f32 %v933_v36, %v905_v37 }
 0x73c   :  { %v936_v50 = vmul.f32 %v932_v42, %v904_v44 }
 0x73d   :  { %v939_v41 = vpack.c.bf16 %v937_v40, %v935_v39 }
 0x73e   :  { %v1545_v43 = vpop.eup %1544 }
 0x73f   :  { %1081 = vmatmul.bf16.vlgmr.msrb.gmra.mxu3 %v939_v41  ;;  %v934_v49 = vadd.f32 1.0, %v1545_v43 }
 0x741   :  { %v938_v38 = vmul.f32 %v934_v49, %v906_v58 }
 0x743   :  { %v940_v51 = vpack.c.bf16 %v938_v38, %v936_v50 }
 0x745   :  { %1095 = vmatmul.bf16.vlgmr.msra.gmra.mxu0 %v940_v51 }
 0x7c2   :  { %v1082_v47 = vpop.f32.mrf.mxu3  ;;  %v1096_v53 = vpop.f32.mrf.mxu0 }
 0x7c3   :  { %v1083_v54 = vadd.f32 %v1513_v52, %v1082_v47 }
 0x7c5   :  { %v1097_v55 = vadd.f32 %v1096_v53, %v1083_v54 }
 0x7c7   :  { %v1101_v56 = vadd.f32 %v1097_v55, %v1877_v45 }
 0x7c9   :  { %1105 = vadd.xlane.f32.xlu0 %v1101_v56 }
 0x7ca   :  { %v1084_v25 = vpop.f32.mrf.mxu3  ;;  %v1098_v59 = vpop.f32.mrf.mxu0 }
 0x7cb   :  { %v1085_v57 = vadd.f32 %v1513_v52, %v1084_v25 }
 0x7cd   :  { %v1099_v60 = vadd.f32 %v1098_v59, %v1085_v57 }
 0x7cf   :  { %v1102_v61 = vadd.f32 %v1099_v60, %v1879_v46 }
 0x7d1   :  { %1107 = vadd.xlane.f32.xlu2 %v1102_v61 }
 0x83c   :  { %v1106_v62 = vpop.xlane.xlu0 %1105 }
 0x83d   :  { %v1109_v63 = vmul.f32 %v1106_v62, %v1847_v22 }
 0x83f   :  { %v1111_v0 = vsub.f32 %v1101_v56, %v1109_v63 }
 0x841   :  { %v1113_v1 = vmul.f32 %v1111_v0, %v1111_v0 }
 0x843   :  { %1115 = vadd.xlane.f32.xlu0 %v1113_v1 }
 0x844   :  { %v1108_v2 = vpop.xlane.xlu2 %1107 }
 0x845   :  { %v1110_v3 = vmul.f32 %v1108_v2, %v1847_v22 }
 0x847   :  { %v1112_v4 = vsub.f32 %v1102_v61, %v1110_v3 }
 0x849   :  { %v1114_v5 = vmul.f32 %v1112_v4, %v1112_v4 }
 0x84b   :  { %1117 = vadd.xlane.f32.xlu2 %v1114_v5 }
 0x8b6   :  { %v1116_v45 = vpop.xlane.xlu0 %1115 }
 0x8b7   :  { %v1119_v6 = vmul.f32 %v1116_v45, %v1847_v22 }
 0x8b9   :  { %v1121_v7 = vadd.f32 1e-12, %v1119_v6 }
 0x8bb   :  { %1546 = vrsqrt.f32 %v1121_v7  ;;  %vm1129_vm13 = vweird.f32 %v1121_v7 }
 0x8be   :  { %v1118_v8 = vpop.xlane.xlu2 %1117 }
 0x8bf   :  { %v1120_v46 = vmul.f32 %v1118_v8, %v1847_v22  ;;  %v1515_v22 = vld [vmem:[%s1922_s15] ss:$0 sm:$0xff] }
 0x8c1   :  { %v1547_v9 = vpop.eup %1546  ;;  %v1122_v10 = vadd.f32 1e-12, %v1120_v46 }
 0x8c2   :  { %v1124_v11 = vmul.f32 %v1547_v9, %v1121_v7  ;;  %vm1130_vm12 = vweird.f32 %v1547_v9 }
 0x8c3   :  { %1548 = vrsqrt.f32 %v1122_v10  ;;  %vm1131_vm14 = vmor %vm1129_vm13, %vm1130_vm12  ;;  %vm1139_vm0 = vweird.f32 %v1122_v10 }
 0x8c4   :  { %v1125_v12 = vmul.f32 %v1547_v9, %v1124_v11 }
 0x8c6   :  { %v1126_v13 = vmul.f32 0.5, %v1125_v12 }
 0x8c8   :  { %v1127_v14 = vsub.f32 1.5, %v1126_v13 }
 0x8c9   :  { %v1549_v15 = vpop.eup %1548 }
 0x8ca   :  { %v1128_v16 = vmul.f32 %v1547_v9, %v1127_v14  ;;  %v1134_v17 = vmul.f32 %v1549_v15, %v1122_v10  ;;  %vm1140_vm15 = vweird.f32 %v1549_v15 }
 0x8cb   :  { %vm1141_vm1 = vmor %vm1139_vm0, %vm1140_vm15 }
 0x8cc   :  { %v1132_v19 = vsel %vm1131_vm14, %v1547_v9, %v1128_v16  ;;  %v1135_v20 = vmul.f32 %v1549_v15, %v1134_v17 }
 0x8cd   :  { %v1143_v21 = vmul.f32 %v1132_v19, %v1111_v0 }
 0x8ce   :  { %v1136_v23 = vmul.f32 0.5, %v1135_v20 }
 0x8cf   :  { %v1148_v24 = vmul.f32 %v1514_v18, %v1143_v21 }
 0x8d0   :  { %v1137_v27 = vsub.f32 1.5, %v1136_v23 }
 0x8d1   :  { %v1153_v28 = vadd.f32 %v1515_v22, %v1148_v24 }
 0x8d2   :  { %v1138_v26 = vmul.f32 %v1549_v15, %v1137_v27 }
 0x8d3   :  { %1155 = vst [vmem:[%s1923_s16] sm:$0xff] %v1153_v28 }
 0x8d4   :  { %v1142_v29 = vsel %vm1141_vm1, %v1549_v15, %v1138_v26 }
 0x8d5   :  { %v1144_v30 = vmul.f32 %v1142_v29, %v1112_v4 }
 0x8d7   :  { %v1149_v31 = vmul.f32 %v1514_v18, %v1144_v30 }
 0x8d9   :  { %v1154_v32 = vadd.f32 %v1515_v22, %v1149_v31 }
 0x8db   :  { %1156 = vst [vmem:[%s1923_s16 + $0x8] sm:$0xff] %v1154_v32 }
 0x8dc   :  { %1161 = vsyncpa [#allocation5], 1 }
 0x8dd   :  { %1162 = vsyncpa [#allocation7], 1 }
 0x8de   :  { %1163 = vsyncpa [#allocation10], 1 }

// kernel: bert_classifier_forward.2
= control target key start
LH: loop header
LB: loop body
LE: loop exit
PB: predicated region body
PF: predicated region fallthrough
CT: control target
= control target key end

     0   :  { %s1678_s24 = smov [#allocation3]   ;;  %s2028_s0 = inlined_call_operand.vmem [shape: s32[2], index: 0, kind: input, shape index: {}]   ;;  %s2029_s1 = inlined_call_operand.vmem [shape: f32[16,128], index: 1, kind: input, shape index: {}]   ;;  %s2030_s2 = inlined_call_operand.vmem [shape: f32[1,128], index: 2, kind: input, shape index: {}]   ;;  %s2031_s3 = inlined_call_operand.vmem [shape: f32[1,128], index: 3, kind: input, shape index: {}]   ;;  %s2032_s4 = inlined_call_operand.hbm [shape: bf16[128,384], index: 4, kind: input, shape index: {}]   ;;  %s2033_s5 = inlined_call_operand.vmem [shape: f32[1,384], index: 5, kind: input, shape index: {}]   ;;  %s2034_s6 = inlined_call_operand.hbm [shape: bf16[128,128], index: 6, kind: input, shape index: {}]   ;;  %s2035_s7 = inlined_call_operand.vmem [shape: f32[1,128], index: 7, kind: input, shape index: {}]   ;;  %s2036_s8 = inlined_call_operand.vmem [shape: f32[1,128], index: 8, kind: input, shape index: {}]   ;;  %s2037_s9 = inlined_call_operand.vmem [shape: f32[1,128], index: 9, kind: input, shape index: {}]   ;;  %s2038_s10 = inlined_call_operand.vmem [shape: bf16[128,256], index: 10, kind: input, shape index: {}]   ;;  %s2039_s11 = inlined_call_operand.vmem [shape: f32[1,256], index: 11, kind: input, shape index: {}]   ;;  %s2040_s12 = inlined_call_operand.hbm [shape: bf16[256,128], index: 12, kind: input, shape index: {}]   ;;  %s2041_s13 = inlined_call_operand.vmem [shape: f32[1,128], index: 13, kind: input, shape index: {}]   ;;  %s2042_s14 = inlined_call_operand.vmem [shape: f32[1,128], index: 14, kind: input, shape index: {}]   ;;  %s2043_s15 = inlined_call_operand.vmem [shape: f32[1,128], index: 15, kind: input, shape index: {}]   ;;  %s2044_s16 = inlined_call_operand.vmem [shape: f32[16,128], index: 16, kind: output, shape index: {}]  }
   0x1   :  { %2045 = sst [smem:[#allocation12_spill]] %s2028_s0 }
   0x2   :  { %2046 = sst [smem:[#allocation13_spill]] %s2037_s9 }
   0x3   :  { %s2047_s23 = sld [smem:[#allocation12_spill]] }
   0x9   :  { %s22_s9 = sshll.u32 %s2047_s23, 4  ;;  %s23_s9 = int_to_ptr.vmem [resolvable:$true] %s22_s9 }
   0xa   :  { %25 = dma.vmem_to_smem %s23_s9, 16, %s1678_s24, [#allocation2] }
   0xb   :  { %1672 = dma.done.wait [#allocation2], 16 }
   0xc   :  { %1673 = vsyncadd [#allocation2], 4294967280 }
   0xd   :  { %28 = sfence }
   0xe   :  { %29 = vsyncpa [#allocation5], 0 }
   0xf   :  { %30 = vsyncpa [#allocation7], 0  ;;  %s56_s27 = sshll.u32 %s2034_s6, 4  ;;  %s1679_s28 = smov [#allocation6]   ;;  %s57_s27 = int_to_ptr.hbm [resolvable:$true] %s56_s27 }
  0x10   :  { %s58_s29 = sshll.u32 %s1679_s28, 4  ;;  %s41_s17 = sshll.u32 %s2032_s4, 4  ;;  %s59_s29 = int_to_ptr.vmem [resolvable:$true] %s58_s29  ;;  %s42_s17 = int_to_ptr.hbm [resolvable:$true] %s41_s17 }
  0x11   :  { %s1680_s18 = smov 64   ;;  %s1681_s19 = smov 4  }
  0x12   :  { %64 = dma.hbm_to_vmem [thread:$0]  %s57_s27, 1024, %s59_s29, [#allocation7], %s1680_s18, %s1680_s18, %s1681_s19  }
  0x13   :  { %s1682_s9 = smov [#allocation4]   ;;  %s1683_s21 = smov 192  }
  0x14   :  { %s43_s20 = sshll.u32 %s1682_s9, 4  ;;  %s1684_s22 = smov 12   ;;  %s44_s20 = int_to_ptr.vmem [resolvable:$true] %s43_s20 }
  0x15   :  { %49 = dma.hbm_to_vmem [thread:$0]  %s42_s17, 3072, %s44_s20, [#allocation5], %s1683_s21, %s1683_s21, %s1684_s22  }
  0x16   :  { %s79_s24 = sshll.u32 %s2040_s12, 4  ;;  %s1685_s25 = smov [#allocation8]   ;;  %s80_s24 = int_to_ptr.hbm [resolvable:$true] %s79_s24 }
  0x17   :  { %s81_s26 = sshll.u32 %s1685_s25, 4  ;;  %s82_s26 = int_to_ptr.vmem [resolvable:$true] %s81_s26 }
  0x18   :  { %87 = dma.hbm_to_vmem [thread:$0]  %s80_s24, 2048, %s82_s26, [#allocation7], %s1680_s18, %s1680_s18, %s1681_s19  }
  0x19   :  { %1674 = dma.done.wait [#allocation5], 3072  }
  0x1a   :  { %1675 = vsyncadd [#allocation5], 4294964224 }
  0x1b   :  { %1676 = dma.done.wait [#allocation7], 3072  }
  0x1c   :  { %1677 = vsyncadd [#allocation7], 4294964224  ;;  %v107_v0 = vld [vmem:[%s2029_s1] sm:$0xff]  ;;  %v108_v1 = vld [vmem:[%s2029_s1 + $0x8] sm:$0xff]  ;;  %v1686_v2 = vmov 128.0   ;;  %vm388_vm7 = vcmask 523264  }
  0x1d   :  { %111 = vadd.xlane.f32.xlu0 %v107_v0  ;;  %1550 = vrcp.f32 %v1686_v2  ;;  %v1285_v17 = vld [vmem:[#allocation4 + $0xa8] sm:$0xf]  ;;  %v1490_v18 = vld [vmem:[#allocation4 + $0xb0] sm:$0xf0]  ;;  %v1489_v19 = vld [vmem:[#allocation4 + $0xac] sm:$0xf] }
  0x1e   :  { %v1286_v20 = vor.u32 %v1490_v18, %v1285_v17  ;;  %v1287_v21 = vld [vmem:[#allocation4 + $0xb4] sm:$0xf0]  ;;  %v1293_v22 = vld [vmem:[#allocation4 + $0xb0] sm:$0xf]  ;;  %v1491_v23 = vld [vmem:[#allocation4 + $0xb8] sm:$0xf0] }
  0x1f   :  { %v1290_v24 = vor.u32 %v1489_v19, %v1287_v21  ;;  %v1294_v25 = vor.u32 %v1491_v23, %v1293_v22  ;;  %v1273_v26 = vld [vmem:[#allocation4 + $0x90] sm:$0xf]  ;;  %v1487_v27 = vld [vmem:[#allocation4 + $0x98] sm:$0xf0]  ;;  %v1486_v28 = vld [vmem:[#allocation4 + $0x94] sm:$0xf] }
  0x20   :  { %337 = vmatpush.bf16.msra.mxu0 %v1286_v20  ;;  %v1274_v29 = vor.u32 %v1487_v27, %v1273_v26  ;;  %v1275_v30 = vld [vmem:[#allocation4 + $0x9c] sm:$0xf0]  ;;  %v1281_v31 = vld [vmem:[#allocation4 + $0x98] sm:$0xf]  ;;  %v1488_v32 = vld [vmem:[#allocation4 + $0xa0] sm:$0xf0] }
  0x21   :  { %351 = vmatpush.bf16.msra.mxu1 %v1290_v24  ;;  %365 = vmatpush.bf16.msra.mxu2 %v1294_v25  ;;  %v1278_v33 = vor.u32 %v1486_v28, %v1275_v30  ;;  %v1282_v34 = vor.u32 %v1488_v32, %v1281_v31  ;;  %v1261_v35 = vld [vmem:[#allocation4 + $0x78] sm:$0xf]  ;;  %v1484_v36 = vld [vmem:[#allocation4 + $0x80] sm:$0xf0]  ;;  %v1483_v37 = vld [vmem:[#allocation4 + $0x7c] sm:$0xf] }
  0x22   :  { %v1262_v38 = vor.u32 %v1484_v36, %v1261_v35  ;;  %v1263_v39 = vld [vmem:[#allocation4 + $0x84] sm:$0xf0]  ;;  %v1269_v40 = vld [vmem:[#allocation4 + $0x80] sm:$0xf]  ;;  %v1485_v41 = vld [vmem:[#allocation4 + $0x88] sm:$0xf0] }
  0x23   :  { %v1551_v3 = vpop.eup %1550  ;;  %v1266_v42 = vor.u32 %v1483_v37, %v1263_v39  ;;  %v1270_v43 = vor.u32 %v1485_v41, %v1269_v40  ;;  %v1249_v44 = vld [vmem:[#allocation4 + $0x60] sm:$0xf]  ;;  %v1481_v45 = vld [vmem:[#allocation4 + $0x68] sm:$0xf0]  ;;  %v1480_v46 = vld [vmem:[#allocation4 + $0x64] sm:$0xf] }
  0x24   :  { %v116_v4 = vmul.f32 128.0, %v1551_v3  ;;  %vm120_vm0 = vweird.f32 %v1551_v3  ;;  %338 = vmatpush.bf16.msra.mxu0 %v1274_v29  ;;  %v1250_v47 = vor.u32 %v1481_v45, %v1249_v44  ;;  %v1251_v48 = vld [vmem:[#allocation4 + $0x6c] sm:$0xf0]  ;;  %v1257_v49 = vld [vmem:[#allocation4 + $0x68] sm:$0xf]  ;;  %vm422_vm8 = vcmask 1043456  }
  0x25   :  { %113 = vadd.xlane.f32.xlu0 %v108_v1  ;;  %352 = vmatpush.bf16.msra.mxu1 %v1278_v33  ;;  %v1482_v50 = vld [vmem:[#allocation4 + $0x70] sm:$0xf0]  ;;  %v1254_v51 = vor.u32 %v1480_v46, %v1251_v48  ;;  %v1237_v53 = vld [vmem:[#allocation4 + $0x48] sm:$0xf]  ;;  %v1477_v55 = vld [vmem:[#allocation4 + $0x4c] sm:$0xf] }
  0x26   :  { %v117_v5 = vsub.f32 1.0, %v116_v4  ;;  %366 = vmatpush.bf16.msra.mxu2 %v1282_v34  ;;  %v1258_v52 = vor.u32 %v1482_v50, %v1257_v49  ;;  %v1478_v54 = vld [vmem:[#allocation4 + $0x50] sm:$0xf0]  ;;  %v1239_v57 = vld [vmem:[#allocation4 + $0x54] sm:$0xf0]  ;;  %vm408_vm10 = vcmask 64512  }
  0x27   :  { %v1238_v56 = vor.u32 %v1478_v54, %v1237_v53  ;;  %v1245_v58 = vld [vmem:[#allocation4 + $0x50] sm:$0xf]  ;;  %v1479_v59 = vld [vmem:[#allocation4 + $0x58] sm:$0xf0]  ;;  %v1242_v60 = vor.u32 %v1477_v55, %v1239_v57  ;;  %v1227_v2 = vld [vmem:[#allocation4 + $0x3c] sm:$0xf0] }
  0x28   :  { %v118_v6 = vmul.f32 %v1551_v3, %v117_v5  ;;  %339 = vmatpush.bf16.msra.mxu0 %v1262_v38  ;;  %v1246_v61 = vor.u32 %v1479_v59, %v1245_v58  ;;  %v1225_v62 = vld [vmem:[#allocation4 + $0x30] sm:$0xf]  ;;  %v1475_v63 = vld [vmem:[#allocation4 + $0x38] sm:$0xf0]  ;;  %v1476_v4 = vld [vmem:[#allocation4 + $0x40] sm:$0xf0] }
  0x29   :  { %353 = vmatpush.bf16.msra.mxu1 %v1266_v42  ;;  %v1201_v19 = vld [vmem:[#allocation4] sm:$0xf]  ;;  %v1469_v20 = vld [vmem:[#allocation4 + $0x8] sm:$0xf0]  ;;  %v1468_v21 = vld [vmem:[#allocation4 + $0x4] sm:$0xf] }
  0x2a   :  { %v119_v7 = vadd.f32 %v1551_v3, %v118_v6  ;;  %367 = vmatpush.bf16.msra.mxu2 %v1270_v43  ;;  %v1202_v23 = vor.u32 %v1469_v20, %v1201_v19  ;;  %v1203_v24 = vld [vmem:[#allocation4 + $0xc] sm:$0xf0]  ;;  %v1209_v25 = vld [vmem:[#allocation4 + $0x8] sm:$0xf]  ;;  %v1470_v26 = vld [vmem:[#allocation4 + $0x10] sm:$0xf0] }
  0x2b   :  { %v1206_v28 = vor.u32 %v1468_v21, %v1203_v24  ;;  %v1210_v29 = vor.u32 %v1470_v26, %v1209_v25  ;;  %v1687_v25 = vmov -10000.0   ;;  %s2048_s17 = sld [smem:[#allocation13_spill]] }
  0x2c   :  { %v1795_v8 = vsel %vm120_vm0, %v1551_v3, %v119_v7  ;;  %340 = vmatpush.bf16.msra.mxu0 %v1250_v47  ;;  %v1233_v3 = vld [vmem:[#allocation4 + $0x38] sm:$0xf]  ;;  %v1542_v47 = vld [vmem:[%s2030_s2] ss:$0 sm:$0xff] }
  0x2d   :  { %354 = vmatpush.bf16.msra.mxu1 %v1254_v51  ;;  %v1234_v6 = vor.u32 %v1476_v4, %v1233_v3  ;;  %v1213_v7 = vld [vmem:[#allocation4 + $0x18] sm:$0xf] }
  0x2e   :  { %368 = vmatpush.bf16.msra.mxu2 %v1258_v52  ;;  %v1543_v52 = vld [vmem:[%s2031_s3] ss:$0 sm:$0xff]  ;;  %s379_s3 = sld [smem:[#allocation3]] }
  0x30   :  { %341 = vmatpush.bf16.msra.mxu0 %v1238_v56  ;;  %v1823_v56 = vld [vmem:[#allocation6 + $0x38] sm:$0xff] }
  0x31   :  { %355 = vmatpush.bf16.msra.mxu1 %v1242_v60 }
  0x32   :  { %369 = vmatpush.bf16.msra.mxu2 %v1246_v61 }
  0x34   :  { %v382_v24 = vstv %s379_s3 }
  0x36   :  { %370 = vmatpush.bf16.msra.mxu2 %v1234_v6 }
  0x90   :  { %v112_v9 = vpop.xlane.xlu0 %111 }
  0x91   :  { %v122_v10 = vmul.f32 %v1795_v8, %v112_v9  ;;  %v1472_v9 = vld [vmem:[#allocation4 + $0x20] sm:$0xf0] }
  0x93   :  { %v1798_v11 = vsub.f32 %v107_v0, %v122_v10  ;;  %v1474_v0 = vld [vmem:[#allocation4 + $0x34] sm:$0xf]  ;;  %v1471_v10 = vld [vmem:[#allocation4 + $0x1c] sm:$0xf] }
  0x94   :  { %v1230_v5 = vor.u32 %v1474_v0, %v1227_v2 }
  0x95   :  { %v126_v12 = vmul.f32 %v1798_v11, %v1798_v11 }
  0x96   :  { %356 = vmatpush.bf16.msra.mxu1 %v1230_v5 }
  0x97   :  { %128 = vadd.xlane.f32.xlu1 %v126_v12  ;;  %v1214_v12 = vor.u32 %v1472_v9, %v1213_v7 }
  0x98   :  { %v114_v13 = vpop.xlane.xlu0 %113 }
  0x99   :  { %v123_v14 = vmul.f32 %v1795_v8, %v114_v13  ;;  %v1215_v13 = vld [vmem:[#allocation4 + $0x24] sm:$0xf0] }
  0x9a   :  { %v1218_v17 = vor.u32 %v1471_v10, %v1215_v13 }
  0x9b   :  { %v1803_v15 = vsub.f32 %v108_v1, %v123_v14  ;;  %v1226_v1 = vor.u32 %v1475_v63, %v1225_v62  ;;  %v1221_v14 = vld [vmem:[#allocation4 + $0x20] sm:$0xf] }
  0x9c   :  { %357 = vmatpush.bf16.msra.mxu1 %v1218_v17  ;;  %v1497_v17 = vld [vmem:[#allocation6 + $0x28] sm:$0xff] }
  0x9d   :  { %v127_v16 = vmul.f32 %v1803_v15, %v1803_v15  ;;  %342 = vmatpush.bf16.msra.mxu0 %v1226_v1 }
  0x9f   :  { %130 = vadd.xlane.f32.xlu1 %v127_v16  ;;  %v1473_v16 = vld [vmem:[#allocation4 + $0x28] sm:$0xf0] }
  0xa0   :  { %v1222_v18 = vor.u32 %v1473_v16, %v1221_v14  ;;  %358 = vmatpush.bf16.msra.mxu1 %v1206_v28  ;;  %v1498_v16 = vld [vmem:[#allocation6 + $0x30] sm:$0xff] }
  0xa1   :  { %343 = vmatpush.bf16.msra.mxu0 %v1214_v12 }
  0xa2   :  { %371 = vmatpush.bf16.msra.mxu2 %v1222_v18  ;;  %v1496_v18 = vld [vmem:[#allocation6 + $0x20] sm:$0xff] }
  0xa4   :  { %549 = vmatpush.bf16.msrb.mxu1 %v1823_v56 }
  0xa5   :  { %344 = vmatpush.bf16.msra.mxu0 %v1202_v23 }
  0xa6   :  { %372 = vmatpush.bf16.msra.mxu2 %v1210_v29 }
  0xa8   :  { %550 = vmatpush.bf16.msrb.mxu1 %v1498_v16 }
  0xac   :  { %551 = vmatpush.bf16.msrb.mxu1 %v1497_v17 }
  0xb0   :  { %552 = vmatpush.bf16.msrb.mxu1 %v1496_v18 }
 0x10a   :  { %v129_v22 = vpop.xlane.xlu1 %128 }
 0x10b   :  { %v132_v27 = vmul.f32 %v129_v22, %v1795_v8  ;;  %v380_v22 = vlaneseq }
 0x10d   :  { %v134_v30 = vadd.f32 1e-12, %v132_v27  ;;  %v381_v23 = vand.u32 127, %v380_v22 }
 0x10f   :  { %1552 = vrsqrt.f32 %v134_v30  ;;  %vm142_vm2 = vweird.f32 %v134_v30  ;;  %vm383_vm9 = vcmp.lt.s32.totalorder %v381_v23, %v382_v24 }
 0x110   :  { %v384_v26 = vsel %vm383_vm9, 0.0, %v1687_v25 }
 0x112   :  { %v131_v31 = vpop.xlane.xlu1 %130 }
 0x113   :  { %v133_v32 = vmul.f32 %v131_v31, %v1795_v8 }
 0x115   :  { %v1553_v33 = vpop.eup %1552  ;;  %v135_v34 = vadd.f32 1e-12, %v133_v32 }
 0x116   :  { %v137_v35 = vmul.f32 %v1553_v33, %v134_v30  ;;  %vm143_vm1 = vweird.f32 %v1553_v33 }
 0x117   :  { %1554 = vrsqrt.f32 %v135_v34  ;;  %vm144_vm3 = vmor %vm142_vm2, %vm143_vm1  ;;  %vm152_vm5 = vweird.f32 %v135_v34 }
 0x118   :  { %v138_v36 = vmul.f32 %v1553_v33, %v137_v35 }
 0x11a   :  { %v139_v37 = vmul.f32 0.5, %v138_v36 }
 0x11c   :  { %v140_v38 = vsub.f32 1.5, %v139_v37 }
 0x11d   :  { %v1555_v39 = vpop.eup %1554 }
 0x11e   :  { %v141_v40 = vmul.f32 %v1553_v33, %v140_v38  ;;  %v147_v41 = vmul.f32 %v1555_v39, %v135_v34  ;;  %vm153_vm4 = vweird.f32 %v1555_v39 }
 0x11f   :  { %vm154_vm6 = vmor %vm152_vm5, %vm153_vm4 }
 0x120   :  { %v148_v42 = vmul.f32 %v1555_v39, %v147_v41  ;;  %v145_v43 = vsel %vm144_vm3, %v1553_v33, %v141_v40 }
 0x121   :  { %v156_v46 = vmul.f32 %v145_v43, %v1798_v11 }
 0x122   :  { %v149_v44 = vmul.f32 0.5, %v148_v42 }
 0x123   :  { %v161_v51 = vmul.f32 %v1542_v47, %v156_v46 }
 0x124   :  { %v150_v45 = vsub.f32 1.5, %v149_v44 }
 0x125   :  { %v1817_v54 = vadd.f32 %v1543_v52, %v161_v51 }
 0x126   :  { %v151_v48 = vmul.f32 %v1555_v39, %v150_v45 }
 0x128   :  { %v155_v49 = vsel %vm154_vm6, %v1555_v39, %v151_v48 }
 0x129   :  { %v157_v50 = vmul.f32 %v155_v49, %v1803_v15  ;;  %v1829_v15 = vld [vmem:[%s2033_s5] sm:$0x7]  ;;  %s1333_s5 = sld [smem:[#allocation3 + $0x1]] }
 0x12a   :  { %v203_v57 = vperm.slane %v1829_v15, 0  ;;  %v204_v58 = vperm.slane %v1829_v15, 1  ;;  %v205_v1 = vperm.slane %v1829_v15, 2  ;;  %v1492_v15 = vld [vmem:[#allocation6] sm:$0xff] }
 0x12b   :  { %v162_v53 = vmul.f32 %v1542_v47, %v157_v50 }
 0x12d   :  { %v1819_v55 = vadd.f32 %v1543_v52, %v162_v53 }
 0x12f   :  { %v168_v11 = vpack.c.bf16 %v1819_v55, %v1817_v54  ;;  %v599_v47 = vstv %s1333_s5 }
 0x130   :  { %vm600_vm11 = vcmp.lt.s32.totalorder %v381_v23, %v599_v47 }
 0x131   :  { %345 = vmatmul.bf16.vlgmr.msra.gmra.mxu0 %v168_v11  ;;  %359 = vmatmul.bf16.vlgmr.msra.gmra.mxu1 %v168_v11  ;;  %v1854_v49 = vsel %vm600_vm11, 0.0, %v1687_v25 }
 0x132   :  { %373 = vmatmul.bf16.vlgmr.msra.gmra.mxu2 %v168_v11 }
 0x1ae   :  { %v346_v59 = vpop.f32.mrf.mxu0  ;;  %v360_v60 = vpop.f32.mrf.mxu1 }
 0x1af   :  { %v347_v61 = vadd.f32 %v346_v59, %v203_v57  ;;  %v361_v62 = vadd.f32 %v360_v60, %v204_v58 }
 0x1b1   :  { %v385_v63 = vpack.c.bf16 %v347_v61, %v347_v61  ;;  %v386_v0 = vpack.c.bf16 %v361_v62, %v361_v62 }
 0x1b3   :  { %451 = vrot.lane.b32.xlu0 %v385_v63, %s1680_s18  ;;  %v393_v2 = vsel %vm388_vm7, %v386_v0, 0 }
 0x1b4   :  { %402 = vmatpush.bf16.xpose.msra.mxu3 %v393_v2 }
 0x1b5   :  { %v374_v3 = vpop.f32.mrf.mxu2 }
 0x1b6   :  { %v375_v4 = vadd.f32 %v374_v3, %v205_v1  ;;  %v362_v5 = vpop.f32.mrf.mxu1  ;;  %v348_v10 = vpop.f32.mrf.mxu0  ;;  %v1494_v3 = vld [vmem:[#allocation6 + $0x10] sm:$0xff] }
 0x1b7   :  { %v363_v6 = vadd.f32 %v362_v5, %v204_v58  ;;  %v349_v13 = vadd.f32 %v348_v10, %v203_v57 }
 0x1b8   :  { %v387_v7 = vpack.c.bf16 %v375_v4, %v375_v4  ;;  %v1493_v4 = vld [vmem:[#allocation6 + $0x8] sm:$0xff] }
 0x1b9   :  { %v603_v9 = vpack.c.bf16 %v363_v6, %v363_v6  ;;  %v602_v14 = vpack.c.bf16 %v349_v13, %v349_v13 }
 0x1ba   :  { %v424_v12 = vsel %vm422_vm8, %v387_v7, 0 }
 0x1bb   :  { %660 = vrot.lane.b32.xlu0 %v603_v9, %s1680_s18  ;;  %1295 = vmatmul.msk.bf16.vlgmr.msra.gmra.mxu3 %vm388_vm7, %v385_v63  ;;  %v609_v38 = vsel %vm388_vm7, %v603_v9, 0 }
 0x1bc   :  { %433 = vmatpush.bf16.msrb.mxu3 %v424_v12 }
 0x1bd   :  { %v376_v59 = vpop.f32.mrf.mxu2 }
 0x1be   :  { %v377_v60 = vadd.f32 %v376_v59, %v205_v1 }
 0x1c0   :  { %v604_v61 = vpack.c.bf16 %v377_v60, %v377_v60 }
 0x1c3   :  { %657 = vrot.lane.b32.xlu0 %v602_v14, %s1680_s18 }
 0x225   :  { %v452_v19 = vpop.permute.xlu0 %451 }
 0x22d   :  { %v661_v20 = vpop.permute.xlu0 %660 }
 0x22e   :  { %v666_v21 = vsel %vm388_vm7, %v661_v20, 0 }
 0x22f   :  { %675 = vmatpush.bf16.xpose.msra.mxu1 %v666_v21 }
 0x235   :  { %v658_v25 = vpop.permute.xlu0 %657 }
 0x23e   :  { %v404_v27 = vpop.f32.mrf.mxu3 }
 0x23f   :  { %v405_v28 = vadd.f32 %v404_v27, %v384_v26 }
 0x241   :  { %v409_v29 = vsel %vm408_vm10, %v405_v28, -inf }
 0x242   :  { %410 = vmax.xlane.f32.xlu2 %v409_v29 }
 0x246   :  { %v406_v30 = vpop.f32.mrf.mxu3 }
 0x25a   :  { %454 = vrot.lane.b32.xlu2 %v386_v0, %s1680_s18  ;;  %v638_v0 = vsel %vm422_vm8, %v604_v61, 0 }
 0x2b5   :  { %v411_v31 = vpop.xlane.xlu2 %410 }
 0x2b6   :  { %v412_v32 = vsub.f32 %v405_v28, %v411_v31 }
 0x2b8   :  { %v413_v33 = vmul.f32 1.442695, %v412_v32 }
 0x2ba   :  { %1556 = vpow2.f32 %v413_v33 }
 0x2bd   :  { %v455_v34 = vpop.permute.xlu2 %454 }
 0x2be   :  { %v460_v35 = vsel %vm388_vm7, %v455_v34, 0  ;;  %v1544_v34 = vld [vmem:[%s2035_s7] ss:$0 sm:$0xff] }
 0x2bf   :  { %469 = vmatpush.bf16.xpose.msra.mxu3 %v460_v35 }
 0x2c0   :  { %v1557_v36 = vpop.eup %1556 }
 0x2c1   :  { %v418_v37 = vpack.c.bf16 %v1557_v36, %v1557_v36  ;;  %v415_v48 = vsel %vm408_vm10, %v1557_v36, 0.0 }
 0x2c3   :  { %1296 = vmatmul.msk.bf16.vlgmr.msrb.gmra.mxu3 %vm408_vm10, %v418_v37 }
 0x2c7   :  { %618 = vmatpush.bf16.xpose.msrb.mxu3 %v609_v38 }
 0x2d3   :  { %1297 = vmatmul.msk.bf16.vlgmr.msra.gmra.mxu3 %vm388_vm7, %v452_v19 }
 0x2d4   :  { %723 = vmatpush.bf16.msra.mxu3 %v1823_v56  ;;  %v1495_v56 = vld [vmem:[#allocation6 + $0x18] sm:$0xff] }
 0x2d5   :  { %589 = vmatpush.bf16.msrb.mxu2 %v1495_v56 }
 0x2d8   :  { %724 = vmatpush.bf16.msra.mxu3 %v1498_v16 }
 0x2d9   :  { %590 = vmatpush.bf16.msrb.mxu2 %v1494_v3 }
 0x2dc   :  { %725 = vmatpush.bf16.msra.mxu3 %v1497_v17 }
 0x2dd   :  { %591 = vmatpush.bf16.msrb.mxu2 %v1493_v4 }
 0x2e0   :  { %726 = vmatpush.bf16.msra.mxu3 %v1496_v18 }
 0x2e1   :  { %592 = vmatpush.bf16.msrb.mxu2 %v1492_v15 }
 0x2e3   :  { %1334 = vmatmul.msk.bf16.vlgmr.msrb.gmra.mxu3 %vm388_vm7, %v602_v14 }
 0x346   :  { %v435_v39 = vpop.f32.mrf.mxu3 }
 0x34e   :  { %v437_v40 = vpop.f32.mrf.mxu3 }
 0x356   :  { %v471_v41 = vpop.f32.mrf.mxu3 }
 0x357   :  { %v472_v42 = vadd.f32 %v471_v41, %v384_v26 }
 0x359   :  { %v475_v43 = vsel %vm408_vm10, %v472_v42, -inf }
 0x35a   :  { %476 = vmax.xlane.f32.xlu1 %v475_v43 }
 0x35e   :  { %v473_v44 = vpop.f32.mrf.mxu3 }
 0x366   :  { %v620_v45 = vpop.f32.mrf.mxu3 }
 0x367   :  { %v621_v50 = vadd.f32 %v620_v45, %v1854_v49 }
 0x369   :  { %v624_v51 = vsel %vm408_vm10, %v621_v50, -inf }
 0x36e   :  { %v622_v46 = vpop.f32.mrf.mxu3 }
 0x373   :  { %486 = vrot.lane.b32.xlu1 %v387_v7, %s1680_s18 }
 0x39d   :  { %416 = vadd.xlane.f32.xlu1 %v415_v48 }
 0x3a5   :  { %625 = vmax.xlane.f32.xlu1 %v624_v51 }
 0x3cd   :  { %v477_v52 = vpop.xlane.xlu1 %476 }
 0x3ce   :  { %v478_v53 = vsub.f32 %v472_v42, %v477_v52 }
 0x3d0   :  { %v479_v11 = vmul.f32 1.442695, %v478_v53 }
 0x3d2   :  { %1558 = vpow2.f32 %v479_v11 }
 0x3d8   :  { %v1559_v57 = vpop.eup %1558 }
 0x3d9   :  { %v481_v58 = vsel %vm408_vm10, %v1559_v57, 0.0  ;;  %v484_v2 = vpack.c.bf16 %v1559_v57, %v1559_v57 }
 0x3da   :  { %482 = vadd.xlane.f32.xlu2 %v481_v58 }
 0x3e5   :  { %v487_v62 = vpop.permute.xlu1 %486 }
 0x3e6   :  { %v492_v63 = vsel %vm422_vm8, %v487_v62, 0 }
 0x3e7   :  { %501 = vmatpush.bf16.msrb.mxu0 %v492_v63 }
 0x3ea   :  { %1298 = vmatmul.msk.bf16.vlgmr.msrb.gmra.mxu0 %vm408_vm10, %v484_v2 }
 0x3eb   :  { %647 = vmatpush.bf16.msra.mxu0 %v638_v0 }
 0x3ef   :  { %739 = vmatpush.bf16.msrb.mxu0 %v1495_v56 }
 0x3f2   :  { %692 = vrot.lane.b32.xlu2 %v604_v61, %s1680_s18 }
 0x3f3   :  { %740 = vmatpush.bf16.msrb.mxu0 %v1494_v3 }
 0x3f7   :  { %741 = vmatpush.bf16.msrb.mxu0 %v1493_v4  ;;  %v1398_v4 = vld [vmem:[%s2038_s10 + $0x70] sm:$0xf] }
 0x3fb   :  { %742 = vmatpush.bf16.msrb.mxu0 %v1492_v15  ;;  %v1515_v15 = vld [vmem:[%s2038_s10 + $0x74] sm:$0xf0] }
 0x410   :  { %v417_v1 = vpop.xlane.xlu1 %416 }
 0x411   :  { %1560 = vrcp.f32 %v417_v1  ;;  %v1514_v1 = vld [vmem:[%s2038_s10 + $0x74] sm:$0xf] }
 0x417   :  { %v1561_v5 = vpop.eup %1560 }
 0x418   :  { %v440_v6 = vmul.f32 %v1561_v5, %v435_v39  ;;  %v626_v7 = vpop.xlane.xlu1 %625  ;;  %v1399_v5 = vor.u32 %v1515_v15, %v1398_v4 }
 0x419   :  { %v627_v9 = vsub.f32 %v621_v50, %v626_v7 }
 0x41a   :  { %v441_v10 = vpack.c.bf16 %v440_v6, %v440_v6  ;;  %v1400_v6 = vld [vmem:[%s2038_s10 + $0x78] sm:$0xf0] }
 0x41b   :  { %v628_v12 = vmul.f32 1.442695, %v627_v9 }
 0x41c   :  { %1332 = vmatmul.msk.bf16.vlgmr.msrb.gmra.mxu2 %vm388_vm7, %v441_v10 }
 0x41d   :  { %1562 = vpow2.f32 %v628_v12 }
 0x423   :  { %v1563_v13 = vpop.eup %1562 }
 0x424   :  { %v633_v14 = vpack.c.bf16 %v1563_v13, %v1563_v13  ;;  %v630_v16 = vsel %vm408_vm10, %v1563_v13, 0.0  ;;  %v1390_v13 = vld [vmem:[%s2038_s10 + $0x60] sm:$0xf] }
 0x425   :  { %631 = vadd.xlane.f32.xlu2 %v630_v16  ;;  %v1512_v16 = vld [vmem:[%s2038_s10 + $0x64] sm:$0xf] }
 0x426   :  { %1335 = vmatmul.msk.bf16.vlgmr.msra.gmra.mxu0 %vm408_vm10, %v633_v14  ;;  %v1513_v14 = vld [vmem:[%s2038_s10 + $0x64] sm:$0xf0] }
 0x44d   :  { %v483_v17 = vpop.xlane.xlu2 %482 }
 0x44e   :  { %1564 = vrcp.f32 %v483_v17  ;;  %v1391_v17 = vor.u32 %v1513_v14, %v1390_v13  ;;  %v1545_v13 = vld [vmem:[%s2036_s8] ss:$0 sm:$0xff] }
 0x454   :  { %v1565_v20 = vpop.eup %1564 }
 0x455   :  { %v693_v18 = vpop.permute.xlu2 %692 }
 0x456   :  { %v698_v19 = vsel %vm422_vm8, %v693_v18, 0  ;;  %v1392_v18 = vld [vmem:[%s2038_s10 + $0x68] sm:$0xf0] }
 0x457   :  { %707 = vmatpush.bf16.msra.mxu2 %v698_v19  ;;  %v1395_v19 = vor.u32 %v1512_v16, %v1392_v18 }
 0x467   :  { %v503_v21 = vpop.f32.mrf.mxu0 }
 0x468   :  { %v508_v22 = vmul.f32 %v1565_v20, %v503_v21  ;;  %v1382_v20 = vld [vmem:[%s2038_s10 + $0x50] sm:$0xf]  ;;  %v1511_v21 = vld [vmem:[%s2038_s10 + $0x54] sm:$0xf0] }
 0x46a   :  { %v509_v23 = vpack.c.bf16 %v508_v22, %v508_v22  ;;  %v1510_v22 = vld [vmem:[%s2038_s10 + $0x54] sm:$0xf] }
 0x46c   :  { %1315 = vmatmul.msk.bf16.vlgmr.msrb.gmra.mxu1 %vm388_vm7, %v509_v23  ;;  %v1383_v23 = vor.u32 %v1511_v21, %v1382_v20 }
 0x46d   :  { %911 = vmatpush.bf16.msrb.mxu1 %v1399_v5 }
 0x46f   :  { %v505_v24 = vpop.f32.mrf.mxu0 }
 0x470   :  { %v1384_v24 = vld [vmem:[%s2038_s10 + $0x58] sm:$0xf0] }
 0x471   :  { %912 = vmatpush.bf16.msrb.mxu1 %v1391_v17 }
 0x475   :  { %913 = vmatpush.bf16.msrb.mxu1 %v1383_v23  ;;  %v1523_v23 = vld [vmem:[#allocation8 + $0x38] sm:$0xff] }
 0x476   :  { %1109 = vmatpush.bf16.msrb.mxu3 %v1523_v23 }
 0x47c   :  { %1336 = vmatmul.msk.bf16.vlgmr.msra.gmra.mxu1 %vm388_vm7, %v658_v25 }
 0x498   :  { %v632_v26 = vpop.xlane.xlu2 %631 }
 0x499   :  { %1566 = vrcp.f32 %v632_v26  ;;  %v1387_v26 = vor.u32 %v1510_v22, %v1384_v24  ;;  %v1522_v24 = vld [vmem:[#allocation8 + $0x30] sm:$0xff] }
 0x49a   :  { %1110 = vmatpush.bf16.msrb.mxu3 %v1522_v24 }
 0x49f   :  { %v594_v27 = vpop.f32.mrf.mxu2  ;;  %v1567_v28 = vpop.eup %1566 }
 0x4a3   :  { %v649_v29 = vpop.f32.mrf.mxu0 }
 0x4a4   :  { %v654_v30 = vmul.f32 %v1567_v28, %v649_v29  ;;  %v1509_v28 = vld [vmem:[%s2038_s10 + $0x44] sm:$0xf0]  ;;  %v1508_v29 = vld [vmem:[%s2038_s10 + $0x44] sm:$0xf] }
 0x4a6   :  { %v655_v31 = vpack.c.bf16 %v654_v30, %v654_v30 }
 0x4a7   :  { %v596_v32 = vpop.f32.mrf.mxu2 }
 0x4a8   :  { %1339 = vmatmul.msk.bf16.vlgmr.msrb.gmra.mxu0 %vm388_vm7, %v655_v31  ;;  %v1376_v32 = vld [vmem:[%s2038_s10 + $0x48] sm:$0xf0] }
 0x4ab   :  { %v651_v33 = vpop.f32.mrf.mxu0 }
 0x4ac   :  { %v1379_v33 = vor.u32 %v1508_v29, %v1376_v32  ;;  %v1519_v29 = vld [vmem:[#allocation8 + $0x18] sm:$0xff] }
 0x4ad   :  { %v1527_v32 = vld [vmem:[#allocation8 + $0x58] sm:$0xff] }
 0x4e9   :  { %v554_v35 = vpop.f32.mrf.mxu1 }
 0x4ea   :  { %v595_v36 = vadd.f32 %v594_v27, %v554_v35  ;;  %v1374_v27 = vld [vmem:[%s2038_s10 + $0x40] sm:$0xf]  ;;  %v1507_v35 = vld [vmem:[%s2038_s10 + $0x34] sm:$0xf0] }
 0x4eb   :  { %v1375_v31 = vor.u32 %v1509_v28, %v1374_v27  ;;  %v1520_v27 = vld [vmem:[#allocation8 + $0x20] sm:$0xff]  ;;  %v1529_v28 = vld [vmem:[#allocation8 + $0x68] sm:$0xff] }
 0x4ec   :  { %v752_v37 = vadd.f32 %v1544_v34, %v595_v36  ;;  %v1506_v36 = vld [vmem:[%s2038_s10 + $0x34] sm:$0xf] }
 0x4ed   :  { %914 = vmatpush.bf16.msrb.mxu1 %v1375_v31  ;;  %v1518_v31 = vld [vmem:[#allocation8 + $0x10] sm:$0xff] }
 0x4ee   :  { %v754_v38 = vadd.f32 %v752_v37, %v1817_v54 }
 0x4f0   :  { %758 = vadd.xlane.f32.xlu1 %v754_v38 }
 0x4f1   :  { %v556_v39 = vpop.f32.mrf.mxu1 }
 0x4f2   :  { %v1368_v39 = vld [vmem:[%s2038_s10 + $0x38] sm:$0xf0] }
 0x4f9   :  { %v677_v40 = vpop.f32.mrf.mxu1 }
 0x4fa   :  { %v678_v41 = vadd.f32 %v677_v40, %v1854_v49  ;;  %v1371_v40 = vor.u32 %v1506_v36, %v1368_v39  ;;  %v1516_v36 = vld [vmem:[#allocation8] sm:$0xff] }
 0x4fc   :  { %v681_v42 = vsel %vm408_vm10, %v678_v41, -inf }
 0x4fd   :  { %682 = vmax.xlane.f32.xlu0 %v681_v42  ;;  %v1505_v42 = vld [vmem:[%s2038_s10 + $0x24] sm:$0xf0] }
 0x501   :  { %v679_v43 = vpop.f32.mrf.mxu1 }
 0x502   :  { %v1504_v43 = vld [vmem:[%s2038_s10 + $0x24] sm:$0xf] }
 0x525   :  { %v744_v44 = vpop.f32.mrf.mxu0 }
 0x52d   :  { %v746_v45 = vpop.f32.mrf.mxu0 }
 0x52e   :  { %v1360_v45 = vld [vmem:[%s2038_s10 + $0x28] sm:$0xf0] }
 0x563   :  { %v759_v46 = vpop.xlane.xlu1 %758 }
 0x564   :  { %v762_v47 = vmul.f32 %v759_v46, %v1795_v8  ;;  %v1363_v46 = vor.u32 %v1504_v43, %v1360_v45 }
 0x566   :  { %v1879_v48 = vsub.f32 %v754_v38, %v762_v47  ;;  %v1350_v47 = vld [vmem:[%s2038_s10 + $0x10] sm:$0xf] }
 0x568   :  { %v766_v50 = vmul.f32 %v1879_v48, %v1879_v48 }
 0x56a   :  { %768 = vadd.xlane.f32.xlu1 %v766_v50  ;;  %v1503_v50 = vld [vmem:[%s2038_s10 + $0x14] sm:$0xf0] }
 0x570   :  { %v683_v54 = vpop.xlane.xlu0 %682 }
 0x571   :  { %v684_v51 = vsub.f32 %v678_v41, %v683_v54  ;;  %v1358_v41 = vld [vmem:[%s2038_s10 + $0x20] sm:$0xf]  ;;  %v1502_v54 = vld [vmem:[%s2038_s10 + $0x14] sm:$0xf] }
 0x573   :  { %v685_v52 = vmul.f32 1.442695, %v684_v51  ;;  %v1351_v51 = vor.u32 %v1503_v50, %v1350_v47 }
 0x575   :  { %1568 = vpow2.f32 %v685_v52  ;;  %v1352_v52 = vld [vmem:[%s2038_s10 + $0x18] sm:$0xf0] }
 0x57b   :  { %v1569_v49 = vpop.eup %1568 }
 0x57c   :  { %v690_v53 = vpack.c.bf16 %v1569_v49, %v1569_v49  ;;  %v687_v11 = vsel %vm408_vm10, %v1569_v49, 0.0  ;;  %v1342_v49 = vld [vmem:[%s2038_s10] sm:$0xf] }
 0x57d   :  { %688 = vadd.xlane.f32.xlu0 %v687_v11  ;;  %v1355_v11 = vor.u32 %v1502_v54, %v1352_v52 }
 0x57e   :  { %1337 = vmatmul.msk.bf16.vlgmr.msra.gmra.mxu2 %vm408_vm10, %v690_v53  ;;  %v1501_v53 = vld [vmem:[%s2038_s10 + $0x4] sm:$0xf0] }
 0x5dd   :  { %v769_v25 = vpop.xlane.xlu1 %768 }
 0x5de   :  { %v772_v30 = vmul.f32 %v769_v25, %v1795_v8  ;;  %v1521_v25 = vld [vmem:[#allocation8 + $0x28] sm:$0xff] }
 0x5df   :  { %1111 = vmatpush.bf16.msrb.mxu3 %v1521_v25 }
 0x5e0   :  { %v774_v37 = vadd.f32 1e-12, %v772_v30  ;;  %v1528_v30 = vld [vmem:[#allocation8 + $0x60] sm:$0xff] }
 0x5e2   :  { %vm782_vm13 = vweird.f32 %v774_v37 }
 0x5e3   :  { %1112 = vmatpush.bf16.msrb.mxu3 %v1520_v27 }
 0x5e7   :  { %1113 = vmatpush.bf16.msrb.mxu3 %v1519_v29 }
 0x5eb   :  { %1114 = vmatpush.bf16.msrb.mxu3 %v1518_v31 }
 0x5f0   :  { %v689_v56 = vpop.xlane.xlu0 %688 }
 0x5f1   :  { %1570 = vrcp.f32 %v689_v56  ;;  %v1500_v56 = vld [vmem:[%s2038_s10 + $0x4] sm:$0xf] }
 0x5f2   :  { %1572 = vrsqrt.f32 %v774_v37 }
 0x5f7   :  { %v1571_v57 = vpop.eup %1570 }
 0x601   :  { %v709_v58 = vpop.f32.mrf.mxu2 }
 0x602   :  { %v714_v59 = vmul.f32 %v1571_v57, %v709_v58  ;;  %v1344_v57 = vld [vmem:[%s2038_s10 + $0x8] sm:$0xf0]  ;;  %v1573_v58 = vpop.eup %1572 }
 0x603   :  { %vm783_vm12 = vweird.f32 %v1573_v58 }
 0x604   :  { %v715_v60 = vpack.c.bf16 %v714_v59, %v714_v59  ;;  %v1343_v59 = vor.u32 %v1501_v53, %v1342_v49  ;;  %vm784_vm14 = vmor %vm782_vm13, %vm783_vm12 }
 0x606   :  { %1338 = vmatmul.msk.bf16.vlgmr.msra.gmra.mxu3 %vm388_vm7, %v715_v60  ;;  %v1347_v60 = vor.u32 %v1500_v56, %v1344_v57 }
 0x609   :  { %v711_v61 = vpop.f32.mrf.mxu2 }
 0x60a   :  { %v777_v61 = vmul.f32 %v1573_v58, %v774_v37 }
 0x689   :  { %v728_v62 = vpop.f32.mrf.mxu3 }
 0x68a   :  { %v745_v63 = vadd.f32 %v744_v44, %v728_v62  ;;  %v1359_v44 = vor.u32 %v1505_v42, %v1358_v41  ;;  %v778_v62 = vmul.f32 %v1573_v58, %v777_v61  ;;  %v1524_v41 = vld [vmem:[#allocation8 + $0x40] sm:$0xff] }
 0x68c   :  { %v753_v0 = vadd.f32 %v1544_v34, %v745_v63  ;;  %v1366_v34 = vld [vmem:[%s2038_s10 + $0x30] sm:$0xf] }
 0x68d   :  { %v1367_v38 = vor.u32 %v1507_v35, %v1366_v34  ;;  %v825_v34 = vld [vmem:[%s2039_s11] sm:$0x3]  ;;  %v1526_v35 = vld [vmem:[#allocation8 + $0x50] sm:$0xff] }
 0x68e   :  { %v755_v2 = vadd.f32 %v753_v0, %v1819_v55  ;;  %v1403_v55 = vor.u32 %v1514_v1, %v1400_v6  ;;  %v827_v37 = vperm.slane %v825_v34, 0  ;;  %v828_v43 = vperm.slane %v825_v34, 1 }
 0x68f   :  { %915 = vmatpush.bf16.msrb.mxu1 %v1367_v38  ;;  %v1525_v38 = vld [vmem:[#allocation8 + $0x48] sm:$0xff] }
 0x690   :  { %760 = vadd.xlane.f32.xlu0 %v755_v2  ;;  %925 = vmatpush.bf16.msrb.mxu2 %v1403_v55 }
 0x691   :  { %v730_v3 = vpop.f32.mrf.mxu3 }
 0x692   :  { %v779_v3 = vmul.f32 0.5, %v778_v62 }
 0x693   :  { %916 = vmatpush.bf16.msrb.mxu1 %v1359_v44 }
 0x694   :  { %926 = vmatpush.bf16.msrb.mxu2 %v1395_v19  ;;  %v780_v4 = vsub.f32 1.5, %v779_v3  ;;  %v1546_v19 = vld [vmem:[%s2048_s17] ss:$0 sm:$0xff] }
 0x696   :  { %v781_v1 = vmul.f32 %v1573_v58, %v780_v4 }
 0x697   :  { %917 = vmatpush.bf16.msrb.mxu1 %v1351_v51 }
 0x698   :  { %927 = vmatpush.bf16.msrb.mxu2 %v1387_v26  ;;  %v785_v55 = vsel %vm784_vm14, %v1573_v58, %v781_v1  ;;  %v1530_v26 = vld [vmem:[#allocation8 + $0x70] sm:$0xff] }
 0x69b   :  { %918 = vmatpush.bf16.msrb.mxu1 %v1343_v59 }
 0x69c   :  { %928 = vmatpush.bf16.msrb.mxu2 %v1379_v33  ;;  %v1517_v33 = vld [vmem:[#allocation8 + $0x8] sm:$0xff] }
 0x69d   :  { %1115 = vmatpush.bf16.msrb.mxu3 %v1517_v33 }
 0x6a0   :  { %929 = vmatpush.bf16.msrb.mxu2 %v1371_v40 }
 0x6a1   :  { %1116 = vmatpush.bf16.msrb.mxu3 %v1516_v36 }
 0x6a4   :  { %930 = vmatpush.bf16.msrb.mxu2 %v1363_v46 }
 0x6a8   :  { %931 = vmatpush.bf16.msrb.mxu2 %v1355_v11 }
 0x6ac   :  { %932 = vmatpush.bf16.msrb.mxu2 %v1347_v60 }
 0x703   :  { %v761_v7 = vpop.xlane.xlu0 %760 }
 0x704   :  { %v763_v9 = vmul.f32 %v761_v7, %v1795_v8 }
 0x706   :  { %v1900_v10 = vsub.f32 %v755_v2, %v763_v9 }
 0x708   :  { %v767_v12 = vmul.f32 %v1900_v10, %v1900_v10 }
 0x70a   :  { %770 = vadd.xlane.f32.xlu0 %v767_v12  ;;  %v796_v12 = vmul.f32 %v785_v55, %v1879_v48 }
 0x70c   :  { %v801_v18 = vmul.f32 %v1545_v13, %v796_v12 }
 0x70e   :  { %v1998_v21 = vadd.f32 %v1546_v19, %v801_v18 }
 0x77d   :  { %v771_v63 = vpop.xlane.xlu0 %770 }
 0x77e   :  { %v773_v0 = vmul.f32 %v771_v63, %v1795_v8 }
 0x780   :  { %v775_v2 = vadd.f32 1e-12, %v773_v0 }
 0x782   :  { %1574 = vrsqrt.f32 %v775_v2  ;;  %vm792_vm0 = vweird.f32 %v775_v2 }
 0x788   :  { %v1575_v15 = vpop.eup %1574 }
 0x789   :  { %v787_v5 = vmul.f32 %v1575_v15, %v775_v2  ;;  %vm793_vm15 = vweird.f32 %v1575_v15 }
 0x78a   :  { %vm794_vm1 = vmor %vm792_vm0, %vm793_vm15 }
 0x78b   :  { %v788_v6 = vmul.f32 %v1575_v15, %v787_v5 }
 0x78d   :  { %v789_v7 = vmul.f32 0.5, %v788_v6 }
 0x78f   :  { %v790_v9 = vsub.f32 1.5, %v789_v7 }
 0x791   :  { %v791_v14 = vmul.f32 %v1575_v15, %v790_v9 }
 0x793   :  { %v795_v16 = vsel %vm794_vm1, %v1575_v15, %v791_v14 }
 0x794   :  { %v797_v17 = vmul.f32 %v795_v16, %v1900_v10  ;;  %v1531_v10 = vld [vmem:[#allocation8 + $0x78] sm:$0xff] }
 0x795   :  { %1123 = vmatpush.bf16.msra.mxu0 %v1531_v10 }
 0x796   :  { %v802_v20 = vmul.f32 %v1545_v13, %v797_v17 }
 0x798   :  { %v2000_v22 = vadd.f32 %v1546_v19, %v802_v20 }
 0x799   :  { %1124 = vmatpush.bf16.msra.mxu0 %v1530_v26  ;;  %v1547_v26 = vld [vmem:[%s2041_s13] ss:$0 sm:$0xff] }
 0x79a   :  { %v808_v48 = vpack.c.bf16 %v2000_v22, %v1998_v21 }
 0x79c   :  { %919 = vmatmul.bf16.vlgmr.msrb.gmra.mxu1 %v808_v48  ;;  %933 = vmatmul.bf16.vlgmr.msrb.gmra.mxu2 %v808_v48 }
 0x79d   :  { %1125 = vmatpush.bf16.msra.mxu0 %v1529_v28 }
 0x7a1   :  { %1126 = vmatpush.bf16.msra.mxu0 %v1528_v30 }
 0x7a5   :  { %1127 = vmatpush.bf16.msra.mxu0 %v1527_v32 }
 0x7a9   :  { %1128 = vmatpush.bf16.msra.mxu0 %v1526_v35 }
 0x7ad   :  { %1129 = vmatpush.bf16.msra.mxu0 %v1525_v38 }
 0x7b1   :  { %1130 = vmatpush.bf16.msra.mxu0 %v1524_v41 }
 0x819   :  { %v920_v39 = vpop.f32.mrf.mxu1 }
 0x81a   :  { %v921_v40 = vadd.f32 %v920_v39, %v827_v37 }
 0x81c   :  { %v943_v42 = vmul.f32 0.044715, %v921_v40  ;;  %v939_v7 = vmul.f32 0.5, %v921_v40 }
 0x81e   :  { %v947_v44 = vmul.f32 %v943_v42, %v921_v40 }
 0x81f   :  { %v934_v45 = vpop.f32.mrf.mxu2 }
 0x820   :  { %v951_v46 = vmul.f32 %v947_v44, %v921_v40  ;;  %v935_v47 = vadd.f32 %v934_v45, %v828_v43 }
 0x821   :  { %v922_v50 = vpop.f32.mrf.mxu1 }
 0x822   :  { %v955_v54 = vadd.f32 %v951_v46, %v921_v40  ;;  %v944_v51 = vmul.f32 0.044715, %v935_v47  ;;  %v923_v52 = vadd.f32 %v922_v50, %v827_v37  ;;  %v940_v20 = vmul.f32 0.5, %v935_v47 }
 0x824   :  { %v948_v49 = vmul.f32 %v944_v51, %v935_v47  ;;  %v945_v53 = vmul.f32 0.044715, %v923_v52  ;;  %v959_v11 = vmul.f32 0.7978846, %v955_v54  ;;  %v941_v9 = vmul.f32 0.5, %v923_v52 }
 0x826   :  { %v952_v56 = vmul.f32 %v948_v49, %v935_v47  ;;  %v949_v57 = vmul.f32 %v945_v53, %v923_v52  ;;  %1576 = vtanh.f32 %v959_v11 }
 0x827   :  { %v936_v58 = vpop.f32.mrf.mxu2 }
 0x828   :  { %v956_v59 = vadd.f32 %v952_v56, %v935_v47  ;;  %v953_v60 = vmul.f32 %v949_v57, %v923_v52  ;;  %v937_v61 = vadd.f32 %v936_v58, %v828_v43  ;;  %v1548_v58 = vld [vmem:[%s2042_s14] ss:$0 sm:$0xff] }
 0x82a   :  { %v957_v62 = vadd.f32 %v953_v60, %v923_v52  ;;  %v946_v63 = vmul.f32 0.044715, %v937_v61  ;;  %v960_v0 = vmul.f32 0.7978846, %v956_v59  ;;  %v942_v48 = vmul.f32 0.5, %v937_v61 }
 0x82c   :  { %v961_v2 = vmul.f32 0.7978846, %v957_v62  ;;  %v950_v3 = vmul.f32 %v946_v63, %v937_v61  ;;  %v1577_v15 = vpop.eup %1576 }
 0x82d   :  { %v967_v6 = vadd.f32 1.0, %v1577_v15 }
 0x82e   :  { %v954_v4 = vmul.f32 %v950_v3, %v937_v61  ;;  %1578 = vtanh.f32 %v961_v2 }
 0x82f   :  { %1580 = vtanh.f32 %v960_v0  ;;  %v971_v14 = vmul.f32 %v967_v6, %v939_v7 }
 0x830   :  { %v958_v1 = vadd.f32 %v954_v4, %v937_v61 }
 0x832   :  { %v962_v5 = vmul.f32 0.7978846, %v958_v1 }
 0x834   :  { %v1579_v55 = vpop.eup %1578  ;;  %1582 = vtanh.f32 %v962_v5 }
 0x835   :  { %v969_v12 = vadd.f32 1.0, %v1579_v55  ;;  %v1581_v13 = vpop.eup %1580 }
 0x836   :  { %v968_v18 = vadd.f32 1.0, %v1581_v13 }
 0x837   :  { %v973_v16 = vmul.f32 %v969_v12, %v941_v9 }
 0x838   :  { %v972_v24 = vmul.f32 %v968_v18, %v940_v20 }
 0x839   :  { %v975_v17 = vpack.c.bf16 %v973_v16, %v971_v14 }
 0x83a   :  { %v1583_v19 = vpop.eup %1582 }
 0x83b   :  { %1117 = vmatmul.bf16.vlgmr.msrb.gmra.mxu3 %v975_v17  ;;  %v970_v23 = vadd.f32 1.0, %v1583_v19 }
 0x83d   :  { %v974_v10 = vmul.f32 %v970_v23, %v942_v48 }
 0x83f   :  { %v976_v25 = vpack.c.bf16 %v974_v10, %v972_v24 }
 0x841   :  { %1131 = vmatmul.bf16.vlgmr.msra.gmra.mxu0 %v976_v25 }
 0x8be   :  { %v1118_v27 = vpop.f32.mrf.mxu3  ;;  %v1132_v28 = vpop.f32.mrf.mxu0 }
 0x8bf   :  { %v1119_v29 = vadd.f32 %v1547_v26, %v1118_v27 }
 0x8c1   :  { %v1133_v30 = vadd.f32 %v1132_v28, %v1119_v29 }
 0x8c3   :  { %v1137_v31 = vadd.f32 %v1133_v30, %v1998_v21 }
 0x8c5   :  { %1141 = vadd.xlane.f32.xlu1 %v1137_v31 }
 0x8c6   :  { %v1120_v32 = vpop.f32.mrf.mxu3  ;;  %v1134_v34 = vpop.f32.mrf.mxu0 }
 0x8c7   :  { %v1121_v33 = vadd.f32 %v1547_v26, %v1120_v32 }
 0x8c9   :  { %v1135_v35 = vadd.f32 %v1134_v34, %v1121_v33 }
 0x8cb   :  { %v1138_v36 = vadd.f32 %v1135_v35, %v2000_v22 }
 0x8cd   :  { %1143 = vadd.xlane.f32.xlu0 %v1138_v36 }
 0x938   :  { %v1142_v37 = vpop.xlane.xlu1 %1141 }
 0x939   :  { %v1145_v38 = vmul.f32 %v1142_v37, %v1795_v8 }
 0x93b   :  { %v1147_v39 = vsub.f32 %v1137_v31, %v1145_v38 }
 0x93d   :  { %v1149_v40 = vmul.f32 %v1147_v39, %v1147_v39 }
 0x93f   :  { %1151 = vadd.xlane.f32.xlu1 %v1149_v40 }
 0x940   :  { %v1144_v41 = vpop.xlane.xlu0 %1143 }
 0x941   :  { %v1146_v42 = vmul.f32 %v1144_v41, %v1795_v8 }
 0x943   :  { %v1148_v43 = vsub.f32 %v1138_v36, %v1146_v42 }
 0x945   :  { %v1150_v44 = vmul.f32 %v1148_v43, %v1148_v43 }
 0x947   :  { %1153 = vadd.xlane.f32.xlu0 %v1150_v44 }
 0x9b2   :  { %v1152_v21 = vpop.xlane.xlu1 %1151 }
 0x9b3   :  { %v1155_v45 = vmul.f32 %v1152_v21, %v1795_v8 }
 0x9b5   :  { %v1157_v46 = vadd.f32 1e-12, %v1155_v45 }
 0x9b7   :  { %1584 = vrsqrt.f32 %v1157_v46  ;;  %vm1165_vm3 = vweird.f32 %v1157_v46 }
 0x9ba   :  { %v1154_v47 = vpop.xlane.xlu0 %1153 }
 0x9bb   :  { %v1156_v22 = vmul.f32 %v1154_v47, %v1795_v8  ;;  %v1549_v8 = vld [vmem:[%s2043_s15] ss:$0 sm:$0xff] }
 0x9bd   :  { %v1585_v50 = vpop.eup %1584  ;;  %v1158_v54 = vadd.f32 1e-12, %v1156_v22 }
 0x9be   :  { %v1160_v51 = vmul.f32 %v1585_v50, %v1157_v46  ;;  %vm1166_vm2 = vweird.f32 %v1585_v50 }
 0x9bf   :  { %1586 = vrsqrt.f32 %v1158_v54  ;;  %vm1167_vm4 = vmor %vm1165_vm3, %vm1166_vm2  ;;  %vm1175_vm6 = vweird.f32 %v1158_v54 }
 0x9c0   :  { %v1161_v52 = vmul.f32 %v1585_v50, %v1160_v51 }
 0x9c2   :  { %v1162_v49 = vmul.f32 0.5, %v1161_v52 }
 0x9c4   :  { %v1163_v53 = vsub.f32 1.5, %v1162_v49 }
 0x9c5   :  { %v1587_v11 = vpop.eup %1586 }
 0x9c6   :  { %v1164_v56 = vmul.f32 %v1585_v50, %v1163_v53  ;;  %v1170_v57 = vmul.f32 %v1587_v11, %v1158_v54  ;;  %vm1176_vm5 = vweird.f32 %v1587_v11 }
 0x9c7   :  { %vm1177_vm7 = vmor %vm1175_vm6, %vm1176_vm5 }
 0x9c8   :  { %v1168_v59 = vsel %vm1167_vm4, %v1585_v50, %v1164_v56  ;;  %v1171_v60 = vmul.f32 %v1587_v11, %v1170_v57 }
 0x9c9   :  { %v1179_v61 = vmul.f32 %v1168_v59, %v1147_v39 }
 0x9ca   :  { %v1172_v62 = vmul.f32 0.5, %v1171_v60 }
 0x9cb   :  { %v1184_v63 = vmul.f32 %v1548_v58, %v1179_v61 }
 0x9cc   :  { %v1173_v0 = vsub.f32 1.5, %v1172_v62 }
 0x9cd   :  { %v1189_v2 = vadd.f32 %v1549_v8, %v1184_v63 }
 0x9ce   :  { %v1174_v3 = vmul.f32 %v1587_v11, %v1173_v0 }
 0x9cf   :  { %1191 = vst [vmem:[%s2044_s16] sm:$0xff] %v1189_v2 }
 0x9d0   :  { %v1178_v4 = vsel %vm1177_vm7, %v1587_v11, %v1174_v3 }
 0x9d1   :  { %v1180_v15 = vmul.f32 %v1178_v4, %v1148_v43 }
 0x9d3   :  { %v1185_v1 = vmul.f32 %v1548_v58, %v1180_v15 }
 0x9d5   :  { %v1190_v5 = vadd.f32 %v1549_v8, %v1185_v1 }
 0x9d7   :  { %1192 = vst [vmem:[%s2044_s16 + $0x8] sm:$0xff] %v1190_v5 }
 0x9d8   :  { %1197 = vsyncpa [#allocation5], 1 }
 0x9d9   :  { %1198 = vsyncpa [#allocation7], 1 }

</bundles_post_ra>
